<compile_context>
chip_gen: v6e
topology: v6e:2x2x1
jax: 0.10.0
libtpu: 0.0.40
codegen_flags: <defaults>
</compile_context>

<pallas_src>
import math
import functools

import numpy as np
import jax
import jax.numpy as jnp
from jax import lax
from jax.experimental import pallas as pl
from jax.experimental.pallas import tpu as pltpu

# ----------------------------- model config --------------------------------
VOCAB  = 256     # input_size (vocabulary)
EMB    = 128     # embedding_size
HEADS  = 8       # nheads            (head_dim = 16)
HIDDEN = 256     # hidden_dim        (transformer FFN width)
LAYERS = 2       # num_encoder_layers (small for the demo; module default is 6)
SEQ    = 8
BATCH  = 2
LN_EPS = 1e-5
NEG_INF = -1e30  # additive causal-mask value (exp() underflows to 0 like -inf)

_LAYER_PARAM_ORDER = ("wq", "bq", "wk", "bk", "wv", "bv", "wo", "bo",
                      "ln1_g", "ln1_b", "w1", "b1", "w2", "b2", "ln2_g", "ln2_b")


# ------------------------------ kernel helpers ------------------------------
def _layer_norm(x, gamma, beta):
    mu = jnp.mean(x, axis=-1, keepdims=True)
    var = jnp.mean((x - mu) ** 2, axis=-1, keepdims=True)
    return (x - mu) * jax.lax.rsqrt(var + LN_EPS) * gamma + beta


# ------------------------------- fused kernel -------------------------------
def _fused_forward_kernel(ids_ref, emb_ref, w_attn_ref, w1_ref, w2_ref,
                          wd_ref, slab_ref, out_ref, s_scr, ctx_scr,
                          *, num_layers, num_heads, batch, scale):
    """Whole PoemGenerator forward on one (M, E) = (N*S, EMB) activation tile.

    Rows are seq-major flattened: row i = s*N + n.
    slab layout (f32, width 3E):
      rows [0, M)                 : packed positional encoding (lanes 0:E)
      rows [M + 8l, M + 8l + 8)   : bqkv | bo | b1 | b2 | ln1g | ln1b | ln2g | ln2b
      row  M + 8*num_layers       : decoder bias (lanes 0:VOCAB)
    """
    f32, bf16 = jnp.float32, jnp.bfloat16
    M = ids_ref.shape[0]
    V, E = emb_ref.shape
    HID = w1_ref.shape[2]
    dh = E // num_heads
    HM = num_heads * M
    inv_sqrt_dh = 1.0 / math.sqrt(dh)

    # M and batch are powers of two in this config -> shift/and index math
    # (avoids vector integer div/rem on the VPU).
    assert M & (M - 1) == 0 and batch & (batch - 1) == 0
    m_bits = M.bit_length() - 1

    # ---- block-diagonal causal mask, lane-dense over all heads (built in-kernel)
    i_idx = lax.broadcasted_iota(jnp.int32, (M, HM), 0)          # query row
    lane  = lax.broadcasted_iota(jnp.int32, (M, HM), 1)
    j_idx = lane & (M - 1)                                       # key row = lane % M
    ok = (((i_idx - j_idx) & (batch - 1)) == 0) & (j_idx <= i_idx)
    mask_all = jnp.where(ok, 0.0, NEG_INF).astype(f32)           # (M, H*M)

    # ---- constant head-segment indicators for the collapsed softmax
    seg = ((lax.broadcasted_iota(jnp.int32, (HM, num_heads), 0) >> m_bits)
           == lax.broadcasted_iota(jnp.int32, (HM, num_heads), 1)).astype(f32)
    seg_t = (lax.broadcasted_iota(jnp.int32, (num_heads, HM), 0)
             == (lax.broadcasted_iota(jnp.int32, (num_heads, HM), 1) >> m_bits)
             ).astype(f32)

    # ---- embedding: in-kernel one-hot (exact in bf16) @ bf16 table, f32 accum
    ids = ids_ref[...]                                           # (M, 1) int32
    iota = lax.broadcasted_iota(jnp.int32, (M, V), 1)
    onehot = (iota == ids).astype(bf16)
    x = jnp.dot(onehot, emb_ref[...], preferred_element_type=f32)
    x = x * scale + slab_ref[0:M, 0:E]                           # scale + pos-enc
    # TODO(synk): nn.Dropout (p=0.1) in PositionalEncoding / encoder layers is
    # identity here (eval-mode forward).

    # ---- stacked post-norm TransformerEncoderLayers (statically unrolled)
    for l in range(num_layers):
        base = M + 8 * l
        wl = w_attn_ref[l]                                       # (E, 4E) bf16
        wqkv = wl[:, :3 * E]
        wo = wl[:, 3 * E:]

        # fused Q/K/V projection: one matmul, one bias add, static slices
        qkv = jnp.dot(x.astype(bf16), wqkv, preferred_element_type=f32)
        qkv = qkv + slab_ref[base:base + 1, 0:3 * E]
        q = qkv[:, :E]
        k = qkv[:, E:2 * E]
        v = qkv[:, 2 * E:]

        # per-head scores staged lane-dense into a (M, H*M) scratch
        for h in range(num_heads):
            lo, hi = h * dh, (h + 1) * dh
            s_h = lax.dot_general(q[:, lo:hi], k[:, lo:hi],
                                  (((1,), (1,)), ((), ())),
                                  preferred_element_type=f32) * inv_sqrt_dh
            s_scr[:, h * M:(h + 1) * M] = s_h

        # collapsed softmax: one max, one exp, one indicator matmul for the
        # per-head denominators, one approx reciprocal, one indicator matmul
        # to broadcast back (shared row-max is exact per head).
        s_all = s_scr[...] + mask_all
        s_all = s_all - jnp.max(s_all, axis=-1, keepdims=True)
        e = jnp.exp(s_all)
        denom = jnp.dot(e, seg, preferred_element_type=f32)       # (M, H)
        rinv = pl.reciprocal(denom, approx=True)
        p = e * jnp.dot(rinv, seg_t, preferred_element_type=f32)  # (M, H*M)

        # per-head contexts staged lane-dense, then ONE output projection
        for h in range(num_heads):
            lo, hi = h * dh, (h + 1) * dh
            ctx_scr[:, lo:hi] = jnp.dot(p[:, h * M:(h + 1) * M], v[:, lo:hi],
                                        preferred_element_type=f32)
        attn = jnp.dot(ctx_scr[...].astype(bf16), wo,
                       preferred_element_type=f32) + slab_ref[base + 1:base + 2, 0:E]

        y = _layer_norm(x + attn,
                        slab_ref[base + 4:base + 5, 0:E],
                        slab_ref[base + 5:base + 6, 0:E])
        hmid = jnp.maximum(
            jnp.dot(y.astype(bf16), w1_ref[l], preferred_element_type=f32)
            + slab_ref[base + 2:base + 3, 0:HID], 0.0)            # ReLU
        ff = (jnp.dot(hmid.astype(bf16), w2_ref[l], preferred_element_type=f32)
              + slab_ref[base + 3:base + 4, 0:E])
        x = _layer_norm(y + ff,
                        slab_ref[base + 6:base + 7, 0:E],
                        slab_ref[base + 7:base + 8, 0:E])

    # ---- decoder (lane-dense (M, VOCAB) output, unmasked stores)
    bd_row = M + 8 * num_layers
    out_ref[...] = (jnp.dot(x.astype(bf16), wd_ref[...],
                            preferred_element_type=f32)
                    + slab_ref[bd_row:bd_row + 1, 0:V])


# ------------------------------- wrapper -------------------------------------
def fused_forward_pallas(ids, packed, *, batch):
    """ids: (M,1) int32 seq-major; packed: dict of packed weight arrays."""
    M = ids.shape[0]
    V = packed["wd"].shape[1]
    num_layers = packed["w_attn"].shape[0]
    inputs = [ids, packed["emb"], packed["w_attn"], packed["w1"],
              packed["w2"], packed["wd"], packed["slab"]]
    vmem = lambda: pl.BlockSpec(memory_space=pltpu.MemorySpace.VMEM)
    return pl.pallas_call(
        functools.partial(_fused_forward_kernel,
                          num_layers=num_layers, num_heads=HEADS,
                          batch=batch, scale=math.sqrt(EMB)),
        out_shape=jax.ShapeDtypeStruct((M, V), jnp.float32),
        in_specs=[vmem() for _ in inputs],
        out_specs=vmem(),
        scratch_shapes=[pltpu.VMEM((M, HEADS * M), jnp.float32),   # staged scores
                        pltpu.VMEM((M, EMB), jnp.float32)],        # staged contexts
    )(*inputs)


# --------------------------- params / packing (JAX) --------------------------
def init_params(key):
    keys = iter(jax.random.split(key, 8 * LAYERS * 16 + 8))

    def w(shape, scale=0.05):
        return jax.random.normal(next(keys), shape, jnp.float32) * scale

    params = {"emb": w((VOCAB, EMB))}
    layers = []
    for _ in range(LAYERS):
        layers.append({
            "wq": w((EMB, EMB)), "bq": w((1, EMB)),
            "wk": w((EMB, EMB)), "bk": w((1, EMB)),
            "wv": w((EMB, EMB)), "bv": w((1, EMB)),
            "wo": w((EMB, EMB)), "bo": w((1, EMB)),
            "ln1_g": jnp.ones((1, EMB), jnp.float32),
            "ln1_b": jnp.zeros((1, EMB), jnp.float32),
            "w1": w((EMB, HIDDEN)), "b1": w((1, HIDDEN)),
            "w2": w((HIDDEN, EMB)), "b2": w((1, EMB)),
            "ln2_g": jnp.ones((1, EMB), jnp.float32),
            "ln2_b": jnp.zeros((1, EMB), jnp.float32),
        })
    params["layers"] = layers
    params["wd"] = w((EMB, VOCAB))
    params["bd"] = w((1, VOCAB))
    return params


def positional_encoding(seq_len, d_model):
    pos = jnp.arange(seq_len, dtype=jnp.float32)[:, None]
    div = jnp.exp(jnp.arange(0, d_model, 2, dtype=jnp.float32)
                  * (-math.log(10000.0) / d_model))
    ang = pos * div[None, :]
    return jnp.stack([jnp.sin(ang), jnp.cos(ang)], axis=-1).reshape(seq_len, d_model)


def pack_params(params, seq_len, batch):
    """One-time packing: bf16 weight stacks + a single f32 bias/LN/pe slab."""
    M = seq_len * batch
    W = max(3 * EMB, HIDDEN, VOCAB)

    def row(v):
        v = jnp.asarray(v, jnp.float32).reshape(1, -1)
        return jnp.pad(v, ((0, 0), (0, W - v.shape[1])))

    pe = positional_encoding(seq_len, EMB)
    pe_packed = jnp.repeat(pe, batch, axis=0)               # row s*N+n -> pe[s]
    slab_rows = [jnp.pad(pe_packed, ((0, 0), (0, W - EMB)))]
    for lp in params["layers"]:
        bqkv = jnp.concatenate([lp["bq"], lp["bk"], lp["bv"]], axis=1)
        for v in (bqkv, lp["bo"], lp["b1"], lp["b2"],
                  lp["ln1_g"], lp["ln1_b"], lp["ln2_g"], lp["ln2_b"]):
            slab_rows.append(row(v))
    slab_rows.append(row(params["bd"]))
    slab = jnp.concatenate(slab_rows, axis=0)

    w_attn = jnp.stack([jnp.concatenate(
        [lp["wq"], lp["wk"], lp["wv"], lp["wo"]], axis=1)
        for lp in params["layers"]]).astype(jnp.bfloat16)
    return {
        "emb": params["emb"].astype(jnp.bfloat16),
        "w_attn": w_attn,
        "w1": jnp.stack([lp["w1"] for lp in params["layers"]]).astype(jnp.bfloat16),
        "w2": jnp.stack([lp["w2"] for lp in params["layers"]]).astype(jnp.bfloat16),
        "wd": params["wd"].astype(jnp.bfloat16),
        "slab": slab,
    }


@jax.jit
def poem_generator_forward(tokens, packed):
    """tokens: (N, S) int32 -> logits (S, N, VOCAB), matching PyTorch layout."""
    N, S = tokens.shape
    M = N * S
    V = packed["wd"].shape[1]
    ids = jnp.transpose(tokens).reshape(M, 1).astype(jnp.int32)   # seq-major flatten
    logits_flat = fused_forward_pallas(ids, packed, batch=N)
    # rows are already seq-major -> free reshape to (S, N, V), no transpose
    return logits_flat.reshape(S, N, V)


# ---------------------------- numpy reference --------------------------------
def _np_layernorm(x, g, b):
    mu = x.mean(-1, keepdims=True)
    var = ((x - mu) ** 2).mean(-1, keepdims=True)
    return (x - mu) / np.sqrt(var + LN_EPS) * g + b


def reference_forward(tokens_np, params):
    P = jax.tree_util.tree_map(np.asarray, params)
    pos = np.arange(SEQ, dtype=np.float32)[:, None]
    div = np.exp(np.arange(0, EMB, 2, dtype=np.float32) * (-math.log(10000.0) / EMB))
    ang = pos * div[None, :]
    pe = np.stack([np.sin(ang), np.cos(ang)], axis=-1).reshape(SEQ, EMB)
    i = np.arange(SEQ)
    mask = np.where(i[None, :] <= i[:, None], 0.0, NEG_INF).astype(np.float32)

    x = P["emb"][tokens_np] * math.sqrt(EMB) + pe[None]          # (N, S, E)
    dh = EMB // HEADS
    for lp in P["layers"]:
        q = x @ lp["wq"] + lp["bq"]
        k = x @ lp["wk"] + lp["bk"]
        v = x @ lp["wv"] + lp["bv"]
        ctx = np.zeros_like(x)
        for h in range(HEADS):
            lo, hi = h * dh, (h + 1) * dh
            s = np.einsum("nsd,ntd->nst", q[..., lo:hi], k[..., lo:hi]) / math.sqrt(dh)
            s = s + mask
            s = s - s.max(-1, keepdims=True)
            p = np.exp(s)
            p = p / p.sum(-1, keepdims=True)
            ctx[..., lo:hi] = np.einsum("nst,ntd->nsd", p, v[..., lo:hi])
        attn = ctx @ lp["wo"] + lp["bo"]
        x = _np_layernorm(x + attn, lp["ln1_g"], lp["ln1_b"])
        ff = np.maximum(x @ lp["w1"] + lp["b1"], 0.0) @ lp["w2"] + lp["b2"]
        x = _np_layernorm(x + ff, lp["ln2_g"], lp["ln2_b"])
    logits = x @ P["wd"] + P["bd"]                               # (N, S, V)
    return logits.transpose(1, 0, 2)                             # (S, N, V)


# --------------------------------- main ---------------------------------------
if __name__ == "__main__":
    key = jax.random.PRNGKey(0)
    pkey, tkey = jax.random.split(key)
    params = init_params(pkey)
    packed = pack_params(params, SEQ, BATCH)
    tokens = jax.random.randint(tkey, (BATCH, SEQ), 0, VOCAB, dtype=jnp.int32)

    out = poem_generator_forward(tokens, packed)
    out = jax.block_until_ready(out)
    assert out.shape == (SEQ, BATCH, VOCAB), out.shape

    ref = reference_forward(np.asarray(tokens), params)
    err = float(np.max(np.abs(np.asarray(out, dtype=np.float32) - ref)))
    assert err < 5e-2, f"mismatch vs reference: max abs err = {err}"

    print("KERNEL_OK")
</pallas_src>

<mosaic_0001>
module attributes {stable_mosaic.version = 11 : i64} {
  func.func @_fused_forward_kernel(%arg0: memref<16x1xi32, #tpu.memory_space<vmem>>, %arg1: memref<256x128xbf16, #tpu.memory_space<vmem>>, %arg2: memref<2x128x512xbf16, #tpu.memory_space<vmem>>, %arg3: memref<2x128x256xbf16, #tpu.memory_space<vmem>>, %arg4: memref<2x256x128xbf16, #tpu.memory_space<vmem>>, %arg5: memref<128x256xbf16, #tpu.memory_space<vmem>>, %arg6: memref<33x384xf32, #tpu.memory_space<vmem>>, %arg7: memref<16x256xf32, #tpu.memory_space<vmem>>, %arg8: memref<16x128xf32, #tpu.memory_space<vmem>>, %arg9: memref<16x128xf32, #tpu.memory_space<vmem>>) attributes {dimension_semantics = [], scalar_prefetch = 0 : i64, scratch_operands = 2 : i64, tpu.core_type = #tpu.core_type<tc>} {
    %0 = tpu.iota {dimensions = array<i32: 0>} : vector<16x128xi32>
    %1 = tpu.iota {dimensions = array<i32: 1>} : vector<16x128xi32>
    %c15_i32 = arith.constant 15 : i32
    %2 = vector.broadcast %c15_i32 : i32 to vector<16x128xi32>
    %3 = arith.andi %1, %2 : vector<16x128xi32>
    %4 = arith.subi %0, %3 : vector<16x128xi32>
    %c1_i32 = arith.constant 1 : i32
    %5 = vector.broadcast %c1_i32 : i32 to vector<16x128xi32>
    %6 = arith.andi %4, %5 : vector<16x128xi32>
    %c0_i32 = arith.constant 0 : i32
    %7 = vector.broadcast %c0_i32 : i32 to vector<16x128xi32>
    %8 = arith.cmpi eq, %6, %7 : vector<16x128xi32>
    %9 = arith.cmpi sle, %3, %0 : vector<16x128xi32>
    %10 = arith.andi %8, %9 : vector<16x128xi1>
    %cst = arith.constant 0.000000e+00 : f32
    %cst_0 = arith.constant -1.000000e+30 : f32
    %11 = vector.broadcast %cst : f32 to vector<16x128xf32>
    %12 = vector.broadcast %cst_0 : f32 to vector<16x128xf32>
    %13 = arith.select %10, %11, %12 : vector<16x128xi1>, vector<16x128xf32>
    %14 = tpu.iota {dimensions = array<i32: 0>} : vector<128x8xi32>
    %c4_i32 = arith.constant 4 : i32
    %15 = vector.broadcast %c4_i32 : i32 to vector<128x8xi32>
    %16 = arith.shrsi %14, %15 : vector<128x8xi32>
    %17 = tpu.iota {dimensions = array<i32: 1>} : vector<128x8xi32>
    %18 = arith.cmpi eq, %16, %17 : vector<128x8xi32>
    %19 = arith.extui %18 : vector<128x8xi1> to vector<128x8xi32>
    %20 = arith.sitofp %19 : vector<128x8xi32> to vector<128x8xf32>
    %21 = tpu.iota {dimensions = array<i32: 0>} : vector<8x128xi32>
    %22 = tpu.iota {dimensions = array<i32: 1>} : vector<8x128xi32>
    %c4_i32_1 = arith.constant 4 : i32
    %23 = vector.broadcast %c4_i32_1 : i32 to vector<8x128xi32>
    %24 = arith.shrsi %22, %23 : vector<8x128xi32>
    %25 = arith.cmpi eq, %21, %24 : vector<8x128xi32>
    %26 = arith.extui %25 : vector<8x128xi1> to vector<8x128xi32>
    %27 = arith.sitofp %26 : vector<8x128xi32> to vector<8x128xf32>
    %c0 = arith.constant 0 : index
    %c0_2 = arith.constant 0 : index
    %28 = vector.load %arg0[%c0, %c0_2] : memref<16x1xi32, #tpu.memory_space<vmem>>, vector<16x1xi32>
    %29 = tpu.iota {dimensions = array<i32: 1>} : vector<16x256xi32>
    %30 = vector.broadcast %28 : vector<16x1xi32> to vector<16x256xi32>
    %31 = arith.cmpi eq, %29, %30 : vector<16x256xi32>
    %32 = arith.extui %31 : vector<16x256xi1> to vector<16x256xi32>
    %33 = arith.sitofp %32 : vector<16x256xi32> to vector<16x256xf32>
    %34 = arith.truncf %33 : vector<16x256xf32> to vector<16x256xbf16>
    %c0_3 = arith.constant 0 : index
    %c0_4 = arith.constant 0 : index
    %35 = vector.load %arg1[%c0_3, %c0_4] : memref<256x128xbf16, #tpu.memory_space<vmem>>, vector<256x128xbf16>
    %cst_5 = arith.constant dense<0.000000e+00> : vector<16x128xf32>
    %36 = tpu.matmul %34, %35, %cst_5 {dimension_numbers = #tpu.dot_dimension_numbers<[1], [0], [0], [1], [0, 0, 1, 1], [], []>} : vector<16x256xbf16>, vector<256x128xbf16>, vector<16x128xf32> -> vector<16x128xf32>
    %cst_6 = arith.constant 11.3137083 : f32
    %37 = vector.broadcast %cst_6 : f32 to vector<16x128xf32>
    %38 = arith.mulf %36, %37 : vector<16x128xf32>
    %c0_7 = arith.constant 0 : index
    %c0_8 = arith.constant 0 : index
    %39 = vector.load %arg6[%c0_7, %c0_8] : memref<33x384xf32, #tpu.memory_space<vmem>>, vector<16x128xf32>
    %40 = arith.addf %38, %39 : vector<16x128xf32>
    %c0_9 = arith.constant 0 : index
    %c0_10 = arith.constant 0 : index
    %c0_11 = arith.constant 0 : index
    %41 = vector.load %arg2[%c0_9, %c0_10, %c0_11] : memref<2x128x512xbf16, #tpu.memory_space<vmem>>, vector<1x128x512xbf16>
    %42 = vector.shape_cast %41 : vector<1x128x512xbf16> to vector<128x512xbf16>
    %43 = vector.extract_strided_slice %42 {offsets = [0, 0], sizes = [128, 384], strides = [1, 1]} : vector<128x512xbf16> to vector<128x384xbf16>
    %44 = vector.extract_strided_slice %42 {offsets = [0, 384], sizes = [128, 128], strides = [1, 1]} : vector<128x512xbf16> to vector<128x128xbf16>
    %45 = arith.truncf %40 : vector<16x128xf32> to vector<16x128xbf16>
    %cst_12 = arith.constant dense<0.000000e+00> : vector<16x384xf32>
    %46 = tpu.matmul %45, %43, %cst_12 {dimension_numbers = #tpu.dot_dimension_numbers<[1], [0], [0], [1], [0, 0, 1, 1], [], []>} : vector<16x128xbf16>, vector<128x384xbf16>, vector<16x384xf32> -> vector<16x384xf32>
    %c16 = arith.constant 16 : index
    %c0_13 = arith.constant 0 : index
    %47 = vector.load %arg6[%c16, %c0_13] : memref<33x384xf32, #tpu.memory_space<vmem>>, vector<1x384xf32>
    %48 = vector.broadcast %47 : vector<1x384xf32> to vector<16x384xf32>
    %49 = arith.addf %46, %48 : vector<16x384xf32>
    %50 = vector.extract_strided_slice %49 {offsets = [0, 0], sizes = [16, 128], strides = [1, 1]} : vector<16x384xf32> to vector<16x128xf32>
    %51 = vector.extract_strided_slice %49 {offsets = [0, 128], sizes = [16, 128], strides = [1, 1]} : vector<16x384xf32> to vector<16x128xf32>
    %52 = vector.extract_strided_slice %49 {offsets = [0, 256], sizes = [16, 128], strides = [1, 1]} : vector<16x384xf32> to vector<16x128xf32>
    %53 = vector.extract_strided_slice %50 {offsets = [0, 0], sizes = [16, 16], strides = [1, 1]} : vector<16x128xf32> to vector<16x16xf32>
    %54 = vector.extract_strided_slice %51 {offsets = [0, 0], sizes = [16, 16], strides = [1, 1]} : vector<16x128xf32> to vector<16x16xf32>
    %cst_14 = arith.constant dense<0.000000e+00> : vector<16x16xf32>
    %55 = tpu.matmul %53, %54, %cst_14 {dimension_numbers = #tpu.dot_dimension_numbers<[1], [1], [0], [0], [0, 0, 1, 0], [], []>} : vector<16x16xf32>, vector<16x16xf32>, vector<16x16xf32> -> vector<16x16xf32>
    %cst_15 = arith.constant 2.500000e-01 : f32
    %56 = vector.broadcast %cst_15 : f32 to vector<16x16xf32>
    %57 = arith.mulf %55, %56 : vector<16x16xf32>
    %c0_16 = arith.constant 0 : index
    %c0_17 = arith.constant 0 : index
    %58 = vector.load %arg8[%c0_16, %c0_17] : memref<16x128xf32, #tpu.memory_space<vmem>>, vector<16x16xf32>
    tpu.vector_store %arg8[%c0_16, %c0_17], %57 {strides = array<i32>} : memref<16x128xf32, #tpu.memory_space<vmem>>, vector<16x16xf32>,
    %59 = vector.extract_strided_slice %50 {offsets = [0, 16], sizes = [16, 16], strides = [1, 1]} : vector<16x128xf32> to vector<16x16xf32>
    %60 = vector.extract_strided_slice %51 {offsets = [0, 16], sizes = [16, 16], strides = [1, 1]} : vector<16x128xf32> to vector<16x16xf32>
    %cst_18 = arith.constant dense<0.000000e+00> : vector<16x16xf32>
    %61 = tpu.matmul %59, %60, %cst_18 {dimension_numbers = #tpu.dot_dimension_numbers<[1], [1], [0], [0], [0, 0, 1, 0], [], []>} : vector<16x16xf32>, vector<16x16xf32>, vector<16x16xf32> -> vector<16x16xf32>
    %cst_19 = arith.constant 2.500000e-01 : f32
    %62 = vector.broadcast %cst_19 : f32 to vector<16x16xf32>
    %63 = arith.mulf %61, %62 : vector<16x16xf32>
    %c0_20 = arith.constant 0 : index
    %c16_21 = arith.constant 16 : index
    %64 = vector.load %arg8[%c0_20, %c16_21] : memref<16x128xf32, #tpu.memory_space<vmem>>, vector<16x16xf32>
    tpu.vector_store %arg8[%c0_20, %c16_21], %63 {strides = array<i32>} : memref<16x128xf32, #tpu.memory_space<vmem>>, vector<16x16xf32>,
    %65 = vector.extract_strided_slice %50 {offsets = [0, 32], sizes = [16, 16], strides = [1, 1]} : vector<16x128xf32> to vector<16x16xf32>
    %66 = vector.extract_strided_slice %51 {offsets = [0, 32], sizes = [16, 16], strides = [1, 1]} : vector<16x128xf32> to vector<16x16xf32>
    %cst_22 = arith.constant dense<0.000000e+00> : vector<16x16xf32>
    %67 = tpu.matmul %65, %66, %cst_22 {dimension_numbers = #tpu.dot_dimension_numbers<[1], [1], [0], [0], [0, 0, 1, 0], [], []>} : vector<16x16xf32>, vector<16x16xf32>, vector<16x16xf32> -> vector<16x16xf32>
    %cst_23 = arith.constant 2.500000e-01 : f32
    %68 = vector.broadcast %cst_23 : f32 to vector<16x16xf32>
    %69 = arith.mulf %67, %68 : vector<16x16xf32>
    %c0_24 = arith.constant 0 : index
    %c32 = arith.constant 32 : index
    %70 = vector.load %arg8[%c0_24, %c32] : memref<16x128xf32, #tpu.memory_space<vmem>>, vector<16x16xf32>
    tpu.vector_store %arg8[%c0_24, %c32], %69 {strides = array<i32>} : memref<16x128xf32, #tpu.memory_space<vmem>>, vector<16x16xf32>,
    %71 = vector.extract_strided_slice %50 {offsets = [0, 48], sizes = [16, 16], strides = [1, 1]} : vector<16x128xf32> to vector<16x16xf32>
    %72 = vector.extract_strided_slice %51 {offsets = [0, 48], sizes = [16, 16], strides = [1, 1]} : vector<16x128xf32> to vector<16x16xf32>
    %cst_25 = arith.constant dense<0.000000e+00> : vector<16x16xf32>
    %73 = tpu.matmul %71, %72, %cst_25 {dimension_numbers = #tpu.dot_dimension_numbers<[1], [1], [0], [0], [0, 0, 1, 0], [], []>} : vector<16x16xf32>, vector<16x16xf32>, vector<16x16xf32> -> vector<16x16xf32>
    %cst_26 = arith.constant 2.500000e-01 : f32
    %74 = vector.broadcast %cst_26 : f32 to vector<16x16xf32>
    %75 = arith.mulf %73, %74 : vector<16x16xf32>
    %c0_27 = arith.constant 0 : index
    %c48 = arith.constant 48 : index
    %76 = vector.load %arg8[%c0_27, %c48] : memref<16x128xf32, #tpu.memory_space<vmem>>, vector<16x16xf32>
    tpu.vector_store %arg8[%c0_27, %c48], %75 {strides = array<i32>} : memref<16x128xf32, #tpu.memory_space<vmem>>, vector<16x16xf32>,
    %77 = vector.extract_strided_slice %50 {offsets = [0, 64], sizes = [16, 16], strides = [1, 1]} : vector<16x128xf32> to vector<16x16xf32>
    %78 = vector.extract_strided_slice %51 {offsets = [0, 64], sizes = [16, 16], strides = [1, 1]} : vector<16x128xf32> to vector<16x16xf32>
    %cst_28 = arith.constant dense<0.000000e+00> : vector<16x16xf32>
    %79 = tpu.matmul %77, %78, %cst_28 {dimension_numbers = #tpu.dot_dimension_numbers<[1], [1], [0], [0], [0, 0, 1, 0], [], []>} : vector<16x16xf32>, vector<16x16xf32>, vector<16x16xf32> -> vector<16x16xf32>
    %cst_29 = arith.constant 2.500000e-01 : f32
    %80 = vector.broadcast %cst_29 : f32 to vector<16x16xf32>
    %81 = arith.mulf %79, %80 : vector<16x16xf32>
    %c0_30 = arith.constant 0 : index
    %c64 = arith.constant 64 : index
    %82 = vector.load %arg8[%c0_30, %c64] : memref<16x128xf32, #tpu.memory_space<vmem>>, vector<16x16xf32>
    tpu.vector_store %arg8[%c0_30, %c64], %81 {strides = array<i32>} : memref<16x128xf32, #tpu.memory_space<vmem>>, vector<16x16xf32>,
    %83 = vector.extract_strided_slice %50 {offsets = [0, 80], sizes = [16, 16], strides = [1, 1]} : vector<16x128xf32> to vector<16x16xf32>
    %84 = vector.extract_strided_slice %51 {offsets = [0, 80], sizes = [16, 16], strides = [1, 1]} : vector<16x128xf32> to vector<16x16xf32>
    %cst_31 = arith.constant dense<0.000000e+00> : vector<16x16xf32>
    %85 = tpu.matmul %83, %84, %cst_31 {dimension_numbers = #tpu.dot_dimension_numbers<[1], [1], [0], [0], [0, 0, 1, 0], [], []>} : vector<16x16xf32>, vector<16x16xf32>, vector<16x16xf32> -> vector<16x16xf32>
    %cst_32 = arith.constant 2.500000e-01 : f32
    %86 = vector.broadcast %cst_32 : f32 to vector<16x16xf32>
    %87 = arith.mulf %85, %86 : vector<16x16xf32>
    %c0_33 = arith.constant 0 : index
    %c80 = arith.constant 80 : index
    %88 = vector.load %arg8[%c0_33, %c80] : memref<16x128xf32, #tpu.memory_space<vmem>>, vector<16x16xf32>
    tpu.vector_store %arg8[%c0_33, %c80], %87 {strides = array<i32>} : memref<16x128xf32, #tpu.memory_space<vmem>>, vector<16x16xf32>,
    %89 = vector.extract_strided_slice %50 {offsets = [0, 96], sizes = [16, 16], strides = [1, 1]} : vector<16x128xf32> to vector<16x16xf32>
    %90 = vector.extract_strided_slice %51 {offsets = [0, 96], sizes = [16, 16], strides = [1, 1]} : vector<16x128xf32> to vector<16x16xf32>
    %cst_34 = arith.constant dense<0.000000e+00> : vector<16x16xf32>
    %91 = tpu.matmul %89, %90, %cst_34 {dimension_numbers = #tpu.dot_dimension_numbers<[1], [1], [0], [0], [0, 0, 1, 0], [], []>} : vector<16x16xf32>, vector<16x16xf32>, vector<16x16xf32> -> vector<16x16xf32>
    %cst_35 = arith.constant 2.500000e-01 : f32
    %92 = vector.broadcast %cst_35 : f32 to vector<16x16xf32>
    %93 = arith.mulf %91, %92 : vector<16x16xf32>
    %c0_36 = arith.constant 0 : index
    %c96 = arith.constant 96 : index
    %94 = vector.load %arg8[%c0_36, %c96] : memref<16x128xf32, #tpu.memory_space<vmem>>, vector<16x16xf32>
    tpu.vector_store %arg8[%c0_36, %c96], %93 {strides = array<i32>} : memref<16x128xf32, #tpu.memory_space<vmem>>, vector<16x16xf32>,
    %95 = vector.extract_strided_slice %50 {offsets = [0, 112], sizes = [16, 16], strides = [1, 1]} : vector<16x128xf32> to vector<16x16xf32>
    %96 = vector.extract_strided_slice %51 {offsets = [0, 112], sizes = [16, 16], strides = [1, 1]} : vector<16x128xf32> to vector<16x16xf32>
    %cst_37 = arith.constant dense<0.000000e+00> : vector<16x16xf32>
    %97 = tpu.matmul %95, %96, %cst_37 {dimension_numbers = #tpu.dot_dimension_numbers<[1], [1], [0], [0], [0, 0, 1, 0], [], []>} : vector<16x16xf32>, vector<16x16xf32>, vector<16x16xf32> -> vector<16x16xf32>
    %cst_38 = arith.constant 2.500000e-01 : f32
    %98 = vector.broadcast %cst_38 : f32 to vector<16x16xf32>
    %99 = arith.mulf %97, %98 : vector<16x16xf32>
    %c0_39 = arith.constant 0 : index
    %c112 = arith.constant 112 : index
    %100 = vector.load %arg8[%c0_39, %c112] : memref<16x128xf32, #tpu.memory_space<vmem>>, vector<16x16xf32>
    tpu.vector_store %arg8[%c0_39, %c112], %99 {strides = array<i32>} : memref<16x128xf32, #tpu.memory_space<vmem>>, vector<16x16xf32>,
    %c0_40 = arith.constant 0 : index
    %c0_41 = arith.constant 0 : index
    %101 = vector.load %arg8[%c0_40, %c0_41] : memref<16x128xf32, #tpu.memory_space<vmem>>, vector<16x128xf32>
    %102 = arith.addf %101, %13 : vector<16x128xf32>
    %cst_42 = arith.constant dense<0xFF800000> : vector<16xf32>
    %103 = vector.multi_reduction <maximumf>, %102, %cst_42 [1] : vector<16x128xf32> to vector<16xf32>
    %104 = vector.shape_cast %103 : vector<16xf32> to vector<16x1xf32>
    %105 = vector.broadcast %104 : vector<16x1xf32> to vector<16x128xf32>
    %106 = arith.subf %102, %105 : vector<16x128xf32>
    %107 = math.exp %106 : vector<16x128xf32>
    %cst_43 = arith.constant dense<0.000000e+00> : vector<16x8xf32>
    %108 = tpu.matmul %107, %20, %cst_43 {dimension_numbers = #tpu.dot_dimension_numbers<[1], [0], [0], [1], [0, 0, 1, 1], [], []>} : vector<16x128xf32>, vector<128x8xf32>, vector<16x8xf32> -> vector<16x8xf32>
    %109 = tpu.reciprocal %108 {approx = true} : vector<16x8xf32> -> vector<16x8xf32>
    %cst_44 = arith.constant dense<0.000000e+00> : vector<16x128xf32>
    %110 = tpu.matmul %109, %27, %cst_44 {dimension_numbers = #tpu.dot_dimension_numbers<[1], [0], [0], [1], [0, 0, 1, 1], [], []>} : vector<16x8xf32>, vector<8x128xf32>, vector<16x128xf32> -> vector<16x128xf32>
    %111 = arith.mulf %107, %110 : vector<16x128xf32>
    %112 = vector.extract_strided_slice %111 {offsets = [0, 0], sizes = [16, 16], strides = [1, 1]} : vector<16x128xf32> to vector<16x16xf32>
    %113 = vector.extract_strided_slice %52 {offsets = [0, 0], sizes = [16, 16], strides = [1, 1]} : vector<16x128xf32> to vector<16x16xf32>
    %cst_45 = arith.constant dense<0.000000e+00> : vector<16x16xf32>
    %114 = tpu.matmul %112, %113, %cst_45 {dimension_numbers = #tpu.dot_dimension_numbers<[1], [0], [0], [1], [0, 0, 1, 1], [], []>} : vector<16x16xf32>, vector<16x16xf32>, vector<16x16xf32> -> vector<16x16xf32>
    %c0_46 = arith.constant 0 : index
    %c0_47 = arith.constant 0 : index
    %115 = vector.load %arg9[%c0_46, %c0_47] : memref<16x128xf32, #tpu.memory_space<vmem>>, vector<16x16xf32>
    tpu.vector_store %arg9[%c0_46, %c0_47], %114 {strides = array<i32>} : memref<16x128xf32, #tpu.memory_space<vmem>>, vector<16x16xf32>,
    %116 = vector.extract_strided_slice %111 {offsets = [0, 16], sizes = [16, 16], strides = [1, 1]} : vector<16x128xf32> to vector<16x16xf32>
    %117 = vector.extract_strided_slice %52 {offsets = [0, 16], sizes = [16, 16], strides = [1, 1]} : vector<16x128xf32> to vector<16x16xf32>
    %cst_48 = arith.constant dense<0.000000e+00> : vector<16x16xf32>
    %118 = tpu.matmul %116, %117, %cst_48 {dimension_numbers = #tpu.dot_dimension_numbers<[1], [0], [0], [1], [0, 0, 1, 1], [], []>} : vector<16x16xf32>, vector<16x16xf32>, vector<16x16xf32> -> vector<16x16xf32>
    %c0_49 = arith.constant 0 : index
    %c16_50 = arith.constant 16 : index
    %119 = vector.load %arg9[%c0_49, %c16_50] : memref<16x128xf32, #tpu.memory_space<vmem>>, vector<16x16xf32>
    tpu.vector_store %arg9[%c0_49, %c16_50], %118 {strides = array<i32>} : memref<16x128xf32, #tpu.memory_space<vmem>>, vector<16x16xf32>,
    %120 = vector.extract_strided_slice %111 {offsets = [0, 32], sizes = [16, 16], strides = [1, 1]} : vector<16x128xf32> to vector<16x16xf32>
    %121 = vector.extract_strided_slice %52 {offsets = [0, 32], sizes = [16, 16], strides = [1, 1]} : vector<16x128xf32> to vector<16x16xf32>
    %cst_51 = arith.constant dense<0.000000e+00> : vector<16x16xf32>
    %122 = tpu.matmul %120, %121, %cst_51 {dimension_numbers = #tpu.dot_dimension_numbers<[1], [0], [0], [1], [0, 0, 1, 1], [], []>} : vector<16x16xf32>, vector<16x16xf32>, vector<16x16xf32> -> vector<16x16xf32>
    %c0_52 = arith.constant 0 : index
    %c32_53 = arith.constant 32 : index
    %123 = vector.load %arg9[%c0_52, %c32_53] : memref<16x128xf32, #tpu.memory_space<vmem>>, vector<16x16xf32>
    tpu.vector_store %arg9[%c0_52, %c32_53], %122 {strides = array<i32>} : memref<16x128xf32, #tpu.memory_space<vmem>>, vector<16x16xf32>,
    %124 = vector.extract_strided_slice %111 {offsets = [0, 48], sizes = [16, 16], strides = [1, 1]} : vector<16x128xf32> to vector<16x16xf32>
    %125 = vector.extract_strided_slice %52 {offsets = [0, 48], sizes = [16, 16], strides = [1, 1]} : vector<16x128xf32> to vector<16x16xf32>
    %cst_54 = arith.constant dense<0.000000e+00> : vector<16x16xf32>
    %126 = tpu.matmul %124, %125, %cst_54 {dimension_numbers = #tpu.dot_dimension_numbers<[1], [0], [0], [1], [0, 0, 1, 1], [], []>} : vector<16x16xf32>, vector<16x16xf32>, vector<16x16xf32> -> vector<16x16xf32>
    %c0_55 = arith.constant 0 : index
    %c48_56 = arith.constant 48 : index
    %127 = vector.load %arg9[%c0_55, %c48_56] : memref<16x128xf32, #tpu.memory_space<vmem>>, vector<16x16xf32>
    tpu.vector_store %arg9[%c0_55, %c48_56], %126 {strides = array<i32>} : memref<16x128xf32, #tpu.memory_space<vmem>>, vector<16x16xf32>,
    %128 = vector.extract_strided_slice %111 {offsets = [0, 64], sizes = [16, 16], strides = [1, 1]} : vector<16x128xf32> to vector<16x16xf32>
    %129 = vector.extract_strided_slice %52 {offsets = [0, 64], sizes = [16, 16], strides = [1, 1]} : vector<16x128xf32> to vector<16x16xf32>
    %cst_57 = arith.constant dense<0.000000e+00> : vector<16x16xf32>
    %130 = tpu.matmul %128, %129, %cst_57 {dimension_numbers = #tpu.dot_dimension_numbers<[1], [0], [0], [1], [0, 0, 1, 1], [], []>} : vector<16x16xf32>, vector<16x16xf32>, vector<16x16xf32> -> vector<16x16xf32>
    %c0_58 = arith.constant 0 : index
    %c64_59 = arith.constant 64 : index
    %131 = vector.load %arg9[%c0_58, %c64_59] : memref<16x128xf32, #tpu.memory_space<vmem>>, vector<16x16xf32>
    tpu.vector_store %arg9[%c0_58, %c64_59], %130 {strides = array<i32>} : memref<16x128xf32, #tpu.memory_space<vmem>>, vector<16x16xf32>,
    %132 = vector.extract_strided_slice %111 {offsets = [0, 80], sizes = [16, 16], strides = [1, 1]} : vector<16x128xf32> to vector<16x16xf32>
    %133 = vector.extract_strided_slice %52 {offsets = [0, 80], sizes = [16, 16], strides = [1, 1]} : vector<16x128xf32> to vector<16x16xf32>
    %cst_60 = arith.constant dense<0.000000e+00> : vector<16x16xf32>
    %134 = tpu.matmul %132, %133, %cst_60 {dimension_numbers = #tpu.dot_dimension_numbers<[1], [0], [0], [1], [0, 0, 1, 1], [], []>} : vector<16x16xf32>, vector<16x16xf32>, vector<16x16xf32> -> vector<16x16xf32>
    %c0_61 = arith.constant 0 : index
    %c80_62 = arith.constant 80 : index
    %135 = vector.load %arg9[%c0_61, %c80_62] : memref<16x128xf32, #tpu.memory_space<vmem>>, vector<16x16xf32>
    tpu.vector_store %arg9[%c0_61, %c80_62], %134 {strides = array<i32>} : memref<16x128xf32, #tpu.memory_space<vmem>>, vector<16x16xf32>,
    %136 = vector.extract_strided_slice %111 {offsets = [0, 96], sizes = [16, 16], strides = [1, 1]} : vector<16x128xf32> to vector<16x16xf32>
    %137 = vector.extract_strided_slice %52 {offsets = [0, 96], sizes = [16, 16], strides = [1, 1]} : vector<16x128xf32> to vector<16x16xf32>
    %cst_63 = arith.constant dense<0.000000e+00> : vector<16x16xf32>
    %138 = tpu.matmul %136, %137, %cst_63 {dimension_numbers = #tpu.dot_dimension_numbers<[1], [0], [0], [1], [0, 0, 1, 1], [], []>} : vector<16x16xf32>, vector<16x16xf32>, vector<16x16xf32> -> vector<16x16xf32>
    %c0_64 = arith.constant 0 : index
    %c96_65 = arith.constant 96 : index
    %139 = vector.load %arg9[%c0_64, %c96_65] : memref<16x128xf32, #tpu.memory_space<vmem>>, vector<16x16xf32>
    tpu.vector_store %arg9[%c0_64, %c96_65], %138 {strides = array<i32>} : memref<16x128xf32, #tpu.memory_space<vmem>>, vector<16x16xf32>,
    %140 = vector.extract_strided_slice %111 {offsets = [0, 112], sizes = [16, 16], strides = [1, 1]} : vector<16x128xf32> to vector<16x16xf32>
    %141 = vector.extract_strided_slice %52 {offsets = [0, 112], sizes = [16, 16], strides = [1, 1]} : vector<16x128xf32> to vector<16x16xf32>
    %cst_66 = arith.constant dense<0.000000e+00> : vector<16x16xf32>
    %142 = tpu.matmul %140, %141, %cst_66 {dimension_numbers = #tpu.dot_dimension_numbers<[1], [0], [0], [1], [0, 0, 1, 1], [], []>} : vector<16x16xf32>, vector<16x16xf32>, vector<16x16xf32> -> vector<16x16xf32>
    %c0_67 = arith.constant 0 : index
    %c112_68 = arith.constant 112 : index
    %143 = vector.load %arg9[%c0_67, %c112_68] : memref<16x128xf32, #tpu.memory_space<vmem>>, vector<16x16xf32>
    tpu.vector_store %arg9[%c0_67, %c112_68], %142 {strides = array<i32>} : memref<16x128xf32, #tpu.memory_space<vmem>>, vector<16x16xf32>,
    %c0_69 = arith.constant 0 : index
    %c0_70 = arith.constant 0 : index
    %144 = vector.load %arg9[%c0_69, %c0_70] : memref<16x128xf32, #tpu.memory_space<vmem>>, vector<16x128xf32>
    %145 = arith.truncf %144 : vector<16x128xf32> to vector<16x128xbf16>
    %cst_71 = arith.constant dense<0.000000e+00> : vector<16x128xf32>
    %146 = tpu.matmul %145, %44, %cst_71 {dimension_numbers = #tpu.dot_dimension_numbers<[1], [0], [0], [1], [0, 0, 1, 1], [], []>} : vector<16x128xbf16>, vector<128x128xbf16>, vector<16x128xf32> -> vector<16x128xf32>
    %c17 = arith.constant 17 : index
    %c0_72 = arith.constant 0 : index
    %147 = vector.load %arg6[%c17, %c0_72] : memref<33x384xf32, #tpu.memory_space<vmem>>, vector<1x128xf32>
    %148 = vector.broadcast %147 : vector<1x128xf32> to vector<16x128xf32>
    %149 = arith.addf %146, %148 : vector<16x128xf32>
    %150 = arith.addf %40, %149 : vector<16x128xf32>
    %c20 = arith.constant 20 : index
    %c0_73 = arith.constant 0 : index
    %151 = vector.load %arg6[%c20, %c0_73] : memref<33x384xf32, #tpu.memory_space<vmem>>, vector<1x128xf32>
    %c21 = arith.constant 21 : index
    %c0_74 = arith.constant 0 : index
    %152 = vector.load %arg6[%c21, %c0_74] : memref<33x384xf32, #tpu.memory_space<vmem>>, vector<1x128xf32>
    %cst_75 = arith.constant dense<0.000000e+00> : vector<16xf32>
    %153 = vector.multi_reduction <add>, %150, %cst_75 [1] : vector<16x128xf32> to vector<16xf32>
    %154 = vector.shape_cast %153 : vector<16xf32> to vector<16x1xf32>
    %cst_76 = arith.constant 1.280000e+02 : f32
    %155 = vector.broadcast %cst_76 : f32 to vector<16x1xf32>
    %156 = arith.divf %154, %155 : vector<16x1xf32>
    %157 = vector.broadcast %156 : vector<16x1xf32> to vector<16x128xf32>
    %158 = arith.subf %150, %157 : vector<16x128xf32>
    %159 = arith.mulf %158, %158 : vector<16x128xf32>
    %cst_77 = arith.constant dense<0.000000e+00> : vector<16xf32>
    %160 = vector.multi_reduction <add>, %159, %cst_77 [1] : vector<16x128xf32> to vector<16xf32>
    %161 = vector.shape_cast %160 : vector<16xf32> to vector<16x1xf32>
    %cst_78 = arith.constant 1.280000e+02 : f32
    %162 = vector.broadcast %cst_78 : f32 to vector<16x1xf32>
    %163 = arith.divf %161, %162 : vector<16x1xf32>
    %164 = vector.broadcast %156 : vector<16x1xf32> to vector<16x128xf32>
    %165 = arith.subf %150, %164 : vector<16x128xf32>
    %cst_79 = arith.constant 9.99999974E-6 : f32
    %166 = vector.broadcast %cst_79 : f32 to vector<16x1xf32>
    %167 = arith.addf %163, %166 : vector<16x1xf32>
    %168 = math.rsqrt %167 : vector<16x1xf32>
    %169 = vector.broadcast %168 : vector<16x1xf32> to vector<16x128xf32>
    %170 = arith.mulf %165, %169 : vector<16x128xf32>
    %171 = vector.broadcast %151 : vector<1x128xf32> to vector<16x128xf32>
    %172 = arith.mulf %170, %171 : vector<16x128xf32>
    %173 = vector.broadcast %152 : vector<1x128xf32> to vector<16x128xf32>
    %174 = arith.addf %172, %173 : vector<16x128xf32>
    %175 = arith.truncf %174 : vector<16x128xf32> to vector<16x128xbf16>
    %c0_80 = arith.constant 0 : index
    %c0_81 = arith.constant 0 : index
    %c0_82 = arith.constant 0 : index
    %176 = vector.load %arg3[%c0_80, %c0_81, %c0_82] : memref<2x128x256xbf16, #tpu.memory_space<vmem>>, vector<1x128x256xbf16>
    %177 = vector.shape_cast %176 : vector<1x128x256xbf16> to vector<128x256xbf16>
    %cst_83 = arith.constant dense<0.000000e+00> : vector<16x256xf32>
    %178 = tpu.matmul %175, %177, %cst_83 {dimension_numbers = #tpu.dot_dimension_numbers<[1], [0], [0], [1], [0, 0, 1, 1], [], []>} : vector<16x128xbf16>, vector<128x256xbf16>, vector<16x256xf32> -> vector<16x256xf32>
    %c18 = arith.constant 18 : index
    %c0_84 = arith.constant 0 : index
    %179 = vector.load %arg6[%c18, %c0_84] : memref<33x384xf32, #tpu.memory_space<vmem>>, vector<1x256xf32>
    %180 = vector.broadcast %179 : vector<1x256xf32> to vector<16x256xf32>
    %181 = arith.addf %178, %180 : vector<16x256xf32>
    %cst_85 = arith.constant 0.000000e+00 : f32
    %182 = vector.broadcast %cst_85 : f32 to vector<16x256xf32>
    %183 = arith.maximumf %181, %182 : vector<16x256xf32>
    %184 = arith.truncf %183 : vector<16x256xf32> to vector<16x256xbf16>
    %c0_86 = arith.constant 0 : index
    %c0_87 = arith.constant 0 : index
    %c0_88 = arith.constant 0 : index
    %185 = vector.load %arg4[%c0_86, %c0_87, %c0_88] : memref<2x256x128xbf16, #tpu.memory_space<vmem>>, vector<1x256x128xbf16>
    %186 = vector.shape_cast %185 : vector<1x256x128xbf16> to vector<256x128xbf16>
    %cst_89 = arith.constant dense<0.000000e+00> : vector<16x128xf32>
    %187 = tpu.matmul %184, %186, %cst_89 {dimension_numbers = #tpu.dot_dimension_numbers<[1], [0], [0], [1], [0, 0, 1, 1], [], []>} : vector<16x256xbf16>, vector<256x128xbf16>, vector<16x128xf32> -> vector<16x128xf32>
    %c19 = arith.constant 19 : index
    %c0_90 = arith.constant 0 : index
    %188 = vector.load %arg6[%c19, %c0_90] : memref<33x384xf32, #tpu.memory_space<vmem>>, vector<1x128xf32>
    %189 = vector.broadcast %188 : vector<1x128xf32> to vector<16x128xf32>
    %190 = arith.addf %187, %189 : vector<16x128xf32>
    %191 = arith.addf %174, %190 : vector<16x128xf32>
    %c22 = arith.constant 22 : index
    %c0_91 = arith.constant 0 : index
    %192 = vector.load %arg6[%c22, %c0_91] : memref<33x384xf32, #tpu.memory_space<vmem>>, vector<1x128xf32>
    %c23 = arith.constant 23 : index
    %c0_92 = arith.constant 0 : index
    %193 = vector.load %arg6[%c23, %c0_92] : memref<33x384xf32, #tpu.memory_space<vmem>>, vector<1x128xf32>
    %cst_93 = arith.constant dense<0.000000e+00> : vector<16xf32>
    %194 = vector.multi_reduction <add>, %191, %cst_93 [1] : vector<16x128xf32> to vector<16xf32>
    %195 = vector.shape_cast %194 : vector<16xf32> to vector<16x1xf32>
    %cst_94 = arith.constant 1.280000e+02 : f32
    %196 = vector.broadcast %cst_94 : f32 to vector<16x1xf32>
    %197 = arith.divf %195, %196 : vector<16x1xf32>
    %198 = vector.broadcast %197 : vector<16x1xf32> to vector<16x128xf32>
    %199 = arith.subf %191, %198 : vector<16x128xf32>
    %200 = arith.mulf %199, %199 : vector<16x128xf32>
    %cst_95 = arith.constant dense<0.000000e+00> : vector<16xf32>
    %201 = vector.multi_reduction <add>, %200, %cst_95 [1] : vector<16x128xf32> to vector<16xf32>
    %202 = vector.shape_cast %201 : vector<16xf32> to vector<16x1xf32>
    %cst_96 = arith.constant 1.280000e+02 : f32
    %203 = vector.broadcast %cst_96 : f32 to vector<16x1xf32>
    %204 = arith.divf %202, %203 : vector<16x1xf32>
    %205 = vector.broadcast %197 : vector<16x1xf32> to vector<16x128xf32>
    %206 = arith.subf %191, %205 : vector<16x128xf32>
    %cst_97 = arith.constant 9.99999974E-6 : f32
    %207 = vector.broadcast %cst_97 : f32 to vector<16x1xf32>
    %208 = arith.addf %204, %207 : vector<16x1xf32>
    %209 = math.rsqrt %208 : vector<16x1xf32>
    %210 = vector.broadcast %209 : vector<16x1xf32> to vector<16x128xf32>
    %211 = arith.mulf %206, %210 : vector<16x128xf32>
    %212 = vector.broadcast %192 : vector<1x128xf32> to vector<16x128xf32>
    %213 = arith.mulf %211, %212 : vector<16x128xf32>
    %214 = vector.broadcast %193 : vector<1x128xf32> to vector<16x128xf32>
    %215 = arith.addf %213, %214 : vector<16x128xf32>
    %c1 = arith.constant 1 : index
    %c0_98 = arith.constant 0 : index
    %c0_99 = arith.constant 0 : index
    %216 = vector.load %arg2[%c1, %c0_98, %c0_99] : memref<2x128x512xbf16, #tpu.memory_space<vmem>>, vector<1x128x512xbf16>
    %217 = vector.shape_cast %216 : vector<1x128x512xbf16> to vector<128x512xbf16>
    %218 = vector.extract_strided_slice %217 {offsets = [0, 0], sizes = [128, 384], strides = [1, 1]} : vector<128x512xbf16> to vector<128x384xbf16>
    %219 = vector.extract_strided_slice %217 {offsets = [0, 384], sizes = [128, 128], strides = [1, 1]} : vector<128x512xbf16> to vector<128x128xbf16>
    %220 = arith.truncf %215 : vector<16x128xf32> to vector<16x128xbf16>
    %cst_100 = arith.constant dense<0.000000e+00> : vector<16x384xf32>
    %221 = tpu.matmul %220, %218, %cst_100 {dimension_numbers = #tpu.dot_dimension_numbers<[1], [0], [0], [1], [0, 0, 1, 1], [], []>} : vector<16x128xbf16>, vector<128x384xbf16>, vector<16x384xf32> -> vector<16x384xf32>
    %c24 = arith.constant 24 : index
    %c0_101 = arith.constant 0 : index
    %222 = vector.load %arg6[%c24, %c0_101] : memref<33x384xf32, #tpu.memory_space<vmem>>, vector<1x384xf32>
    %223 = vector.broadcast %222 : vector<1x384xf32> to vector<16x384xf32>
    %224 = arith.addf %221, %223 : vector<16x384xf32>
    %225 = vector.extract_strided_slice %224 {offsets = [0, 0], sizes = [16, 128], strides = [1, 1]} : vector<16x384xf32> to vector<16x128xf32>
    %226 = vector.extract_strided_slice %224 {offsets = [0, 128], sizes = [16, 128], strides = [1, 1]} : vector<16x384xf32> to vector<16x128xf32>
    %227 = vector.extract_strided_slice %224 {offsets = [0, 256], sizes = [16, 128], strides = [1, 1]} : vector<16x384xf32> to vector<16x128xf32>
    %228 = vector.extract_strided_slice %225 {offsets = [0, 0], sizes = [16, 16], strides = [1, 1]} : vector<16x128xf32> to vector<16x16xf32>
    %229 = vector.extract_strided_slice %226 {offsets = [0, 0], sizes = [16, 16], strides = [1, 1]} : vector<16x128xf32> to vector<16x16xf32>
    %cst_102 = arith.constant dense<0.000000e+00> : vector<16x16xf32>
    %230 = tpu.matmul %228, %229, %cst_102 {dimension_numbers = #tpu.dot_dimension_numbers<[1], [1], [0], [0], [0, 0, 1, 0], [], []>} : vector<16x16xf32>, vector<16x16xf32>, vector<16x16xf32> -> vector<16x16xf32>
    %cst_103 = arith.constant 2.500000e-01 : f32
    %231 = vector.broadcast %cst_103 : f32 to vector<16x16xf32>
    %232 = arith.mulf %230, %231 : vector<16x16xf32>
    %c0_104 = arith.constant 0 : index
    %c0_105 = arith.constant 0 : index
    %233 = vector.load %arg8[%c0_104, %c0_105] : memref<16x128xf32, #tpu.memory_space<vmem>>, vector<16x16xf32>
    tpu.vector_store %arg8[%c0_104, %c0_105], %232 {strides = array<i32>} : memref<16x128xf32, #tpu.memory_space<vmem>>, vector<16x16xf32>,
    %234 = vector.extract_strided_slice %225 {offsets = [0, 16], sizes = [16, 16], strides = [1, 1]} : vector<16x128xf32> to vector<16x16xf32>
    %235 = vector.extract_strided_slice %226 {offsets = [0, 16], sizes = [16, 16], strides = [1, 1]} : vector<16x128xf32> to vector<16x16xf32>
    %cst_106 = arith.constant dense<0.000000e+00> : vector<16x16xf32>
    %236 = tpu.matmul %234, %235, %cst_106 {dimension_numbers = #tpu.dot_dimension_numbers<[1], [1], [0], [0], [0, 0, 1, 0], [], []>} : vector<16x16xf32>, vector<16x16xf32>, vector<16x16xf32> -> vector<16x16xf32>
    %cst_107 = arith.constant 2.500000e-01 : f32
    %237 = vector.broadcast %cst_107 : f32 to vector<16x16xf32>
    %238 = arith.mulf %236, %237 : vector<16x16xf32>
    %c0_108 = arith.constant 0 : index
    %c16_109 = arith.constant 16 : index
    %239 = vector.load %arg8[%c0_108, %c16_109] : memref<16x128xf32, #tpu.memory_space<vmem>>, vector<16x16xf32>
    tpu.vector_store %arg8[%c0_108, %c16_109], %238 {strides = array<i32>} : memref<16x128xf32, #tpu.memory_space<vmem>>, vector<16x16xf32>,
    %240 = vector.extract_strided_slice %225 {offsets = [0, 32], sizes = [16, 16], strides = [1, 1]} : vector<16x128xf32> to vector<16x16xf32>
    %241 = vector.extract_strided_slice %226 {offsets = [0, 32], sizes = [16, 16], strides = [1, 1]} : vector<16x128xf32> to vector<16x16xf32>
    %cst_110 = arith.constant dense<0.000000e+00> : vector<16x16xf32>
    %242 = tpu.matmul %240, %241, %cst_110 {dimension_numbers = #tpu.dot_dimension_numbers<[1], [1], [0], [0], [0, 0, 1, 0], [], []>} : vector<16x16xf32>, vector<16x16xf32>, vector<16x16xf32> -> vector<16x16xf32>
    %cst_111 = arith.constant 2.500000e-01 : f32
    %243 = vector.broadcast %cst_111 : f32 to vector<16x16xf32>
    %244 = arith.mulf %242, %243 : vector<16x16xf32>
    %c0_112 = arith.constant 0 : index
    %c32_113 = arith.constant 32 : index
    %245 = vector.load %arg8[%c0_112, %c32_113] : memref<16x128xf32, #tpu.memory_space<vmem>>, vector<16x16xf32>
    tpu.vector_store %arg8[%c0_112, %c32_113], %244 {strides = array<i32>} : memref<16x128xf32, #tpu.memory_space<vmem>>, vector<16x16xf32>,
    %246 = vector.extract_strided_slice %225 {offsets = [0, 48], sizes = [16, 16], strides = [1, 1]} : vector<16x128xf32> to vector<16x16xf32>
    %247 = vector.extract_strided_slice %226 {offsets = [0, 48], sizes = [16, 16], strides = [1, 1]} : vector<16x128xf32> to vector<16x16xf32>
    %cst_114 = arith.constant dense<0.000000e+00> : vector<16x16xf32>
    %248 = tpu.matmul %246, %247, %cst_114 {dimension_numbers = #tpu.dot_dimension_numbers<[1], [1], [0], [0], [0, 0, 1, 0], [], []>} : vector<16x16xf32>, vector<16x16xf32>, vector<16x16xf32> -> vector<16x16xf32>
    %cst_115 = arith.constant 2.500000e-01 : f32
    %249 = vector.broadcast %cst_115 : f32 to vector<16x16xf32>
    %250 = arith.mulf %248, %249 : vector<16x16xf32>
    %c0_116 = arith.constant 0 : index
    %c48_117 = arith.constant 48 : index
    %251 = vector.load %arg8[%c0_116, %c48_117] : memref<16x128xf32, #tpu.memory_space<vmem>>, vector<16x16xf32>
    tpu.vector_store %arg8[%c0_116, %c48_117], %250 {strides = array<i32>} : memref<16x128xf32, #tpu.memory_space<vmem>>, vector<16x16xf32>,
    %252 = vector.extract_strided_slice %225 {offsets = [0, 64], sizes = [16, 16], strides = [1, 1]} : vector<16x128xf32> to vector<16x16xf32>
    %253 = vector.extract_strided_slice %226 {offsets = [0, 64], sizes = [16, 16], strides = [1, 1]} : vector<16x128xf32> to vector<16x16xf32>
    %cst_118 = arith.constant dense<0.000000e+00> : vector<16x16xf32>
    %254 = tpu.matmul %252, %253, %cst_118 {dimension_numbers = #tpu.dot_dimension_numbers<[1], [1], [0], [0], [0, 0, 1, 0], [], []>} : vector<16x16xf32>, vector<16x16xf32>, vector<16x16xf32> -> vector<16x16xf32>
    %cst_119 = arith.constant 2.500000e-01 : f32
    %255 = vector.broadcast %cst_119 : f32 to vector<16x16xf32>
    %256 = arith.mulf %254, %255 : vector<16x16xf32>
    %c0_120 = arith.constant 0 : index
    %c64_121 = arith.constant 64 : index
    %257 = vector.load %arg8[%c0_120, %c64_121] : memref<16x128xf32, #tpu.memory_space<vmem>>, vector<16x16xf32>
    tpu.vector_store %arg8[%c0_120, %c64_121], %256 {strides = array<i32>} : memref<16x128xf32, #tpu.memory_space<vmem>>, vector<16x16xf32>,
    %258 = vector.extract_strided_slice %225 {offsets = [0, 80], sizes = [16, 16], strides = [1, 1]} : vector<16x128xf32> to vector<16x16xf32>
    %259 = vector.extract_strided_slice %226 {offsets = [0, 80], sizes = [16, 16], strides = [1, 1]} : vector<16x128xf32> to vector<16x16xf32>
    %cst_122 = arith.constant dense<0.000000e+00> : vector<16x16xf32>
    %260 = tpu.matmul %258, %259, %cst_122 {dimension_numbers = #tpu.dot_dimension_numbers<[1], [1], [0], [0], [0, 0, 1, 0], [], []>} : vector<16x16xf32>, vector<16x16xf32>, vector<16x16xf32> -> vector<16x16xf32>
    %cst_123 = arith.constant 2.500000e-01 : f32
    %261 = vector.broadcast %cst_123 : f32 to vector<16x16xf32>
    %262 = arith.mulf %260, %261 : vector<16x16xf32>
    %c0_124 = arith.constant 0 : index
    %c80_125 = arith.constant 80 : index
    %263 = vector.load %arg8[%c0_124, %c80_125] : memref<16x128xf32, #tpu.memory_space<vmem>>, vector<16x16xf32>
    tpu.vector_store %arg8[%c0_124, %c80_125], %262 {strides = array<i32>} : memref<16x128xf32, #tpu.memory_space<vmem>>, vector<16x16xf32>,
    %264 = vector.extract_strided_slice %225 {offsets = [0, 96], sizes = [16, 16], strides = [1, 1]} : vector<16x128xf32> to vector<16x16xf32>
    %265 = vector.extract_strided_slice %226 {offsets = [0, 96], sizes = [16, 16], strides = [1, 1]} : vector<16x128xf32> to vector<16x16xf32>
    %cst_126 = arith.constant dense<0.000000e+00> : vector<16x16xf32>
    %266 = tpu.matmul %264, %265, %cst_126 {dimension_numbers = #tpu.dot_dimension_numbers<[1], [1], [0], [0], [0, 0, 1, 0], [], []>} : vector<16x16xf32>, vector<16x16xf32>, vector<16x16xf32> -> vector<16x16xf32>
    %cst_127 = arith.constant 2.500000e-01 : f32
    %267 = vector.broadcast %cst_127 : f32 to vector<16x16xf32>
    %268 = arith.mulf %266, %267 : vector<16x16xf32>
    %c0_128 = arith.constant 0 : index
    %c96_129 = arith.constant 96 : index
    %269 = vector.load %arg8[%c0_128, %c96_129] : memref<16x128xf32, #tpu.memory_space<vmem>>, vector<16x16xf32>
    tpu.vector_store %arg8[%c0_128, %c96_129], %268 {strides = array<i32>} : memref<16x128xf32, #tpu.memory_space<vmem>>, vector<16x16xf32>,
    %270 = vector.extract_strided_slice %225 {offsets = [0, 112], sizes = [16, 16], strides = [1, 1]} : vector<16x128xf32> to vector<16x16xf32>
    %271 = vector.extract_strided_slice %226 {offsets = [0, 112], sizes = [16, 16], strides = [1, 1]} : vector<16x128xf32> to vector<16x16xf32>
    %cst_130 = arith.constant dense<0.000000e+00> : vector<16x16xf32>
    %272 = tpu.matmul %270, %271, %cst_130 {dimension_numbers = #tpu.dot_dimension_numbers<[1], [1], [0], [0], [0, 0, 1, 0], [], []>} : vector<16x16xf32>, vector<16x16xf32>, vector<16x16xf32> -> vector<16x16xf32>
    %cst_131 = arith.constant 2.500000e-01 : f32
    %273 = vector.broadcast %cst_131 : f32 to vector<16x16xf32>
    %274 = arith.mulf %272, %273 : vector<16x16xf32>
    %c0_132 = arith.constant 0 : index
    %c112_133 = arith.constant 112 : index
    %275 = vector.load %arg8[%c0_132, %c112_133] : memref<16x128xf32, #tpu.memory_space<vmem>>, vector<16x16xf32>
    tpu.vector_store %arg8[%c0_132, %c112_133], %274 {strides = array<i32>} : memref<16x128xf32, #tpu.memory_space<vmem>>, vector<16x16xf32>,
    %c0_134 = arith.constant 0 : index
    %c0_135 = arith.constant 0 : index
    %276 = vector.load %arg8[%c0_134, %c0_135] : memref<16x128xf32, #tpu.memory_space<vmem>>, vector<16x128xf32>
    %277 = arith.addf %276, %13 : vector<16x128xf32>
    %cst_136 = arith.constant dense<0xFF800000> : vector<16xf32>
    %278 = vector.multi_reduction <maximumf>, %277, %cst_136 [1] : vector<16x128xf32> to vector<16xf32>
    %279 = vector.shape_cast %278 : vector<16xf32> to vector<16x1xf32>
    %280 = vector.broadcast %279 : vector<16x1xf32> to vector<16x128xf32>
    %281 = arith.subf %277, %280 : vector<16x128xf32>
    %282 = math.exp %281 : vector<16x128xf32>
    %cst_137 = arith.constant dense<0.000000e+00> : vector<16x8xf32>
    %283 = tpu.matmul %282, %20, %cst_137 {dimension_numbers = #tpu.dot_dimension_numbers<[1], [0], [0], [1], [0, 0, 1, 1], [], []>} : vector<16x128xf32>, vector<128x8xf32>, vector<16x8xf32> -> vector<16x8xf32>
    %284 = tpu.reciprocal %283 {approx = true} : vector<16x8xf32> -> vector<16x8xf32>
    %cst_138 = arith.constant dense<0.000000e+00> : vector<16x128xf32>
    %285 = tpu.matmul %284, %27, %cst_138 {dimension_numbers = #tpu.dot_dimension_numbers<[1], [0], [0], [1], [0, 0, 1, 1], [], []>} : vector<16x8xf32>, vector<8x128xf32>, vector<16x128xf32> -> vector<16x128xf32>
    %286 = arith.mulf %282, %285 : vector<16x128xf32>
    %287 = vector.extract_strided_slice %286 {offsets = [0, 0], sizes = [16, 16], strides = [1, 1]} : vector<16x128xf32> to vector<16x16xf32>
    %288 = vector.extract_strided_slice %227 {offsets = [0, 0], sizes = [16, 16], strides = [1, 1]} : vector<16x128xf32> to vector<16x16xf32>
    %cst_139 = arith.constant dense<0.000000e+00> : vector<16x16xf32>
    %289 = tpu.matmul %287, %288, %cst_139 {dimension_numbers = #tpu.dot_dimension_numbers<[1], [0], [0], [1], [0, 0, 1, 1], [], []>} : vector<16x16xf32>, vector<16x16xf32>, vector<16x16xf32> -> vector<16x16xf32>
    %c0_140 = arith.constant 0 : index
    %c0_141 = arith.constant 0 : index
    %290 = vector.load %arg9[%c0_140, %c0_141] : memref<16x128xf32, #tpu.memory_space<vmem>>, vector<16x16xf32>
    tpu.vector_store %arg9[%c0_140, %c0_141], %289 {strides = array<i32>} : memref<16x128xf32, #tpu.memory_space<vmem>>, vector<16x16xf32>,
    %291 = vector.extract_strided_slice %286 {offsets = [0, 16], sizes = [16, 16], strides = [1, 1]} : vector<16x128xf32> to vector<16x16xf32>
    %292 = vector.extract_strided_slice %227 {offsets = [0, 16], sizes = [16, 16], strides = [1, 1]} : vector<16x128xf32> to vector<16x16xf32>
    %cst_142 = arith.constant dense<0.000000e+00> : vector<16x16xf32>
    %293 = tpu.matmul %291, %292, %cst_142 {dimension_numbers = #tpu.dot_dimension_numbers<[1], [0], [0], [1], [0, 0, 1, 1], [], []>} : vector<16x16xf32>, vector<16x16xf32>, vector<16x16xf32> -> vector<16x16xf32>
    %c0_143 = arith.constant 0 : index
    %c16_144 = arith.constant 16 : index
    %294 = vector.load %arg9[%c0_143, %c16_144] : memref<16x128xf32, #tpu.memory_space<vmem>>, vector<16x16xf32>
    tpu.vector_store %arg9[%c0_143, %c16_144], %293 {strides = array<i32>} : memref<16x128xf32, #tpu.memory_space<vmem>>, vector<16x16xf32>,
    %295 = vector.extract_strided_slice %286 {offsets = [0, 32], sizes = [16, 16], strides = [1, 1]} : vector<16x128xf32> to vector<16x16xf32>
    %296 = vector.extract_strided_slice %227 {offsets = [0, 32], sizes = [16, 16], strides = [1, 1]} : vector<16x128xf32> to vector<16x16xf32>
    %cst_145 = arith.constant dense<0.000000e+00> : vector<16x16xf32>
    %297 = tpu.matmul %295, %296, %cst_145 {dimension_numbers = #tpu.dot_dimension_numbers<[1], [0], [0], [1], [0, 0, 1, 1], [], []>} : vector<16x16xf32>, vector<16x16xf32>, vector<16x16xf32> -> vector<16x16xf32>
    %c0_146 = arith.constant 0 : index
    %c32_147 = arith.constant 32 : index
    %298 = vector.load %arg9[%c0_146, %c32_147] : memref<16x128xf32, #tpu.memory_space<vmem>>, vector<16x16xf32>
    tpu.vector_store %arg9[%c0_146, %c32_147], %297 {strides = array<i32>} : memref<16x128xf32, #tpu.memory_space<vmem>>, vector<16x16xf32>,
    %299 = vector.extract_strided_slice %286 {offsets = [0, 48], sizes = [16, 16], strides = [1, 1]} : vector<16x128xf32> to vector<16x16xf32>
    %300 = vector.extract_strided_slice %227 {offsets = [0, 48], sizes = [16, 16], strides = [1, 1]} : vector<16x128xf32> to vector<16x16xf32>
    %cst_148 = arith.constant dense<0.000000e+00> : vector<16x16xf32>
    %301 = tpu.matmul %299, %300, %cst_148 {dimension_numbers = #tpu.dot_dimension_numbers<[1], [0], [0], [1], [0, 0, 1, 1], [], []>} : vector<16x16xf32>, vector<16x16xf32>, vector<16x16xf32> -> vector<16x16xf32>
    %c0_149 = arith.constant 0 : index
    %c48_150 = arith.constant 48 : index
    %302 = vector.load %arg9[%c0_149, %c48_150] : memref<16x128xf32, #tpu.memory_space<vmem>>, vector<16x16xf32>
    tpu.vector_store %arg9[%c0_149, %c48_150], %301 {strides = array<i32>} : memref<16x128xf32, #tpu.memory_space<vmem>>, vector<16x16xf32>,
    %303 = vector.extract_strided_slice %286 {offsets = [0, 64], sizes = [16, 16], strides = [1, 1]} : vector<16x128xf32> to vector<16x16xf32>
    %304 = vector.extract_strided_slice %227 {offsets = [0, 64], sizes = [16, 16], strides = [1, 1]} : vector<16x128xf32> to vector<16x16xf32>
    %cst_151 = arith.constant dense<0.000000e+00> : vector<16x16xf32>
    %305 = tpu.matmul %303, %304, %cst_151 {dimension_numbers = #tpu.dot_dimension_numbers<[1], [0], [0], [1], [0, 0, 1, 1], [], []>} : vector<16x16xf32>, vector<16x16xf32>, vector<16x16xf32> -> vector<16x16xf32>
    %c0_152 = arith.constant 0 : index
    %c64_153 = arith.constant 64 : index
    %306 = vector.load %arg9[%c0_152, %c64_153] : memref<16x128xf32, #tpu.memory_space<vmem>>, vector<16x16xf32>
    tpu.vector_store %arg9[%c0_152, %c64_153], %305 {strides = array<i32>} : memref<16x128xf32, #tpu.memory_space<vmem>>, vector<16x16xf32>,
    %307 = vector.extract_strided_slice %286 {offsets = [0, 80], sizes = [16, 16], strides = [1, 1]} : vector<16x128xf32> to vector<16x16xf32>
    %308 = vector.extract_strided_slice %227 {offsets = [0, 80], sizes = [16, 16], strides = [1, 1]} : vector<16x128xf32> to vector<16x16xf32>
    %cst_154 = arith.constant dense<0.000000e+00> : vector<16x16xf32>
    %309 = tpu.matmul %307, %308, %cst_154 {dimension_numbers = #tpu.dot_dimension_numbers<[1], [0], [0], [1], [0, 0, 1, 1], [], []>} : vector<16x16xf32>, vector<16x16xf32>, vector<16x16xf32> -> vector<16x16xf32>
    %c0_155 = arith.constant 0 : index
    %c80_156 = arith.constant 80 : index
    %310 = vector.load %arg9[%c0_155, %c80_156] : memref<16x128xf32, #tpu.memory_space<vmem>>, vector<16x16xf32>
    tpu.vector_store %arg9[%c0_155, %c80_156], %309 {strides = array<i32>} : memref<16x128xf32, #tpu.memory_space<vmem>>, vector<16x16xf32>,
    %311 = vector.extract_strided_slice %286 {offsets = [0, 96], sizes = [16, 16], strides = [1, 1]} : vector<16x128xf32> to vector<16x16xf32>
    %312 = vector.extract_strided_slice %227 {offsets = [0, 96], sizes = [16, 16], strides = [1, 1]} : vector<16x128xf32> to vector<16x16xf32>
    %cst_157 = arith.constant dense<0.000000e+00> : vector<16x16xf32>
    %313 = tpu.matmul %311, %312, %cst_157 {dimension_numbers = #tpu.dot_dimension_numbers<[1], [0], [0], [1], [0, 0, 1, 1], [], []>} : vector<16x16xf32>, vector<16x16xf32>, vector<16x16xf32> -> vector<16x16xf32>
    %c0_158 = arith.constant 0 : index
    %c96_159 = arith.constant 96 : index
    %314 = vector.load %arg9[%c0_158, %c96_159] : memref<16x128xf32, #tpu.memory_space<vmem>>, vector<16x16xf32>
    tpu.vector_store %arg9[%c0_158, %c96_159], %313 {strides = array<i32>} : memref<16x128xf32, #tpu.memory_space<vmem>>, vector<16x16xf32>,
    %315 = vector.extract_strided_slice %286 {offsets = [0, 112], sizes = [16, 16], strides = [1, 1]} : vector<16x128xf32> to vector<16x16xf32>
    %316 = vector.extract_strided_slice %227 {offsets = [0, 112], sizes = [16, 16], strides = [1, 1]} : vector<16x128xf32> to vector<16x16xf32>
    %cst_160 = arith.constant dense<0.000000e+00> : vector<16x16xf32>
    %317 = tpu.matmul %315, %316, %cst_160 {dimension_numbers = #tpu.dot_dimension_numbers<[1], [0], [0], [1], [0, 0, 1, 1], [], []>} : vector<16x16xf32>, vector<16x16xf32>, vector<16x16xf32> -> vector<16x16xf32>
    %c0_161 = arith.constant 0 : index
    %c112_162 = arith.constant 112 : index
    %318 = vector.load %arg9[%c0_161, %c112_162] : memref<16x128xf32, #tpu.memory_space<vmem>>, vector<16x16xf32>
    tpu.vector_store %arg9[%c0_161, %c112_162], %317 {strides = array<i32>} : memref<16x128xf32, #tpu.memory_space<vmem>>, vector<16x16xf32>,
    %c0_163 = arith.constant 0 : index
    %c0_164 = arith.constant 0 : index
    %319 = vector.load %arg9[%c0_163, %c0_164] : memref<16x128xf32, #tpu.memory_space<vmem>>, vector<16x128xf32>
    %320 = arith.truncf %319 : vector<16x128xf32> to vector<16x128xbf16>
    %cst_165 = arith.constant dense<0.000000e+00> : vector<16x128xf32>
    %321 = tpu.matmul %320, %219, %cst_165 {dimension_numbers = #tpu.dot_dimension_numbers<[1], [0], [0], [1], [0, 0, 1, 1], [], []>} : vector<16x128xbf16>, vector<128x128xbf16>, vector<16x128xf32> -> vector<16x128xf32>
    %c25 = arith.constant 25 : index
    %c0_166 = arith.constant 0 : index
    %322 = vector.load %arg6[%c25, %c0_166] : memref<33x384xf32, #tpu.memory_space<vmem>>, vector<1x128xf32>
    %323 = vector.broadcast %322 : vector<1x128xf32> to vector<16x128xf32>
    %324 = arith.addf %321, %323 : vector<16x128xf32>
    %325 = arith.addf %215, %324 : vector<16x128xf32>
    %c28 = arith.constant 28 : index
    %c0_167 = arith.constant 0 : index
    %326 = vector.load %arg6[%c28, %c0_167] : memref<33x384xf32, #tpu.memory_space<vmem>>, vector<1x128xf32>
    %c29 = arith.constant 29 : index
    %c0_168 = arith.constant 0 : index
    %327 = vector.load %arg6[%c29, %c0_168] : memref<33x384xf32, #tpu.memory_space<vmem>>, vector<1x128xf32>
    %cst_169 = arith.constant dense<0.000000e+00> : vector<16xf32>
    %328 = vector.multi_reduction <add>, %325, %cst_169 [1] : vector<16x128xf32> to vector<16xf32>
    %329 = vector.shape_cast %328 : vector<16xf32> to vector<16x1xf32>
    %cst_170 = arith.constant 1.280000e+02 : f32
    %330 = vector.broadcast %cst_170 : f32 to vector<16x1xf32>
    %331 = arith.divf %329, %330 : vector<16x1xf32>
    %332 = vector.broadcast %331 : vector<16x1xf32> to vector<16x128xf32>
    %333 = arith.subf %325, %332 : vector<16x128xf32>
    %334 = arith.mulf %333, %333 : vector<16x128xf32>
    %cst_171 = arith.constant dense<0.000000e+00> : vector<16xf32>
    %335 = vector.multi_reduction <add>, %334, %cst_171 [1] : vector<16x128xf32> to vector<16xf32>
    %336 = vector.shape_cast %335 : vector<16xf32> to vector<16x1xf32>
    %cst_172 = arith.constant 1.280000e+02 : f32
    %337 = vector.broadcast %cst_172 : f32 to vector<16x1xf32>
    %338 = arith.divf %336, %337 : vector<16x1xf32>
    %339 = vector.broadcast %331 : vector<16x1xf32> to vector<16x128xf32>
    %340 = arith.subf %325, %339 : vector<16x128xf32>
    %cst_173 = arith.constant 9.99999974E-6 : f32
    %341 = vector.broadcast %cst_173 : f32 to vector<16x1xf32>
    %342 = arith.addf %338, %341 : vector<16x1xf32>
    %343 = math.rsqrt %342 : vector<16x1xf32>
    %344 = vector.broadcast %343 : vector<16x1xf32> to vector<16x128xf32>
    %345 = arith.mulf %340, %344 : vector<16x128xf32>
    %346 = vector.broadcast %326 : vector<1x128xf32> to vector<16x128xf32>
    %347 = arith.mulf %345, %346 : vector<16x128xf32>
    %348 = vector.broadcast %327 : vector<1x128xf32> to vector<16x128xf32>
    %349 = arith.addf %347, %348 : vector<16x128xf32>
    %350 = arith.truncf %349 : vector<16x128xf32> to vector<16x128xbf16>
    %c1_174 = arith.constant 1 : index
    %c0_175 = arith.constant 0 : index
    %c0_176 = arith.constant 0 : index
    %351 = vector.load %arg3[%c1_174, %c0_175, %c0_176] : memref<2x128x256xbf16, #tpu.memory_space<vmem>>, vector<1x128x256xbf16>
    %352 = vector.shape_cast %351 : vector<1x128x256xbf16> to vector<128x256xbf16>
    %cst_177 = arith.constant dense<0.000000e+00> : vector<16x256xf32>
    %353 = tpu.matmul %350, %352, %cst_177 {dimension_numbers = #tpu.dot_dimension_numbers<[1], [0], [0], [1], [0, 0, 1, 1], [], []>} : vector<16x128xbf16>, vector<128x256xbf16>, vector<16x256xf32> -> vector<16x256xf32>
    %c26 = arith.constant 26 : index
    %c0_178 = arith.constant 0 : index
    %354 = vector.load %arg6[%c26, %c0_178] : memref<33x384xf32, #tpu.memory_space<vmem>>, vector<1x256xf32>
    %355 = vector.broadcast %354 : vector<1x256xf32> to vector<16x256xf32>
    %356 = arith.addf %353, %355 : vector<16x256xf32>
    %cst_179 = arith.constant 0.000000e+00 : f32
    %357 = vector.broadcast %cst_179 : f32 to vector<16x256xf32>
    %358 = arith.maximumf %356, %357 : vector<16x256xf32>
    %359 = arith.truncf %358 : vector<16x256xf32> to vector<16x256xbf16>
    %c1_180 = arith.constant 1 : index
    %c0_181 = arith.constant 0 : index
    %c0_182 = arith.constant 0 : index
    %360 = vector.load %arg4[%c1_180, %c0_181, %c0_182] : memref<2x256x128xbf16, #tpu.memory_space<vmem>>, vector<1x256x128xbf16>
    %361 = vector.shape_cast %360 : vector<1x256x128xbf16> to vector<256x128xbf16>
    %cst_183 = arith.constant dense<0.000000e+00> : vector<16x128xf32>
    %362 = tpu.matmul %359, %361, %cst_183 {dimension_numbers = #tpu.dot_dimension_numbers<[1], [0], [0], [1], [0, 0, 1, 1], [], []>} : vector<16x256xbf16>, vector<256x128xbf16>, vector<16x128xf32> -> vector<16x128xf32>
    %c27 = arith.constant 27 : index
    %c0_184 = arith.constant 0 : index
    %363 = vector.load %arg6[%c27, %c0_184] : memref<33x384xf32, #tpu.memory_space<vmem>>, vector<1x128xf32>
    %364 = vector.broadcast %363 : vector<1x128xf32> to vector<16x128xf32>
    %365 = arith.addf %362, %364 : vector<16x128xf32>
    %366 = arith.addf %349, %365 : vector<16x128xf32>
    %c30 = arith.constant 30 : index
    %c0_185 = arith.constant 0 : index
    %367 = vector.load %arg6[%c30, %c0_185] : memref<33x384xf32, #tpu.memory_space<vmem>>, vector<1x128xf32>
    %c31 = arith.constant 31 : index
    %c0_186 = arith.constant 0 : index
    %368 = vector.load %arg6[%c31, %c0_186] : memref<33x384xf32, #tpu.memory_space<vmem>>, vector<1x128xf32>
    %cst_187 = arith.constant dense<0.000000e+00> : vector<16xf32>
    %369 = vector.multi_reduction <add>, %366, %cst_187 [1] : vector<16x128xf32> to vector<16xf32>
    %370 = vector.shape_cast %369 : vector<16xf32> to vector<16x1xf32>
    %cst_188 = arith.constant 1.280000e+02 : f32
    %371 = vector.broadcast %cst_188 : f32 to vector<16x1xf32>
    %372 = arith.divf %370, %371 : vector<16x1xf32>
    %373 = vector.broadcast %372 : vector<16x1xf32> to vector<16x128xf32>
    %374 = arith.subf %366, %373 : vector<16x128xf32>
    %375 = arith.mulf %374, %374 : vector<16x128xf32>
    %cst_189 = arith.constant dense<0.000000e+00> : vector<16xf32>
    %376 = vector.multi_reduction <add>, %375, %cst_189 [1] : vector<16x128xf32> to vector<16xf32>
    %377 = vector.shape_cast %376 : vector<16xf32> to vector<16x1xf32>
    %cst_190 = arith.constant 1.280000e+02 : f32
    %378 = vector.broadcast %cst_190 : f32 to vector<16x1xf32>
    %379 = arith.divf %377, %378 : vector<16x1xf32>
    %380 = vector.broadcast %372 : vector<16x1xf32> to vector<16x128xf32>
    %381 = arith.subf %366, %380 : vector<16x128xf32>
    %cst_191 = arith.constant 9.99999974E-6 : f32
    %382 = vector.broadcast %cst_191 : f32 to vector<16x1xf32>
    %383 = arith.addf %379, %382 : vector<16x1xf32>
    %384 = math.rsqrt %383 : vector<16x1xf32>
    %385 = vector.broadcast %384 : vector<16x1xf32> to vector<16x128xf32>
    %386 = arith.mulf %381, %385 : vector<16x128xf32>
    %387 = vector.broadcast %367 : vector<1x128xf32> to vector<16x128xf32>
    %388 = arith.mulf %386, %387 : vector<16x128xf32>
    %389 = vector.broadcast %368 : vector<1x128xf32> to vector<16x128xf32>
    %390 = arith.addf %388, %389 : vector<16x128xf32>
    %391 = arith.truncf %390 : vector<16x128xf32> to vector<16x128xbf16>
    %c0_192 = arith.constant 0 : index
    %c0_193 = arith.constant 0 : index
    %392 = vector.load %arg5[%c0_192, %c0_193] : memref<128x256xbf16, #tpu.memory_space<vmem>>, vector<128x256xbf16>
    %cst_194 = arith.constant dense<0.000000e+00> : vector<16x256xf32>
    %393 = tpu.matmul %391, %392, %cst_194 {dimension_numbers = #tpu.dot_dimension_numbers<[1], [0], [0], [1], [0, 0, 1, 1], [], []>} : vector<16x128xbf16>, vector<128x256xbf16>, vector<16x256xf32> -> vector<16x256xf32>
    %c32_195 = arith.constant 32 : index
    %c0_196 = arith.constant 0 : index
    %394 = vector.load %arg6[%c32_195, %c0_196] : memref<33x384xf32, #tpu.memory_space<vmem>>, vector<1x256xf32>
    %395 = vector.broadcast %394 : vector<1x256xf32> to vector<16x256xf32>
    %396 = arith.addf %393, %395 : vector<16x256xf32>
    %c0_197 = arith.constant 0 : index
    %c0_198 = arith.constant 0 : index
    %397 = vector.load %arg7[%c0_197, %c0_198] : memref<16x256xf32, #tpu.memory_space<vmem>>, vector<16x256xf32>
    tpu.vector_store %arg7[%c0_197, %c0_198], %396 {strides = array<i32>} : memref<16x256xf32, #tpu.memory_space<vmem>>, vector<16x256xf32>,
    return
  }
}

</mosaic_0001>

<bundles_post_ra>
// kernel: poem_generator_forward.1
= control target key start
LH: loop header
LB: loop body
LE: loop exit
PB: predicated region body
PF: predicated region fallthrough
CT: control target
= control target key end

     0   :  { %12 = vsyncpa [#allocation5], 0  ;;  %s7940_s0 = inlined_call_operand.vmem [shape: s32[16,1], index: 0, kind: input, shape index: {}]   ;;  %s7941_s1 = inlined_call_operand.hbm [shape: bf16[256,128], index: 1, kind: input, shape index: {}]   ;;  %s7942_s2 = inlined_call_operand.hbm [shape: bf16[2,128,512], index: 2, kind: input, shape index: {}]   ;;  %s7943_s3 = inlined_call_operand.hbm [shape: bf16[2,128,256], index: 3, kind: input, shape index: {}]   ;;  %s7944_s4 = inlined_call_operand.hbm [shape: bf16[2,256,128], index: 4, kind: input, shape index: {}]   ;;  %s7945_s5 = inlined_call_operand.hbm [shape: bf16[128,256], index: 5, kind: input, shape index: {}]   ;;  %s7946_s6 = inlined_call_operand.hbm [shape: f32[33,384], index: 6, kind: input, shape index: {}]   ;;  %s7947_s7 = inlined_call_operand.vmem [shape: f32[16,256], index: 7, kind: output, shape index: {}]  }
   0x1   :  { %13 = vsyncpa [#allocation7], 0 }
   0x2   :  { %14 = vsyncpa [#allocation10], 0 }
   0x3   :  { %15 = vsyncpa [#allocation13], 0  ;;  %s6932_s24 = smov [#allocation6]  }
   0x4   :  { %s35_s25 = sshll.u32 %s6932_s24, 4  ;;  %s36_s25 = int_to_ptr.vmem [resolvable:$true] %s35_s25 }
   0x5   :  { %s6812_s26 = scalar_lea.vmem %s36_s25, 8192  ;;  %p6817_p1 = scmp.lt.s32.totalorder %s36_s25, %s36_s25 }
   0x6   :  { %p6813_p0 = scmp.ne.s32.totalorder %s36_s25, %s6812_s26  ;;  %p6818_p2 = scmp.lt.s32.totalorder %s6812_s26, %s6812_s26 }
   0x8   :  { %p6819_p3 = por %p6818_p2, %p6817_p1 }
   0xa   :  { %p6820_p4 = pnand %p6819_p3, %p6813_p0 }
   0xc   :  { %6823 = shalt.err (!%p6820_p4)
}
   0xd   :  { %s6933_s27 = smov 256   ;;  %s6934_s28 = smov 16  }
   0xe   :  { %41 = dma.hbm_to_vmem [thread:$0]  %s7942_s2, 8192, %s36_s25, [#allocation7], %s6933_s27, %s6933_s27, %s6934_s28  }
   0xf   :  { %s6935_s8 = smov [#allocation9]   ;;  %s6936_s10 = smov [#allocation4]  }
  0x10   :  { %s59_s9 = sshll.u32 %s6935_s8, 4  ;;  %s23_s11 = sshll.u32 %s6936_s10, 4  ;;  %s60_s9 = int_to_ptr.vmem [resolvable:$true] %s59_s9  ;;  %s24_s11 = int_to_ptr.vmem [resolvable:$true] %s23_s11 }
  0x11   :  { %s6832_s12 = scalar_lea.vmem %s60_s9, 4096  ;;  %p6837_p6 = scmp.lt.s32.totalorder %s60_s9, %s60_s9 }
  0x12   :  { %p6833_p5 = scmp.ne.s32.totalorder %s60_s9, %s6832_s12  ;;  %p6838_p7 = scmp.lt.s32.totalorder %s6832_s12, %s6832_s12 }
  0x14   :  { %p6839_p8 = por %p6838_p7, %p6837_p6 }
  0x16   :  { %p6840_p9 = pnand %p6839_p8, %p6833_p5 }
  0x18   :  { %6843 = shalt.err (!%p6840_p9)
}
  0x19   :  { %s6937_s13 = smov 64   ;;  %s6938_s14 = smov 4  }
  0x1a   :  { %65 = dma.hbm_to_vmem [thread:$0]  %s7944_s4, 4096, %s60_s9, [#allocation10], %s6937_s13, %s6937_s13, %s6938_s14  }
  0x1b   :  { %s6852_s2 = scalar_lea.vmem %s24_s11, 2048  ;;  %p6857_p11 = scmp.lt.s32.totalorder %s24_s11, %s24_s11 }
  0x1c   :  { %p6853_p10 = scmp.ne.s32.totalorder %s24_s11, %s6852_s2  ;;  %p6858_p12 = scmp.lt.s32.totalorder %s6852_s2, %s6852_s2 }
  0x1e   :  { %p6859_p13 = por %p6858_p12, %p6857_p11 }
  0x20   :  { %p6860_p0 = pnand %p6859_p13, %p6853_p10 }
  0x22   :  { %6863 = shalt.err (!%p6860_p0)
}
  0x23   :  { %29 = dma.hbm_to_vmem [thread:$0]  %s7941_s1, 2048, %s24_s11, [#allocation5], %s6937_s13, %s6937_s13, %s6938_s14  }
  0x24   :  { %s6939_s19 = smov [#allocation8]  }
  0x25   :  { %s47_s20 = sshll.u32 %s6939_s19, 4  ;;  %s48_s20 = int_to_ptr.vmem [resolvable:$true] %s47_s20 }
  0x26   :  { %s6872_s21 = scalar_lea.vmem %s48_s20, 4096  ;;  %p6877_p2 = scmp.lt.s32.totalorder %s48_s20, %s48_s20 }
  0x27   :  { %p6873_p1 = scmp.ne.s32.totalorder %s48_s20, %s6872_s21  ;;  %p6878_p3 = scmp.lt.s32.totalorder %s6872_s21, %s6872_s21 }
  0x29   :  { %p6879_p4 = por %p6878_p3, %p6877_p2 }
  0x2b   :  { %p6880_p5 = pnand %p6879_p4, %p6873_p1 }
  0x2d   :  { %6883 = shalt.err (!%p6880_p5)
}
  0x2e   :  { %s6940_s4 = smov 128   ;;  %s6941_s22 = smov 8  }
  0x2f   :  { %53 = dma.hbm_to_vmem [thread:$0]  %s7943_s3, 4096, %s48_s20, [#allocation7], %s6940_s4, %s6940_s4, %s6941_s22  }
  0x30   :  { %s6942_s25 = smov [#allocation11]   ;;  %s6943_s27 = smov [#allocation12]  }
  0x31   :  { %s71_s26 = sshll.u32 %s6942_s25, 4  ;;  %s83_s1 = sshll.u32 %s6943_s27, 4  ;;  %s72_s26 = int_to_ptr.vmem [resolvable:$true] %s71_s26  ;;  %s84_s1 = int_to_ptr.vmem [resolvable:$true] %s83_s1 }
  0x32   :  { %s6892_s29 = scalar_lea.vmem %s72_s26, 2048  ;;  %p6897_p7 = scmp.lt.s32.totalorder %s72_s26, %s72_s26 }
  0x33   :  { %p6893_p6 = scmp.ne.s32.totalorder %s72_s26, %s6892_s29  ;;  %p6898_p8 = scmp.lt.s32.totalorder %s6892_s29, %s6892_s29 }
  0x35   :  { %p6899_p9 = por %p6898_p8, %p6897_p7 }
  0x37   :  { %p6900_p10 = pnand %p6899_p9, %p6893_p6 }
  0x39   :  { %6903 = shalt.err (!%p6900_p10)
}
  0x3a   :  { %77 = dma.hbm_to_vmem [thread:$0]  %s7945_s5, 2048, %s72_s26, [#allocation10], %s6940_s4, %s6940_s4, %s6941_s22  }
  0x3b   :  { %s6912_s9 = scalar_lea.vmem %s84_s1, 1920  ;;  %p6917_p12 = scmp.lt.s32.totalorder %s84_s1, %s84_s1 }
  0x3c   :  { %p6913_p11 = scmp.ne.s32.totalorder %s84_s1, %s6912_s9  ;;  %p6918_p13 = scmp.lt.s32.totalorder %s6912_s9, %s6912_s9 }
  0x3e   :  { %p6919_p0 = por %p6918_p13, %p6917_p12 }
  0x40   :  { %p6920_p1 = pnand %p6919_p0, %p6913_p11 }
  0x42   :  { %6923 = shalt.err (!%p6920_p1)
}
  0x43   :  { %s6944_s3 = smov 384   ;;  %s6945_s10 = smov 24  }
  0x44   :  { %89 = dma.hbm_to_vmem [thread:$0]  %s7946_s6, 1920, %s84_s1, [#allocation13], %s6944_s3, %s6944_s3, %s6945_s10  }
  0x45   :  { %6924 = dma.done.wait [#allocation5], 2048  }
  0x46   :  { %6925 = vsyncadd [#allocation5], 4294965248 }
  0x47   :  { %6926 = dma.done.wait [#allocation7], 12288  }
  0x48   :  { %6927 = vsyncadd [#allocation7], 4294955008 }
  0x49   :  { %6928 = dma.done.wait [#allocation10], 6144  }
  0x4a   :  { %6929 = vsyncadd [#allocation10], 4294961152 }
  0x4b   :  { %6930 = dma.done.wait [#allocation13], 1920  }
  0x4c   :  { %6931 = vsyncadd [#allocation13], 4294965376  ;;  %v6946_v0 = vmov 0   ;;  %v209_v1 = vld [vmem:[%s7940_s0] sm:$0xff]  ;;  %v210_v2 = vld [vmem:[%s7940_s0 + $0x8] sm:$0xff]  ;;  %v6947_v28 = vmov 0.0   ;;  %v109_v29 = vlaneseq }
  0x4d   :  { %6571 = vset.pattern.permute.xlu0 %v6946_v0  ;;  %618 = vmatprep.mubr.bf16.mxu1 %v6946_v0  ;;  %v6572_v3 = vld [vmem:[#allocation4 + $0x78] sm:$0xff]   ;;  %v6574_v5 = vld [vmem:[#allocation4 + $0x70] sm:$0xff]   ;;  %v6576_v7 = vld [vmem:[#allocation4 + $0x68] sm:$0xff]   ;;  %v6948_v35 = vmov 1.0|1.0   ;;  %vm7952_vm6 = vmmov 0  }
  0x4e   :  { %213 = vperm.xlu0 %6571, %v209_v1   ;;  %v6573_v4 = vld [vmem:[#allocation4 + $0x38] sm:$0xff]   ;;  %5890 = vmatprep.subr.bf16.mxu0 %v6572_v3  ;;  %v6575_v6 = vld [vmem:[#allocation4 + $0x30] sm:$0xff]   ;;  %v6577_v8 = vld [vmem:[#allocation4 + $0x28] sm:$0xff]   ;;  %v7030_v30 = vand.u32 127, %v109_v29  ;;  %v7051_v63 = vshrl.u32 %v109_v29, 7  ;;  %vm7954_vm7 = vcmask 130048  }
  0x4f   :  { %5891 = vmatpush3.bf16.msra.mxu0 %v6573_v4  ;;  %v6578_v9 = vld [vmem:[#allocation4 + $0x60] sm:$0xff]   ;;  %v6580_v11 = vld [vmem:[#allocation4 + $0x58] sm:$0xff]   ;;  %v6582_v13 = vld [vmem:[#allocation4 + $0x50] sm:$0xff]   ;;  %s6950_s0 = smov 80   ;;  %s6951_s6 = smov 112   ;;  %vm7951_vm15 = vcmask 261248  }
  0x50   :  { %5892 = vmatprep.subr.bf16.mxu0 %v6574_v5  ;;  %v6579_v10 = vld [vmem:[#allocation4 + $0x20] sm:$0xff]   ;;  %v6581_v12 = vld [vmem:[#allocation4 + $0x18] sm:$0xff]   ;;  %v6583_v17 = vld [vmem:[#allocation4 + $0x10] sm:$0xff]   ;;  %v211_v32 = vadd.s32 128, %v7030_v30  ;;  %v7054_v1 = vsub.s32 0, %v7051_v63  ;;  %s6952_s2 = smov 96  }
  0x51   :  { %v6588_v14 = vld [vmem:[#allocation6 + $0xe4] ss:$16 sps:$4 sm:$0xff]   ;;  %v6590_v15 = vld [vmem:[#allocation6 + $0xe0] ss:$16 sps:$4 sm:$0xff]   ;;  %v6584_v19 = vld [vmem:[#allocation4 + $0x48] sm:$0xff]   ;;  %s6953_s17 = smov 48  }
  0x52   :  { %216 = vperm.xlu0 %6571, %v210_v2   ;;  %586 = vmatprep.subr.bf16.mxu1 %v6588_v14  ;;  %v6593_v16 = vld [vmem:[#allocation6 + $0xc4] ss:$16 sps:$4 sm:$0xff]   ;;  %v6595_v18 = vld [vmem:[#allocation6 + $0xc0] ss:$16 sps:$4 sm:$0xff]   ;;  %v6585_v21 = vld [vmem:[#allocation4 + $0x8] sm:$0xff]   ;;  %v453_v2 = vsub.s32 2, %v7051_v63 }
  0x53   :  { %5893 = vmatpush3.bf16.msra.mxu0 %v6575_v6  ;;  %587 = vmatpush1.bf16.msra.mxu1 %v6590_v15  ;;  %v6598_v20 = vld [vmem:[#allocation6 + $0xa4] ss:$16 sps:$4 sm:$0xff]   ;;  %v6600_v22 = vld [vmem:[#allocation6 + $0xa0] ss:$16 sps:$4 sm:$0xff]   ;;  %v6591_v34 = vld [vmem:[#allocation6 + $0xe8] ss:$16 sps:$4 sm:$0xff]  }
  0x54   :  { %5894 = vmatprep.subr.bf16.mxu0 %v6576_v7  ;;  %588 = vmatprep.subr.bf16.mxu1 %v6593_v16  ;;  %v6586_v23 = vld [vmem:[#allocation4 + $0x40] sm:$0xff]   ;;  %v6596_v36 = vld [vmem:[#allocation6 + $0xc8] ss:$16 sps:$4 sm:$0xff]   ;;  %v7063_v6 = vsub.s32 1, %v7051_v63  ;;  %s6954_s18 = smov 32  }
  0x55   :  { %v6603_v24 = vld [vmem:[#allocation6 + $0x84] ss:$16 sps:$4 sm:$0xff]   ;;  %v6605_v26 = vld [vmem:[#allocation6 + $0x80] ss:$16 sps:$4 sm:$0xff]   ;;  %v6601_v37 = vld [vmem:[#allocation6 + $0xa8] ss:$16 sps:$4 sm:$0xff]  }
  0x56   :  { %v6587_v25 = vld [vmem:[#allocation4] sm:$0xff]   ;;  %v6606_v38 = vld [vmem:[#allocation6 + $0x88] ss:$16 sps:$4 sm:$0xff]  }
  0x57   :  { %5895 = vmatpush3.bf16.msra.mxu0 %v6577_v8  ;;  %589 = vmatpush1.bf16.msra.mxu1 %v6595_v18  ;;  %v6608_v27 = vld [vmem:[#allocation6 + $0x64] ss:$16 sps:$4 sm:$0xff]   ;;  %v6610_v39 = vld [vmem:[#allocation6 + $0x60] ss:$16 sps:$4 sm:$0xff]   ;;  %v6611_v40 = vld [vmem:[#allocation6 + $0x68] ss:$16 sps:$4 sm:$0xff]  }
  0x58   :  { %5896 = vmatprep.subr.bf16.mxu0 %v6578_v9  ;;  %590 = vmatprep.subr.bf16.mxu1 %v6598_v20  ;;  %v6613_v41 = vld [vmem:[#allocation6 + $0x44] ss:$16 sps:$4 sm:$0xff]   ;;  %v6615_v42 = vld [vmem:[#allocation6 + $0x40] ss:$16 sps:$4 sm:$0xff]   ;;  %v6616_v43 = vld [vmem:[#allocation6 + $0x48] ss:$16 sps:$4 sm:$0xff]  }
  0x59   :  { %v6618_v44 = vld [vmem:[#allocation6 + $0x24] ss:$16 sps:$4 sm:$0xff]   ;;  %v6620_v45 = vld [vmem:[#allocation6 + $0x20] ss:$16 sps:$4 sm:$0xff]   ;;  %v6621_v46 = vld [vmem:[#allocation6 + $0x28] ss:$16 sps:$4 sm:$0xff]  }
  0x5a   :  { %v6623_v47 = vld [vmem:[#allocation6 + $0x4] ss:$16 sps:$4 sm:$0xff]   ;;  %v6625_v48 = vld [vmem:[#allocation6] ss:$16 sps:$4 sm:$0xff]   ;;  %v6626_v49 = vld [vmem:[#allocation6 + $0x8] ss:$16 sps:$4 sm:$0xff]  }
  0x5b   :  { %5897 = vmatpush3.bf16.msra.mxu0 %v6579_v10  ;;  %591 = vmatpush1.bf16.msra.mxu1 %v6600_v22  ;;  %v403_v57 = vld [vmem:[#allocation12] sm:$0xff]  ;;  %v404_v58 = vld [vmem:[#allocation12 + $0x18] sm:$0xff] }
  0x5c   :  { %5898 = vmatprep.subr.bf16.mxu0 %v6580_v11  ;;  %592 = vmatprep.subr.bf16.mxu1 %v6603_v24  ;;  %v441_v3 = vld [vmem:[#allocation12 + $0x30] ss:$8 sm:$0x7] }
  0x5d   :  { %v446_v4 = vrot.slane %v441_v3, %v7054_v1  ;;  %v7060_v5 = vrot.slane %v441_v3, %v453_v2  ;;  %v450_v11 = vrot.slane %v441_v3, %v7063_v6 }
  0x5f   :  { %5899 = vmatpush3.bf16.msra.mxu0 %v6581_v12  ;;  %593 = vmatpush1.bf16.msra.mxu1 %v6605_v26 }
  0x60   :  { %5900 = vmatprep.subr.bf16.mxu0 %v6582_v13  ;;  %594 = vmatprep.subr.bf16.mxu1 %v6608_v27 }
  0x63   :  { %5901 = vmatpush3.bf16.msra.mxu0 %v6583_v17  ;;  %595 = vmatpush1.bf16.msra.mxu1 %v6610_v39 }
  0x64   :  { %5902 = vmatprep.subr.bf16.mxu0 %v6584_v19  ;;  %596 = vmatprep.subr.bf16.mxu1 %v6613_v41 }
  0x67   :  { %5903 = vmatpush3.bf16.msra.mxu0 %v6585_v21  ;;  %597 = vmatpush1.bf16.msra.mxu1 %v6615_v42 }
  0x68   :  { %5904 = vmatprep.subr.bf16.mxu0 %v6586_v23  ;;  %598 = vmatprep.subr.bf16.mxu1 %v6618_v44 }
  0x6b   :  { %5905 = vmatpush3.bf16.msra.mxu0 %v6587_v25  ;;  %599 = vmatpush1.bf16.msra.mxu1 %v6620_v45 }
  0x6c   :  { %6162 = vmatprep.subr.bf16.mxu0 %v6947_v28  ;;  %600 = vmatprep.subr.bf16.mxu1 %v6623_v47 }
  0x6f   :  { %601 = vmatpush1.bf16.msra.mxu1 %v6625_v48  ;;  %v205_v48 = vshra.s32 %v7030_v30, 4 }
  0x71   :  { %vm7146_vm8 = vcmp.eq.s32.totalorder %v7051_v63, %v205_v48 }
  0xc9   :  { %v214_v31 = vpop.permute.xlu0 %213 }
  0xca   :  { %vm219_vm1 = vcmp.eq.s32.totalorder %v211_v32, %v214_v31  ;;  %vm218_vm3 = vcmp.eq.s32.totalorder %v7030_v30, %v214_v31 }
  0xcd   :  { %v217_v33 = vpop.permute.xlu0 %216 }
  0xce   :  { %vm220_vm0 = vcmp.eq.s32.totalorder %v7030_v30, %v217_v33  ;;  %vm221_vm2 = vcmp.eq.s32.totalorder %v211_v32, %v217_v33 }
  0xcf   :  { %vm5608_vm4 = vmpackc.low %vm221_vm2, %vm219_vm1  ;;  %vm7949_vm1 = vcmask 523648   ;;  %vm7950_vm2 = vcmask 654848  }
  0xd0   :  { %5609 = vmatprep.mubr.msk.bf16.mxu0 %vm5608_vm4, %v6948_v35  ;;  %vm5610_vm5 = vmpackc.low %vm220_vm0, %vm218_vm3  ;;  %vm7948_vm0 = vcmask 392448   ;;  %vm7957_vm3 = vcmask 786048   ;;  %vm7956_vm4 = vcmask 917248  }
  0xd1   :  { %5611 = vmatmul.mubr.msk.bf16.vlgmr.msra.gmra.mxu0 %vm5610_vm5, %v6948_v35  ;;  %vm7955_vm5 = vcmask 1048448  }
  0xd2   :  { %6163 = vmatpush3.bf16.msra.mxu0 %v6591_v34  ;;  %6178 = vmatprep.mubr.msk.bf16.mxu0 %vm7952_vm6, %v6947_v28 }
  0xd3   :  { %6164 = vmatprep.subr.bf16.mxu0 %v6947_v28 }
  0xd6   :  { %6165 = vmatpush3.bf16.msra.mxu0 %v6596_v36 }
  0xd7   :  { %6166 = vmatprep.subr.bf16.mxu0 %v6947_v28 }
  0xda   :  { %6167 = vmatpush3.bf16.msra.mxu0 %v6601_v37 }
  0xdb   :  { %6168 = vmatprep.subr.bf16.mxu0 %v6947_v28 }
  0xde   :  { %6169 = vmatpush3.bf16.msra.mxu0 %v6606_v38 }
  0xdf   :  { %6170 = vmatprep.subr.bf16.mxu0 %v6947_v28 }
  0xe2   :  { %6171 = vmatpush3.bf16.msra.mxu0 %v6611_v40 }
  0xe3   :  { %6172 = vmatprep.subr.bf16.mxu0 %v6947_v28 }
  0xe6   :  { %6173 = vmatpush3.bf16.msra.mxu0 %v6616_v43 }
  0xe7   :  { %6174 = vmatprep.subr.bf16.mxu0 %v6947_v28 }
  0xea   :  { %6175 = vmatpush3.bf16.msra.mxu0 %v6621_v46 }
  0xeb   :  { %6176 = vmatprep.subr.bf16.mxu0 %v6947_v28 }
  0xee   :  { %6177 = vmatpush3.bf16.msra.mxu0 %v6626_v49 }
 0x191   :  { %v5906_v50 = vpop.f32.mrf.mxu0 }
 0x193   :  { %v5907_v51 = vpop.f32.mrf.mxu0 }
 0x194   :  { %v5908_v52 = vadd.f32 %v5907_v51, %v5906_v50 }
 0x195   :  { %v5909_v53 = vpop.f32.mrf.mxu0 }
 0x196   :  { %v401_v55 = vmul.f32 11.313708, %v5908_v52  ;;  %v6955_v52 = vmov 1.0  }
 0x197   :  { %v5910_v54 = vpop.f32.mrf.mxu0 }
 0x198   :  { %v5911_v56 = vadd.f32 %v5910_v54, %v5909_v53  ;;  %v7044_v60 = vadd.f32 %v403_v57, %v401_v55 }
 0x19a   :  { %v402_v59 = vmul.f32 11.313708, %v5911_v56 }
 0x19c   :  { %v7046_v61 = vadd.f32 %v404_v58, %v402_v59 }
 0x19e   :  { %v439_v62 = vpack.c.bf16 %v7046_v61, %v7044_v60 }
 0x1a0   :  { %619 = vmatmul.mubr.bf16.vlgmr.msra.gmra.mxu1 %v439_v62  ;;  %6179 = vmatmul.mubr.bf16.vlgmr.msra.gmra.mxu0 %v439_v62 }
 0x260   :  { %v620_v7 = vpop.f32.mrf.mxu1  ;;  %v663_v8 = vpop.f32.mrf.mxu0 }
 0x261   :  { %v621_v9 = vadd.f32 %v620_v7, %v446_v4  ;;  %v7066_v10 = vadd.f32 %v663_v8, %v7060_v5 }
 0x262   :  { %v622_v12 = vpop.f32.mrf.mxu1  ;;  %v6180_v13 = vpop.f32.mrf.mxu0 }
 0x263   :  { %970 = vrot.lane.b32.xlu1 %v621_v9, %s6950_s0  ;;  %762 = vrot.lane.b32.xlu0 %v621_v9, %s6951_s6  ;;  %v623_v16 = vadd.f32 %v622_v12, %v450_v11 }
 0x264   :  { %6186 = vmatprep.mubr.msk.f32.mxu1 %vm7954_vm7, %v621_v9  ;;  %v624_v14 = vpop.f32.mrf.mxu1  ;;  %v7072_v15 = vpop.f32.mrf.mxu0 }
 0x265   :  { %v625_v20 = vadd.f32 %v624_v14, %v446_v4  ;;  %v7157_v54 = vadd.f32 %v7072_v15, %v7060_v5 }
 0x266   :  { %v626_v17 = vpop.f32.mrf.mxu1  ;;  %v6181_v18 = vpop.f32.mrf.mxu0 }
 0x267   :  { %v627_v19 = vadd.f32 %v626_v17, %v450_v11  ;;  %766 = vrot.lane.b32.xlu1 %v623_v16, %s6951_s6  ;;  %866 = vrot.lane.b32.xlu0 %v621_v9, %s6952_s2 }
 0x269   :  { %6182 = vmatprep.subr.msk.mxu1 %vm7954_vm7, %v627_v19 }
 0x26a   :  { %6183 = vmatpush3.xpose.msk.msra.mxu1 %vm7954_vm7, %v627_v19 }
 0x26b   :  { %6184 = vmatprep.subr.msk.mxu1 %vm7954_vm7, %v623_v16  ;;  %870 = vrot.lane.b32.xlu1 %v623_v16, %s6952_s2 }
 0x26c   :  { %764 = vrot.lane.b32.xlu0 %v625_v20, %s6951_s6 }
 0x26e   :  { %6185 = vmatpush3.xpose.msk.msra.mxu1 %vm7954_vm7, %v623_v16 }
 0x26f   :  { %974 = vrot.lane.b32.xlu1 %v623_v16, %s6950_s0 }
 0x270   :  { %868 = vrot.lane.b32.xlu0 %v625_v20, %s6952_s2 }
 0x271   :  { %6187 = vmatmul.mubr.msk.f32.vlgmr.msra.gmra.mxu1 %vm7954_vm7, %v625_v20 }
 0x273   :  { %768 = vrot.lane.b32.xlu1 %v627_v19, %s6951_s6 }
 0x274   :  { %1078 = vrot.lane.b32.xlu0 %v623_v16, %s6937_s13 }
 0x277   :  { %972 = vrot.lane.b32.xlu1 %v625_v20, %s6950_s0 }
 0x278   :  { %1074 = vrot.lane.b32.xlu0 %v621_v9, %s6937_s13 }
 0x27b   :  { %872 = vrot.lane.b32.xlu1 %v627_v19, %s6952_s2 }
 0x27c   :  { %1076 = vrot.lane.b32.xlu0 %v625_v20, %s6937_s13 }
 0x27f   :  { %1182 = vrot.lane.b32.xlu1 %v623_v16, %s6953_s17 }
 0x280   :  { %1080 = vrot.lane.b32.xlu0 %v627_v19, %s6937_s13 }
 0x283   :  { %976 = vrot.lane.b32.xlu1 %v627_v19, %s6950_s0 }
 0x284   :  { %1184 = vrot.lane.b32.xlu0 %v627_v19, %s6953_s17 }
 0x287   :  { %1178 = vrot.lane.b32.xlu1 %v621_v9, %s6953_s17 }
 0x288   :  { %1286 = vrot.lane.b32.xlu0 %v623_v16, %s6954_s18 }
 0x28b   :  { %1180 = vrot.lane.b32.xlu1 %v625_v20, %s6953_s17 }
 0x28c   :  { %1392 = vrot.lane.b32.xlu0 %v627_v19, %s6934_s28 }
 0x28f   :  { %1288 = vrot.lane.b32.xlu1 %v627_v19, %s6954_s18 }
 0x290   :  { %1282 = vrot.lane.b32.xlu0 %v621_v9, %s6954_s18 }
 0x293   :  { %1390 = vrot.lane.b32.xlu1 %v623_v16, %s6934_s28 }
 0x294   :  { %1386 = vrot.lane.b32.xlu0 %v621_v9, %s6934_s28 }
 0x297   :  { %1284 = vrot.lane.b32.xlu1 %v625_v20, %s6954_s18 }
 0x29b   :  { %1388 = vrot.lane.b32.xlu1 %v625_v20, %s6934_s28 }
 0x2d5   :  { %v971_v21 = vpop.permute.xlu1 %970  ;;  %v763_v22 = vpop.permute.xlu0 %762 }
 0x2d6   :  { %6193 = vmatprep.mubr.msk.f32.mxu1 %vm7954_vm7, %v763_v22 }
 0x2d9   :  { %v767_v23 = vpop.permute.xlu1 %766  ;;  %v867_v24 = vpop.permute.xlu0 %866 }
 0x2dd   :  { %v871_v25 = vpop.permute.xlu1 %870 }
 0x2de   :  { %v765_v26 = vpop.permute.xlu0 %764 }
 0x2e1   :  { %v975_v27 = vpop.permute.xlu1 %974 }
 0x2e2   :  { %v869_v29 = vpop.permute.xlu0 %868 }
 0x2e5   :  { %v769_v31 = vpop.permute.xlu1 %768 }
 0x2e6   :  { %v1079_v32 = vpop.permute.xlu0 %1078  ;;  %6189 = vmatprep.subr.msk.mxu1 %vm7954_vm7, %v769_v31 }
 0x2e7   :  { %6190 = vmatpush3.xpose.msk.msra.mxu1 %vm7954_vm7, %v769_v31 }
 0x2e8   :  { %6191 = vmatprep.subr.msk.mxu1 %vm7954_vm7, %v767_v23 }
 0x2e9   :  { %v973_v33 = vpop.permute.xlu1 %972 }
 0x2ea   :  { %v1075_v34 = vpop.permute.xlu0 %1074 }
 0x2eb   :  { %6214 = vmatprep.mubr.msk.f32.mxu0 %vm7954_vm7, %v1075_v34  ;;  %6192 = vmatpush3.xpose.msk.msra.mxu1 %vm7954_vm7, %v767_v23  ;;  %v139_v34 = vadd.s32 112, %v7051_v63 }
 0x2ed   :  { %v873_v35 = vpop.permute.xlu1 %872 }
 0x2ee   :  { %v1077_v36 = vpop.permute.xlu0 %1076  ;;  %6194 = vmatmul.mubr.msk.f32.vlgmr.msra.gmra.mxu1 %vm7954_vm7, %v765_v26  ;;  %6196 = vmatprep.subr.msk.mxu1 %vm7954_vm7, %v873_v35 }
 0x2ef   :  { %6197 = vmatpush3.xpose.msk.msra.mxu1 %vm7954_vm7, %v873_v35  ;;  %6200 = vmatprep.mubr.msk.f32.mxu1 %vm7954_vm7, %v867_v24  ;;  %v138_v35 = vadd.s32 104, %v7051_v63 }
 0x2f0   :  { %6198 = vmatprep.subr.msk.mxu1 %vm7954_vm7, %v871_v25 }
 0x2f1   :  { %v1183_v37 = vpop.permute.xlu1 %1182 }
 0x2f2   :  { %v1081_v38 = vpop.permute.xlu0 %1080 }
 0x2f3   :  { %6210 = vmatprep.subr.msk.mxu0 %vm7954_vm7, %v1081_v38  ;;  %6199 = vmatpush3.xpose.msk.msra.mxu1 %vm7954_vm7, %v871_v25 }
 0x2f4   :  { %6211 = vmatpush3.xpose.msk.msra.mxu0 %vm7954_vm7, %v1081_v38  ;;  %v155_v38 = vshra.s32 %v139_v34, 4 }
 0x2f5   :  { %6212 = vmatprep.subr.msk.mxu0 %vm7954_vm7, %v1079_v32  ;;  %v977_v39 = vpop.permute.xlu1 %976 }
 0x2f6   :  { %v1185_v40 = vpop.permute.xlu0 %1184  ;;  %6201 = vmatmul.mubr.msk.f32.vlgmr.msra.gmra.mxu1 %vm7954_vm7, %v869_v29  ;;  %6203 = vmatprep.subr.msk.mxu1 %vm7954_vm7, %v977_v39  ;;  %vm7191_vm10 = vcmp.eq.s32.totalorder %v155_v38, %v7030_v30  ;;  %v130_v38 = vadd.s32 40, %v7051_v63 }
 0x2f7   :  { %6204 = vmatpush3.xpose.msk.msra.mxu1 %vm7954_vm7, %v977_v39  ;;  %6207 = vmatprep.mubr.msk.f32.mxu1 %vm7954_vm7, %v971_v21  ;;  %v154_v39 = vshra.s32 %v138_v35, 4  ;;  %v131_v35 = vadd.s32 48, %v7051_v63 }
 0x2f8   :  { %6213 = vmatpush3.xpose.msk.msra.mxu0 %vm7954_vm7, %v1079_v32  ;;  %6205 = vmatprep.subr.msk.mxu1 %vm7954_vm7, %v975_v27 }
 0x2f9   :  { %v1179_v41 = vpop.permute.xlu1 %1178  ;;  %vm7203_vm11 = vcmp.eq.s32.totalorder %v154_v39, %v7030_v30  ;;  %v8002_v39 = vmov 0 }
 0x2fa   :  { %v1287_v42 = vpop.permute.xlu0 %1286 }
 0x2fb   :  { %6215 = vmatmul.mubr.msk.f32.vlgmr.msra.gmra.mxu0 %vm7954_vm7, %v1077_v36  ;;  %6206 = vmatpush3.xpose.msk.msra.mxu1 %vm7954_vm7, %v975_v27  ;;  %v137_v36 = vadd.s32 96, %v7051_v63 }
 0x2fc   :  { %6217 = vmatprep.subr.msk.mxu1 %vm7954_vm7, %v1185_v40 }
 0x2fd   :  { %v1181_v43 = vpop.permute.xlu1 %1180 }
 0x2fe   :  { %v1393_v44 = vpop.permute.xlu0 %1392  ;;  %6208 = vmatmul.mubr.msk.f32.vlgmr.msra.gmra.mxu1 %vm7954_vm7, %v973_v33  ;;  %v140_v33 = vadd.s32 120, %v7051_v63 }
 0x2ff   :  { %6218 = vmatpush3.xpose.msk.msra.mxu1 %vm7954_vm7, %v1185_v40  ;;  %6221 = vmatprep.mubr.msk.f32.mxu1 %vm7954_vm7, %v1179_v41  ;;  %v136_v40 = vadd.s32 88, %v7051_v63 }
 0x300   :  { %6219 = vmatprep.subr.msk.mxu1 %vm7954_vm7, %v1183_v37 }
 0x301   :  { %v1289_v45 = vpop.permute.xlu1 %1288 }
 0x302   :  { %v1283_v46 = vpop.permute.xlu0 %1282  ;;  %6224 = vmatprep.subr.msk.mxu0 %vm7954_vm7, %v1289_v45 }
 0x303   :  { %6228 = vmatprep.mubr.msk.f32.mxu0 %vm7954_vm7, %v1283_v46  ;;  %6220 = vmatpush3.xpose.msk.msra.mxu1 %vm7954_vm7, %v1183_v37  ;;  %v156_v37 = vshra.s32 %v140_v33, 4  ;;  %v152_v46 = vshra.s32 %v136_v40, 4  ;;  %v7998_v33 = vmov 0  ;;  %v146_v40 = vshra.s32 %v130_v38, 4 }
 0x304   :  { %6225 = vmatpush3.xpose.msk.msra.mxu0 %vm7954_vm7, %v1289_v45  ;;  %6231 = vmatprep.subr.msk.mxu1 %vm7954_vm7, %v1393_v44 }
 0x305   :  { %6226 = vmatprep.subr.msk.mxu0 %vm7954_vm7, %v1287_v42  ;;  %v1391_v47 = vpop.permute.xlu1 %1390  ;;  %vm7186_vm9 = vcmp.eq.s32.totalorder %v156_v37, %v7030_v30  ;;  %vm7225_vm13 = vcmp.eq.s32.totalorder %v152_v46, %v7030_v30  ;;  %v147_v37 = vshra.s32 %v131_v35, 4 }
 0x306   :  { %v1387_v49 = vpop.permute.xlu0 %1386  ;;  %6222 = vmatmul.mubr.msk.f32.vlgmr.msra.gmra.mxu1 %vm7954_vm7, %v1181_v43  ;;  %v153_v43 = vshra.s32 %v137_v36, 4  ;;  %v8000_v36 = vmov 0 }
 0x307   :  { %6232 = vmatpush3.xpose.msk.msra.mxu1 %vm7954_vm7, %v1393_v44  ;;  %6235 = vmatprep.mubr.msk.f32.mxu1 %vm7954_vm7, %v1387_v49  ;;  %v135_v44 = vadd.s32 80, %v7051_v63 }
 0x308   :  { %6227 = vmatpush3.xpose.msk.msra.mxu0 %vm7954_vm7, %v1287_v42  ;;  %6233 = vmatprep.subr.msk.mxu1 %vm7954_vm7, %v1391_v47  ;;  %vm7214_vm12 = vcmp.eq.s32.totalorder %v153_v43, %v7030_v30  ;;  %v129_v43 = vadd.s32 32, %v7051_v63 }
 0x309   :  { %v1285_v50 = vpop.permute.xlu1 %1284  ;;  %6238 = vmatprep.subr.msk.mxu0 %vm7186_vm9, %v6955_v52  ;;  %v151_v48 = vshra.s32 %v135_v44, 4  ;;  %v8004_v44 = vmov 0 }
 0x30a   :  { %v145_v46 = vshra.s32 %v129_v43, 4 }
 0x30b   :  { %6229 = vmatmul.mubr.msk.f32.vlgmr.msra.gmra.mxu0 %vm7954_vm7, %v1285_v50  ;;  %6234 = vmatpush3.xpose.msk.msra.mxu1 %vm7954_vm7, %v1391_v47  ;;  %vm7236_vm14 = vcmp.eq.s32.totalorder %v151_v48, %v7030_v30  ;;  %v7994_v50 = vmov 0  ;;  %v128_v48 = vadd.s32 24, %v7051_v63 }
 0x30c   :  { %6273 = vmatprep.subr.msk.mxu1 %vm7146_vm8, %v6955_v52  ;;  %6239 = vmatpush3.msk.msra.mxu0 %vm7186_vm9, %v6955_v52  ;;  %v7995_v50 = vsel %vm7236_vm14, 4294967295, %v7994_v50 }
 0x30d   :  { %v1389_v53 = vpop.permute.xlu1 %1388  ;;  %6240 = vmatprep.subr.msk.mxu0 %vm7191_vm10, %v6955_v52 }
 0x30e   :  { %6236 = vmatmul.mubr.msk.f32.vlgmr.msra.gmra.mxu1 %vm7954_vm7, %v1389_v53  ;;  %6241 = vmatpush3.msk.msra.mxu0 %vm7191_vm10, %v6955_v52 }
 0x30f   :  { %6274 = vmatpush3.msk.msra.mxu1 %vm7146_vm8, %v6955_v52  ;;  %6242 = vmatprep.subr.msk.mxu0 %vm7203_vm11, %v6955_v52 }
 0x310   :  { %6278 = vmatprep.subr.mxu1 %v7157_v54  ;;  %6243 = vmatpush3.msk.msra.mxu0 %vm7203_vm11, %v6955_v52 }
 0x311   :  { %6244 = vmatprep.subr.msk.mxu0 %vm7214_vm12, %v6955_v52 }
 0x312   :  { %6245 = vmatpush3.msk.msra.mxu0 %vm7214_vm12, %v6955_v52 }
 0x313   :  { %6246 = vmatprep.subr.msk.mxu0 %vm7225_vm13, %v6955_v52 }
 0x314   :  { %6247 = vmatpush3.msk.msra.mxu0 %vm7225_vm13, %v6955_v52 }
 0x315   :  { %6248 = vmatprep.subr.msk.mxu0 %vm7236_vm14, %v6955_v52 }
 0x316   :  { %6249 = vmatpush3.msk.msra.mxu0 %vm7236_vm14, %v6955_v52 }
 0x331   :  { %v6188_v55 = vpop.f32.mrf.mxu1 }
 0x332   :  { %v759_v56 = vmul.f32 0.25, %v6188_v55 }
 0x333   :  { %v749_v57 = vpop.f32.mrf.mxu1 }
 0x334   :  { %761 = vst.msk [vmem:[#allocation2 + $0x8] sm:$0xff] %vm7954_vm7, %v759_v56  ;;  %v758_v58 = vmul.f32 0.25, %v749_v57 }
 0x336   :  { %760 = vst.msk [vmem:[#allocation2] sm:$0xff] %vm7954_vm7, %v758_v58 }
 0x3ae   :  { %v6195_v59 = vpop.f32.mrf.mxu1 }
 0x3af   :  { %v854_v62 = vmul.f32 0.25, %v6195_v59 }
 0x3b0   :  { %v844_v3 = vpop.f32.mrf.mxu1 }
 0x3b1   :  { %v853_v4 = vmul.f32 0.25, %v844_v3  ;;  %859 = vrot.lane.b32.xlu1 %v854_v62, %s6934_s28  ;;  %v7257_v3 = vadd.s32 8, %v7051_v63 }
 0x3b3   :  { %857 = vrot.lane.b32.xlu0 %v853_v4, %s6934_s28  ;;  %v114_v4 = vand.u32 15, %v7030_v30 }
 0x3b6   :  { %v6202_v5 = vpop.f32.mrf.mxu1 }
 0x3b7   :  { %v958_v13 = vmul.f32 0.25, %v6202_v5 }
 0x3b8   :  { %v948_v12 = vpop.f32.mrf.mxu1 }
 0x3b9   :  { %v957_v14 = vmul.f32 0.25, %v948_v12 }
 0x3bb   :  { %v6216_v7 = vpop.f32.mrf.mxu0 }
 0x3bc   :  { %v1166_v8 = vmul.f32 0.25, %v6216_v7 }
 0x3bd   :  { %v1156_v9 = vpop.f32.mrf.mxu0 }
 0x3be   :  { %v1165_v11 = vmul.f32 0.25, %v1156_v9  ;;  %1171 = vrot.lane.b32.xlu1 %v1166_v8, %s6937_s13  ;;  %v6209_v15 = vpop.f32.mrf.mxu1  ;;  %v116_v8 = vsub.s32 %v7257_v3, %v114_v4 }
 0x3bf   :  { %v1062_v22 = vmul.f32 0.25, %v6209_v15 }
 0x3c0   :  { %1169 = vrot.lane.b32.xlu0 %v1165_v11, %s6937_s13  ;;  %v1052_v16 = vpop.f32.mrf.mxu1  ;;  %v115_v11 = vsub.s32 %v7051_v63, %v114_v4 }
 0x3c1   :  { %v1061_v24 = vmul.f32 0.25, %v1052_v16 }
 0x3c2   :  { %963 = vrot.lane.b32.xlu1 %v958_v13, %s6954_s18  ;;  %v118_v13 = vand.u32 1, %v116_v8  ;;  %v117_v15 = vand.u32 1, %v115_v11 }
 0x3c4   :  { %961 = vrot.lane.b32.xlu0 %v957_v14, %s6954_s18 }
 0x3c6   :  { %v6223_v19 = vpop.f32.mrf.mxu1 }
 0x3c7   :  { %v1270_v26 = vmul.f32 0.25, %v6223_v19 }
 0x3c8   :  { %v1260_v23 = vpop.f32.mrf.mxu1 }
 0x3c9   :  { %v1269_v27 = vmul.f32 0.25, %v1260_v23 }
 0x3cb   :  { %v6230_v17 = vpop.f32.mrf.mxu0 }
 0x3cc   :  { %v1374_v18 = vmul.f32 0.25, %v6230_v17 }
 0x3cd   :  { %v1364_v20 = vpop.f32.mrf.mxu0 }
 0x3ce   :  { %v1373_v21 = vmul.f32 0.25, %v1364_v20  ;;  %1379 = vrot.lane.b32.xlu1 %v1374_v18, %s6952_s2  ;;  %v6237_v25 = vpop.f32.mrf.mxu1  ;;  %v6956_v18 = vmov -1e+30  }
 0x3cf   :  { %v1478_v31 = vmul.f32 0.25, %v6237_v25  ;;  %v134_v25 = vadd.s32 72, %v7051_v63 }
 0x3d0   :  { %1377 = vrot.lane.b32.xlu0 %v1373_v21, %s6952_s2  ;;  %v1468_v29 = vpop.f32.mrf.mxu1 }
 0x3d1   :  { %v1477_v32 = vmul.f32 0.25, %v1468_v29  ;;  %v7996_v29 = vmov 0 }
 0x3d2   :  { %1067 = vrot.lane.b32.xlu1 %v1062_v22, %s6953_s17 }
 0x3d4   :  { %1065 = vrot.lane.b32.xlu0 %v1061_v24, %s6953_s17 }
 0x3d6   :  { %1275 = vrot.lane.b32.xlu1 %v1270_v26, %s6950_s0  ;;  %v150_v26 = vshra.s32 %v134_v25, 4 }
 0x3d8   :  { %1273 = vrot.lane.b32.xlu0 %v1269_v27, %s6950_s0  ;;  %v133_v27 = vadd.s32 64, %v7051_v63 }
 0x3da   :  { %1483 = vrot.lane.b32.xlu1 %v1478_v31, %s6951_s6  ;;  %v149_v31 = vshra.s32 %v133_v27, 4 }
 0x3dc   :  { %1481 = vrot.lane.b32.xlu0 %v1477_v32, %s6951_s6  ;;  %v132_v32 = vadd.s32 56, %v7051_v63 }
 0x3de   :  { %v148_v34 = vshra.s32 %v132_v32, 4 }
 0x423   :  { %v860_v53 = vpop.permute.xlu1 %859 }
 0x424   :  { %865 = vst.msk [vmem:[#allocation2 + $0x8] sm:$0xff] %vm7951_vm15, %v860_v53  ;;  %v8006_v53 = vmov 0 }
 0x425   :  { %v858_v55 = vpop.permute.xlu0 %857 }
 0x426   :  { %864 = vst.msk [vmem:[#allocation2] sm:$0xff] %vm7951_vm15, %v858_v55  ;;  %vm121_vm15 = vcmp.le.s32.totalorder %v114_v4, %v7051_v63  ;;  %v144_v55 = vshra.s32 %v128_v48, 4 }
 0x430   :  { %v1172_v56 = vpop.permute.xlu1 %1171 }
 0x432   :  { %v1170_v57 = vpop.permute.xlu0 %1169 }
 0x434   :  { %v964_v58 = vpop.permute.xlu1 %963 }
 0x435   :  { %969 = vst.msk [vmem:[#allocation2 + $0x8] sm:$0xff] %vm7948_vm0, %v964_v58 }
 0x436   :  { %v962_v59 = vpop.permute.xlu0 %961 }
 0x437   :  { %968 = vst.msk [vmem:[#allocation2] sm:$0xff] %vm7948_vm0, %v962_v59  ;;  %vm120_vm0 = vcmp.eq.s32.totalorder %v118_v13, 0  ;;  %v8010_v59 = vmov 0 }
 0x440   :  { %v1380_v62 = vpop.permute.xlu1 %1379 }
 0x442   :  { %v1378_v5 = vpop.permute.xlu0 %1377 }
 0x444   :  { %v1068_v7 = vpop.permute.xlu1 %1067 }
 0x445   :  { %1073 = vst.msk [vmem:[#allocation2 + $0x8] sm:$0xff] %vm7949_vm1, %v1068_v7 }
 0x446   :  { %v1066_v9 = vpop.permute.xlu0 %1065  ;;  %1177 = vst.msk [vmem:[#allocation2 + $0x8] sm:$0xff] %vm7950_vm2, %v1172_v56  ;;  %v127_v56 = vadd.s32 16, %v7051_v63 }
 0x447   :  { %1072 = vst.msk [vmem:[#allocation2] sm:$0xff] %vm7949_vm1, %v1066_v9  ;;  %vm122_vm1 = vcmp.le.s32.totalorder %v114_v4, %v7257_v3  ;;  %v8012_v4 = vmov 0 }
 0x448   :  { %v1276_v12 = vpop.permute.xlu1 %1275  ;;  %1176 = vst.msk [vmem:[#allocation2] sm:$0xff] %vm7950_vm2, %v1170_v57  ;;  %vm119_vm2 = vcmp.eq.s32.totalorder %v117_v15, 0  ;;  %vm124_vm6 = vmand %vm120_vm0, %vm122_vm1  ;;  %vm7325_vm0 = vcmp.eq.s32.totalorder %v147_v37, %v7030_v30  ;;  %vm7339_vm1 = vcmp.eq.s32.totalorder %v146_v40, %v7030_v30  ;;  %v8008_v57 = vmov 0 }
 0x449   :  { %1281 = vst.msk [vmem:[#allocation2 + $0x8] sm:$0xff] %vm7957_vm3, %v1276_v12  ;;  %vm123_vm7 = vmand %vm119_vm2, %vm121_vm15  ;;  %v7274_v19 = vsel %vm124_vm6, 0.0, %v6956_v18  ;;  %vm7289_vm6 = vcmp.eq.s32.totalorder %v150_v26, %v7030_v30  ;;  %vm7313_vm15 = vcmp.eq.s32.totalorder %v148_v34, %v7030_v30  ;;  %v8003_v39 = vsel %vm7325_vm0, 4294967295, %v8002_v39 }
 0x44a   :  { %v1274_v14 = vpop.permute.xlu0 %1273  ;;  %1385 = vst.msk [vmem:[#allocation2 + $0x8] sm:$0xff] %vm7956_vm4, %v1380_v62  ;;  %v7276_v21 = vsel %vm123_vm7, 0.0, %v6956_v18  ;;  %v7997_v29 = vsel %vm7289_vm6, 4294967295, %v7996_v29  ;;  %6250 = vmatprep.subr.msk.mxu0 %vm7289_vm6, %v6955_v52  ;;  %vm7301_vm7 = vcmp.eq.s32.totalorder %v149_v31, %v7030_v30  ;;  %v8001_v36 = vsel %vm7313_vm15, 4294967295, %v8000_v36 }
 0x44b   :  { %1280 = vst.msk [vmem:[#allocation2] sm:$0xff] %vm7957_vm3, %v1274_v14  ;;  %6251 = vmatpush3.msk.msra.mxu0 %vm7289_vm6, %v6955_v52  ;;  %v7999_v33 = vsel %vm7301_vm7, 4294967295, %v7998_v33  ;;  %v8005_v44 = vsel %vm7339_vm1, 4294967295, %v8004_v44  ;;  %vm7351_vm2 = vcmp.eq.s32.totalorder %v145_v46, %v7030_v30  ;;  %v143_v58 = vshra.s32 %v127_v56, 4 }
 0x44c   :  { %v1484_v16 = vpop.permute.xlu1 %1483  ;;  %1384 = vst.msk [vmem:[#allocation2] sm:$0xff] %vm7956_vm4, %v1378_v5  ;;  %6252 = vmatprep.subr.msk.mxu0 %vm7301_vm7, %v6955_v52  ;;  %v8007_v53 = vsel %vm7351_vm2, 4294967295, %v8006_v53  ;;  %v142_v62 = vshra.s32 %v7257_v3, 4  ;;  %v141_v5 = vshra.s32 %v7051_v63, 4  ;;  %v8014_v3 = vmov 0 }
 0x44d   :  { %1489 = vst.msk [vmem:[#allocation2 + $0x8] sm:$0xff] %vm7955_vm5, %v1484_v16  ;;  %6253 = vmatpush3.msk.msra.mxu0 %vm7301_vm7, %v6955_v52  ;;  %vm7378_vm4 = vcmp.eq.s32.totalorder %v143_v58, %v7030_v30  ;;  %vm8038_vm7 = vcmask 654848  }
 0x44e   :  { %v1482_v17 = vpop.permute.xlu0 %1481  ;;  %6254 = vmatprep.subr.msk.mxu0 %vm7313_vm15, %v6955_v52  ;;  %v8011_v59 = vsel %vm7378_vm4, 4294967295, %v8010_v59  ;;  %vm7392_vm3 = vcmp.eq.s32.totalorder %v142_v62, %v7030_v30 }
 0x44f   :  { %1488 = vst.msk [vmem:[#allocation2] sm:$0xff] %vm7955_vm5, %v1482_v17  ;;  %6255 = vmatpush3.msk.msra.mxu0 %vm7313_vm15, %v6955_v52  ;;  %vm7365_vm5 = vcmp.eq.s32.totalorder %v144_v55, %v7030_v30  ;;  %v8013_v4 = vsel %vm7392_vm3, 4294967295, %v8012_v4 }
 0x450   :  { %6256 = vmatprep.subr.msk.mxu0 %vm7325_vm0, %v6955_v52  ;;  %v8009_v57 = vsel %vm7365_vm5, 4294967295, %v8008_v57 }
 0x451   :  { %6257 = vmatpush3.msk.msra.mxu0 %vm7325_vm0, %v6955_v52 }
 0x452   :  { %6258 = vmatprep.subr.msk.mxu0 %vm7339_vm1, %v6955_v52 }
 0x453   :  { %6259 = vmatpush3.msk.msra.mxu0 %vm7339_vm1, %v6955_v52 }
 0x454   :  { %v1491_v20 = vld [vmem:[#allocation2 + $0x8] sm:$0xff]  ;;  %6260 = vmatprep.subr.msk.mxu0 %vm7351_vm2, %v6955_v52 }
 0x455   :  { %v7279_v22 = vadd.f32 %v1491_v20, %v7274_v19  ;;  %6261 = vmatpush3.msk.msra.mxu0 %vm7351_vm2, %v6955_v52 }
 0x456   :  { %v1490_v23 = vld [vmem:[#allocation2] sm:$0xff]  ;;  %6262 = vmatprep.subr.msk.mxu0 %vm7365_vm5, %v6955_v52 }
 0x457   :  { %1496 = vmax.xlane.f32.xlu1 %v7279_v22  ;;  %v7283_v24 = vadd.f32 %v1490_v23, %v7276_v21  ;;  %6263 = vmatpush3.msk.msra.mxu0 %vm7365_vm5, %v6955_v52 }
 0x458   :  { %6264 = vmatprep.subr.msk.mxu0 %vm7378_vm4, %v6955_v52 }
 0x459   :  { %1494 = vmax.xlane.f32.xlu0 %v7283_v24  ;;  %6265 = vmatpush3.msk.msra.mxu0 %vm7378_vm4, %v6955_v52  ;;  %vm7406_vm4 = vcmp.eq.s32.totalorder %v141_v5, %v7030_v30 }
 0x45a   :  { %6266 = vmatprep.subr.msk.mxu0 %vm7392_vm3, %v6955_v52  ;;  %v8015_v3 = vsel %vm7406_vm4, 4294967295, %v8014_v3 }
 0x45b   :  { %6267 = vmatpush3.msk.msra.mxu0 %vm7392_vm3, %v6955_v52  ;;  %vm8016_vm3 = vcmask 130048  }
 0x45c   :  { %6268 = vmatprep.subr.msk.mxu0 %vm7406_vm4, %v6955_v52  ;;  %vm8017_vm5 = vmmov %vm8016_vm3 }
 0x45d   :  { %6269 = vmatpush3.msk.msra.mxu0 %vm7406_vm4, %v6955_v52  ;;  %vm7966_vm4 = vcmask 64512   ;;  %vm8020_vm2 = vmmov %vm8016_vm3 }
 0x45e   :  { %vm8027_vm1 = vmmov %vm8020_vm2 }
 0x45f   :  { %vm8030_vm0 = vmmov %vm8027_vm1 }
 0x460   :  { %vm8031_vm15 = vmmov %vm8030_vm0 }
 0x468   :  { %1754 = vrot.lane.b32.xlu1 %v7066_v10, %s6951_s6 }
 0x46c   :  { %1853 = vrot.lane.b32.xlu1 %v7066_v10, %s6952_s2 }
 0x46f   :  { %1756 = vrot.lane.b32.xlu0 %v7157_v54, %s6951_s6 }
 0x470   :  { %1952 = vrot.lane.b32.xlu1 %v7066_v10, %s6950_s0 }
 0x473   :  { %1855 = vrot.lane.b32.xlu0 %v7157_v54, %s6952_s2 }
 0x474   :  { %2051 = vrot.lane.b32.xlu1 %v7066_v10, %s6937_s13 }
 0x477   :  { %1954 = vrot.lane.b32.xlu0 %v7157_v54, %s6950_s0 }
 0x478   :  { %2150 = vrot.lane.b32.xlu1 %v7066_v10, %s6953_s17 }
 0x47b   :  { %2053 = vrot.lane.b32.xlu0 %v7157_v54, %s6937_s13 }
 0x47c   :  { %2350 = vrot.lane.b32.xlu1 %v7157_v54, %s6934_s28 }
 0x47f   :  { %2152 = vrot.lane.b32.xlu0 %v7157_v54, %s6953_s17 }
 0x483   :  { %2251 = vrot.lane.b32.xlu0 %v7157_v54, %s6954_s18 }
 0x487   :  { %2249 = vrot.lane.b32.xlu0 %v7066_v10, %s6954_s18 }
 0x4e0   :  { %v1497_v30 = vpop.xlane.xlu1 %1496 }
 0x4e1   :  { %v1499_v7 = vsub.f32 %v7279_v22, %v1497_v30 }
 0x4e2   :  { %v1495_v8 = vpop.xlane.xlu0 %1494 }
 0x4e3   :  { %v1498_v9 = vsub.f32 %v7283_v24, %v1495_v8  ;;  %v1502_v11 = vmul.f32 1.442695, %v1499_v7 }
 0x4e4   :  { %v1755_v12 = vpop.permute.xlu1 %1754 }
 0x4e5   :  { %v1500_v13 = vmul.f32 1.442695, %v1498_v9 }
 0x4e6   :  { %v1757_v27 = vpop.permute.xlu0 %1756 }
 0x4e7   :  { %6772 = vpow2.f32 %v1500_v13 }
 0x4e8   :  { %6774 = vpow2.f32 %v1502_v11  ;;  %v7434_v14 = vpop.permute.xlu1 %1853 }
 0x4ec   :  { %v7436_v15 = vpop.permute.xlu1 %1952 }
 0x4f0   :  { %v7438_v16 = vpop.permute.xlu1 %2051 }
 0x4f4   :  { %v6773_v17 = vpop.eup %6772  ;;  %v7440_v18 = vpop.permute.xlu1 %2150 }
 0x4f5   :  { %v6775_v20 = vpop.eup %6774  ;;  %6270 = vmatprep.mubr.f32.mxu0 %v6773_v17 }
 0x4f6   :  { %6271 = vmatmul.mubr.f32.vlgmr.msra.gmra.mxu0 %v6775_v20 }
 0x4f8   :  { %v2351_v22 = vpop.permute.xlu1 %2350 }
 0x4f9   :  { %6327 = vmatprep.subr.mxu0 %v2351_v22 }
 0x4fa   :  { %6328 = vmatpush3.msra.mxu0 %v2351_v22  ;;  %v432_v22 = vld [vmem:[#allocation6 + $0xc8] sm:$0xff] }
 0x5b6   :  { %v6272_v23 = vpop.f32.mrf.mxu0 }
 0x5b8   :  { %v1570_v24 = vpop.f32.mrf.mxu0 }
 0x5b9   :  { %6776 = vrcp.f32 %v1570_v24 }
 0x5ba   :  { %6778 = vrcp.f32 %v6272_v23  ;;  %v434_v23 = vld [vmem:[#allocation6 + $0xd8] sm:$0xff] }
 0x5bb   :  { %v5709_v24 = vcombine.high %v432_v22, %v434_v23 }
 0x5c6   :  { %v6777_v25 = vpop.eup %6776 }
 0x5c7   :  { %v6779_v26 = vpop.eup %6778  ;;  %6275 = vmatprep.mubr.msk.f32.mxu1 %vm7966_vm4, %v6777_v25  ;;  %v428_v25 = vld [vmem:[#allocation6 + $0xa8] sm:$0xff] }
 0x5c8   :  { %6276 = vmatmul.mubr.msk.f32.vlgmr.msra.gmra.mxu1 %vm7966_vm4, %v6779_v26  ;;  %vm8019_vm4 = vmmov %vm8016_vm3  ;;  %v430_v26 = vld [vmem:[#allocation6 + $0xb8] sm:$0xff] }
 0x5c9   :  { %6279 = vmatpush3.msra.mxu1 %v7157_v54  ;;  %v1856_v54 = vpop.permute.xlu0 %1855 }
 0x5ca   :  { %6280 = vmatprep.subr.mxu1 %v7066_v10 }
 0x5cb   :  { %6281 = vmatpush3.msra.mxu1 %v7066_v10 }
 0x5cc   :  { %6285 = vmatprep.subr.mxu1 %v1757_v27 }
 0x5cd   :  { %v1955_v37 = vpop.permute.xlu0 %1954 }
 0x5d1   :  { %v2054_v38 = vpop.permute.xlu0 %2053 }
 0x5d5   :  { %v2153_v40 = vpop.permute.xlu0 %2152 }
 0x5d9   :  { %v2252_v43 = vpop.permute.xlu0 %2251 }
 0x5dd   :  { %v2250_v46 = vpop.permute.xlu0 %2249 }
 0x688   :  { %v6277_v31 = vpop.f32.mrf.mxu1 }
 0x689   :  { %v1664_v32 = vmul.f32 %v6775_v20, %v6277_v31 }
 0x68a   :  { %v1654_v34 = vpop.f32.mrf.mxu1 }
 0x68b   :  { %v1663_v35 = vmul.f32 %v6773_v17, %v1654_v34  ;;  %1750 = vrot.lane.b32.xlu1 %v1664_v32, %s6951_s6  ;;  %v436_v17 = vld [vmem:[#allocation6 + $0xe8] sm:$0xff] }
 0x68c   :  { %v424_v34 = vld [vmem:[#allocation6 + $0x88] sm:$0xff] }
 0x68d   :  { %1748 = vrot.lane.b32.xlu0 %v1663_v35, %s6951_s6  ;;  %6282 = vmatprep.mubr.msk.f32.mxu1 %vm8016_vm3, %v1663_v35 }
 0x68e   :  { %6283 = vmatmul.mubr.msk.f32.vlgmr.msra.gmra.mxu1 %vm8017_vm5, %v1664_v32  ;;  %vm8018_vm5 = vmmov %vm8016_vm3 }
 0x68f   :  { %6286 = vmatpush3.msra.mxu1 %v1757_v27  ;;  %1851 = vrot.lane.b32.xlu1 %v1664_v32, %s6952_s2 }
 0x690   :  { %6287 = vmatprep.subr.mxu1 %v1755_v12 }
 0x691   :  { %6288 = vmatpush3.msra.mxu1 %v1755_v12  ;;  %1849 = vrot.lane.b32.xlu0 %v1663_v35, %s6952_s2 }
 0x692   :  { %6292 = vmatprep.subr.mxu1 %v1856_v54 }
 0x693   :  { %1950 = vrot.lane.b32.xlu1 %v1664_v32, %s6950_s0 }
 0x695   :  { %1948 = vrot.lane.b32.xlu0 %v1663_v35, %s6950_s0 }
 0x697   :  { %2049 = vrot.lane.b32.xlu1 %v1664_v32, %s6937_s13 }
 0x699   :  { %2047 = vrot.lane.b32.xlu0 %v1663_v35, %s6937_s13 }
 0x69b   :  { %2148 = vrot.lane.b32.xlu1 %v1664_v32, %s6953_s17 }
 0x69d   :  { %2146 = vrot.lane.b32.xlu0 %v1663_v35, %s6953_s17 }
 0x69f   :  { %2247 = vrot.lane.b32.xlu1 %v1664_v32, %s6954_s18 }
 0x6a1   :  { %2348 = vrot.lane.b32.xlu0 %v7066_v10, %s6934_s28 }
 0x6a3   :  { %2245 = vrot.lane.b32.xlu1 %v1663_v35, %s6954_s18 }
 0x6a5   :  { %2344 = vrot.lane.b32.xlu0 %v1663_v35, %s6934_s28  ;;  %v426_v35 = vld [vmem:[#allocation6 + $0x98] sm:$0xff] }
 0x6a7   :  { %2346 = vrot.lane.b32.xlu1 %v1664_v32, %s6934_s28  ;;  %v5708_v32 = vcombine.high %v428_v25, %v430_v26 }
 0x6fd   :  { %v1751_v48 = vpop.permute.xlu1 %1750 }
 0x6ff   :  { %v1749_v55 = vpop.permute.xlu0 %1748 }
 0x700   :  { %6289 = vmatprep.mubr.msk.f32.mxu1 %vm8016_vm3, %v1749_v55  ;;  %vm8021_vm3 = vmmov %vm8020_vm2 }
 0x701   :  { %v1852_v56 = vpop.permute.xlu1 %1851  ;;  %6290 = vmatmul.mubr.msk.f32.vlgmr.msra.gmra.mxu1 %vm8018_vm5, %v1751_v48  ;;  %vm8022_vm5 = vmmov %vm8020_vm2 }
 0x702   :  { %6293 = vmatpush3.msra.mxu1 %v1856_v54 }
 0x703   :  { %6294 = vmatprep.subr.mxu1 %v7434_v14  ;;  %v1850_v10 = vpop.permute.xlu0 %1849 }
 0x704   :  { %6295 = vmatpush3.msra.mxu1 %v7434_v14  ;;  %6296 = vmatprep.mubr.msk.f32.mxu1 %vm8019_vm4, %v1850_v10  ;;  %vm8023_vm4 = vmmov %vm8020_vm2  ;;  %v418_v10 = vld [vmem:[#allocation6 + $0x58] sm:$0xff] }
 0x705   :  { %6299 = vmatprep.subr.mxu1 %v1955_v37  ;;  %v1951_v58 = vpop.permute.xlu1 %1950  ;;  %6297 = vmatmul.mubr.msk.f32.vlgmr.msra.gmra.mxu1 %vm8020_vm2, %v1852_v56  ;;  %v416_v56 = vld [vmem:[#allocation6 + $0x48] sm:$0xff] }
 0x706   :  { %6300 = vmatpush3.msra.mxu1 %v1955_v37 }
 0x707   :  { %6301 = vmatprep.subr.mxu1 %v7436_v15  ;;  %v1949_v62 = vpop.permute.xlu0 %1948 }
 0x708   :  { %6302 = vmatpush3.msra.mxu1 %v7436_v15  ;;  %6303 = vmatprep.mubr.msk.f32.mxu1 %vm8021_vm3, %v1949_v62  ;;  %vm8024_vm3 = vmmov %vm8020_vm2  ;;  %v412_v62 = vld [vmem:[#allocation6 + $0x28] sm:$0xff] }
 0x709   :  { %6306 = vmatprep.subr.mxu1 %v2054_v38  ;;  %v2050_v5 = vpop.permute.xlu1 %2049  ;;  %6304 = vmatmul.mubr.msk.f32.vlgmr.msra.gmra.mxu1 %vm8022_vm5, %v1951_v58  ;;  %vm8025_vm5 = vmmov %vm8020_vm2 }
 0x70a   :  { %6307 = vmatpush3.msra.mxu1 %v2054_v38  ;;  %v5707_v38 = vcombine.high %v424_v34, %v426_v35 }
 0x70b   :  { %6308 = vmatprep.subr.mxu1 %v7438_v16  ;;  %v2048_v30 = vpop.permute.xlu0 %2047 }
 0x70c   :  { %6309 = vmatpush3.msra.mxu1 %v7438_v16  ;;  %6310 = vmatprep.mubr.msk.f32.mxu1 %vm8023_vm4, %v2048_v30  ;;  %vm8026_vm4 = vmmov %vm8020_vm2 }
 0x70d   :  { %6313 = vmatprep.subr.mxu1 %v2153_v40  ;;  %v2149_v7 = vpop.permute.xlu1 %2148  ;;  %6311 = vmatmul.mubr.msk.f32.vlgmr.msra.gmra.mxu1 %vm8020_vm2, %v2050_v5  ;;  %v414_v5 = vld [vmem:[#allocation6 + $0x38] sm:$0xff] }
 0x70e   :  { %6314 = vmatpush3.msra.mxu1 %v2153_v40  ;;  %v420_v40 = vld [vmem:[#allocation6 + $0x68] sm:$0xff] }
 0x70f   :  { %6315 = vmatprep.subr.mxu1 %v7440_v18  ;;  %v2147_v8 = vpop.permute.xlu0 %2146 }
 0x710   :  { %6316 = vmatpush3.msra.mxu1 %v7440_v18  ;;  %6317 = vmatprep.mubr.msk.f32.mxu1 %vm8024_vm3, %v2147_v8  ;;  %vm8028_vm3 = vmmov 0   ;;  %v438_v18 = vld [vmem:[#allocation6 + $0xf8] sm:$0xff] }
 0x711   :  { %6320 = vmatprep.subr.mxu1 %v2252_v43  ;;  %v2248_v9 = vpop.permute.xlu1 %2247  ;;  %6318 = vmatmul.mubr.msk.f32.vlgmr.msra.gmra.mxu1 %vm8025_vm5, %v2149_v7  ;;  %vm8029_vm5 = vmmov %vm8027_vm1  ;;  %v5710_v20 = vcombine.high %v436_v17, %v438_v18  ;;  %v5705_v7 = vcombine.high %v416_v56, %v418_v10 }
 0x712   :  { %6321 = vmatpush3.msra.mxu1 %v2252_v43  ;;  %v422_v43 = vld [vmem:[#allocation6 + $0x78] sm:$0xff] }
 0x713   :  { %6322 = vmatprep.subr.mxu1 %v2250_v46  ;;  %v2349_v11 = vpop.permute.xlu0 %2348  ;;  %v5706_v55 = vcombine.high %v420_v40, %v422_v43 }
 0x714   :  { %6323 = vmatpush3.msra.mxu1 %v2250_v46  ;;  %6329 = vmatprep.subr.mxu0 %v2349_v11 }
 0x715   :  { %v2246_v12 = vpop.permute.xlu1 %2245  ;;  %6330 = vmatpush3.msra.mxu0 %v2349_v11  ;;  %6334 = vmatprep.subr.bf16.mxu1 %v6947_v28  ;;  %v408_v11 = vld [vmem:[#allocation6 + $0x8] sm:$0xff] }
 0x716   :  { %6324 = vmatprep.mubr.msk.f32.mxu1 %vm8026_vm4, %v2246_v12  ;;  %v410_v12 = vld [vmem:[#allocation6 + $0x18] sm:$0xff] }
 0x717   :  { %6325 = vmatmul.mubr.msk.f32.vlgmr.msra.gmra.mxu1 %vm8020_vm2, %v2248_v9  ;;  %v2345_v13 = vpop.permute.xlu0 %2344  ;;  %v5704_v9 = vcombine.high %v412_v62, %v414_v5  ;;  %vm8036_vm2 = vcmask 523648  }
 0x718   :  { %6331 = vmatprep.mubr.msk.f32.mxu0 %vm8027_vm1, %v2345_v13  ;;  %6350 = vmatprep.mubr.msk.bf16.mxu1 %vm8028_vm3, %v6947_v28  ;;  %vm8034_vm1 = vcmask 392448  }
 0x719   :  { %v2347_v14 = vpop.permute.xlu1 %2346  ;;  %6335 = vmatpush3.bf16.msra.mxu1 %v5710_v20  ;;  %vm8035_vm4 = vmmov %vm8034_vm1 }
 0x71a   :  { %6332 = vmatmul.mubr.msk.f32.vlgmr.msra.gmra.mxu0 %vm8029_vm5, %v2347_v14  ;;  %6336 = vmatprep.subr.bf16.mxu1 %v6947_v28  ;;  %v5703_v14 = vcombine.high %v408_v11, %v410_v12  ;;  %vm8037_vm5 = vmmov %vm8036_vm2 }
 0x71b   :  { %2693 = vmatprep.mubr.bf16.mxu0 %v6946_v0 }
 0x71d   :  { %6337 = vmatpush3.bf16.msra.mxu1 %v5709_v24 }
 0x71e   :  { %6338 = vmatprep.subr.bf16.mxu1 %v6947_v28 }
 0x721   :  { %6339 = vmatpush3.bf16.msra.mxu1 %v5708_v32 }
 0x722   :  { %6340 = vmatprep.subr.bf16.mxu1 %v6947_v28 }
 0x725   :  { %6341 = vmatpush3.bf16.msra.mxu1 %v5707_v38 }
 0x726   :  { %6342 = vmatprep.subr.bf16.mxu1 %v6947_v28 }
 0x729   :  { %6343 = vmatpush3.bf16.msra.mxu1 %v5706_v55 }
 0x72a   :  { %6344 = vmatprep.subr.bf16.mxu1 %v6947_v28 }
 0x72d   :  { %6345 = vmatpush3.bf16.msra.mxu1 %v5705_v7 }
 0x72e   :  { %6346 = vmatprep.subr.bf16.mxu1 %v6947_v28 }
 0x731   :  { %6347 = vmatpush3.bf16.msra.mxu1 %v5704_v9  ;;  %v6630_v9 = vld [vmem:[#allocation8 + $0x74] ss:$8 sps:$4 sm:$0xff]  }
 0x732   :  { %6348 = vmatprep.subr.bf16.mxu1 %v6947_v28  ;;  %2661 = vmatprep.subr.bf16.mxu0 %v6630_v9 }
 0x735   :  { %6349 = vmatpush3.bf16.msra.mxu1 %v5703_v14 }
 0x74e   :  { %v6284_v15 = vpop.f32.mrf.mxu1 }
 0x74f   :  { %1747 = vst.msk [vmem:[#allocation3 + $0x8] sm:$0xff] %vm8030_vm0, %v6284_v15 }
 0x750   :  { %v1737_v16 = vpop.f32.mrf.mxu1 }
 0x751   :  { %1746 = vst.msk [vmem:[#allocation3] sm:$0xff] %vm8031_vm15, %v1737_v16  ;;  %vm8032_vm15 = vcmask 261248  }
 0x752   :  { %vm8033_vm0 = vmmov %vm8032_vm15 }
 0x7c1   :  { %v6291_v27 = vpop.f32.mrf.mxu1 }
 0x7c2   :  { %1843 = vrot.lane.b32.xlu1 %v6291_v27, %s6934_s28 }
 0x7c3   :  { %v1830_v31 = vpop.f32.mrf.mxu1 }
 0x7c4   :  { %1841 = vrot.lane.b32.xlu0 %v1830_v31, %s6934_s28 }
 0x7c5   :  { %v6298_v54 = vpop.f32.mrf.mxu1 }
 0x7c6   :  { %1942 = vrot.lane.b32.xlu1 %v6298_v54, %s6954_s18 }
 0x7c7   :  { %v1929_v37 = vpop.f32.mrf.mxu1 }
 0x7c8   :  { %1940 = vrot.lane.b32.xlu0 %v1929_v37, %s6954_s18 }
 0x7c9   :  { %v6305_v46 = vpop.f32.mrf.mxu1 }
 0x7ca   :  { %2041 = vrot.lane.b32.xlu1 %v6305_v46, %s6953_s17 }
 0x7cb   :  { %v2028_v48 = vpop.f32.mrf.mxu1 }
 0x7cc   :  { %2039 = vrot.lane.b32.xlu0 %v2028_v48, %s6953_s17  ;;  %v2446_v48 = vld [vmem:[#allocation12 + $0x31] ss:$0 sm:$0xff] }
 0x7cd   :  { %v6312_v58 = vpop.f32.mrf.mxu1 }
 0x7ce   :  { %2140 = vrot.lane.b32.xlu1 %v6312_v58, %s6937_s13 }
 0x7cf   :  { %v2127_v30 = vpop.f32.mrf.mxu1 }
 0x7d0   :  { %2138 = vrot.lane.b32.xlu0 %v2127_v30, %s6937_s13 }
 0x7d1   :  { %v6319_v8 = vpop.f32.mrf.mxu1 }
 0x7d2   :  { %2239 = vrot.lane.b32.xlu1 %v6319_v8, %s6950_s0  ;;  %v6628_v8 = vld [vmem:[#allocation8 + $0x70] ss:$8 sps:$4 sm:$0xff]  }
 0x7d3   :  { %v2226_v13 = vpop.f32.mrf.mxu1  ;;  %2662 = vmatpush1.bf16.msra.mxu0 %v6628_v8 }
 0x7d4   :  { %2237 = vrot.lane.b32.xlu0 %v2226_v13, %s6950_s0 }
 0x7d7   :  { %v6326_v15 = vpop.f32.mrf.mxu1 }
 0x7d8   :  { %2338 = vrot.lane.b32.xlu1 %v6326_v15, %s6952_s2 }
 0x7d9   :  { %v2325_v16 = vpop.f32.mrf.mxu1 }
 0x7da   :  { %2336 = vrot.lane.b32.xlu0 %v2325_v16, %s6952_s2  ;;  %v6333_v17 = vpop.f32.mrf.mxu0 }
 0x7dc   :  { %2437 = vrot.lane.b32.xlu1 %v6333_v17, %s6951_s6  ;;  %v2424_v18 = vpop.f32.mrf.mxu0  ;;  %v6633_v17 = vld [vmem:[#allocation8 + $0x64] ss:$8 sps:$4 sm:$0xff]  }
 0x7dd   :  { %2663 = vmatprep.subr.bf16.mxu0 %v6633_v17  ;;  %v2523_v17 = vld [vmem:[#allocation12 + $0x35] ss:$0 sm:$0xff] }
 0x7de   :  { %2435 = vrot.lane.b32.xlu0 %v2424_v18, %s6951_s6  ;;  %v6631_v18 = vld [vmem:[#allocation8 + $0x60] ss:$8 sps:$4 sm:$0xff]  }
 0x7df   :  { %2664 = vmatpush1.bf16.msra.mxu0 %v6631_v18 }
 0x834   :  { %v1844_v20 = vpop.permute.xlu1 %1843 }
 0x835   :  { %1848 = vst.msk [vmem:[#allocation3 + $0x8] sm:$0xff] %vm8032_vm15, %v1844_v20  ;;  %vm8039_vm15 = vmmov %vm8038_vm7  ;;  %v6636_v20 = vld [vmem:[#allocation8 + $0x54] ss:$8 sps:$4 sm:$0xff]  }
 0x836   :  { %v1842_v22 = vpop.permute.xlu0 %1841  ;;  %2665 = vmatprep.subr.bf16.mxu0 %v6636_v20 }
 0x837   :  { %1847 = vst.msk [vmem:[#allocation3] sm:$0xff] %vm8033_vm0, %v1842_v22  ;;  %vm8040_vm0 = vcmask 786048   ;;  %v6634_v22 = vld [vmem:[#allocation8 + $0x50] ss:$8 sps:$4 sm:$0xff]  }
 0x838   :  { %v1943_v23 = vpop.permute.xlu1 %1942  ;;  %2666 = vmatpush1.bf16.msra.mxu0 %v6634_v22 }
 0x839   :  { %1947 = vst.msk [vmem:[#allocation3 + $0x8] sm:$0xff] %vm8034_vm1, %v1943_v23  ;;  %vm8041_vm1 = vmmov %vm8040_vm0  ;;  %v6637_v23 = vld [vmem:[#allocation8 + $0x40] ss:$8 sps:$4 sm:$0xff]  }
 0x83a   :  { %v1941_v24 = vpop.permute.xlu0 %1940 }
 0x83b   :  { %1946 = vst.msk [vmem:[#allocation3] sm:$0xff] %vm8035_vm4, %v1941_v24  ;;  %vm8042_vm4 = vcmask 917248   ;;  %v6639_v24 = vld [vmem:[#allocation8 + $0x44] ss:$8 sps:$4 sm:$0xff]  }
 0x83c   :  { %v2042_v25 = vpop.permute.xlu1 %2041  ;;  %2667 = vmatprep.subr.bf16.mxu0 %v6639_v24  ;;  %v6662_v24 = vld [vmem:[#allocation9 + $0x50] sm:$0xff]  }
 0x83d   :  { %2046 = vst.msk [vmem:[#allocation3 + $0x8] sm:$0xff] %vm8036_vm2, %v2042_v25  ;;  %vm8043_vm2 = vmmov %vm8042_vm4  ;;  %v6642_v25 = vld [vmem:[#allocation8 + $0x34] ss:$8 sps:$4 sm:$0xff]   ;;  %2668 = vmatpush1.bf16.msra.mxu0 %v6637_v23 }
 0x83e   :  { %v2040_v26 = vpop.permute.xlu0 %2039  ;;  %2669 = vmatprep.subr.bf16.mxu0 %v6642_v25  ;;  %v6663_v25 = vld [vmem:[#allocation9 + $0x10] sm:$0xff]  }
 0x83f   :  { %2045 = vst.msk [vmem:[#allocation3] sm:$0xff] %vm8037_vm5, %v2040_v26  ;;  %vm8044_vm5 = vcmask 1048448   ;;  %v6640_v26 = vld [vmem:[#allocation8 + $0x30] ss:$8 sps:$4 sm:$0xff]  }
 0x840   :  { %v2141_v27 = vpop.permute.xlu1 %2140 }
 0x841   :  { %2145 = vst.msk [vmem:[#allocation3 + $0x8] sm:$0xff] %vm8038_vm7, %v2141_v27  ;;  %vm8045_vm7 = vmmov %vm8044_vm5  ;;  %v6645_v27 = vld [vmem:[#allocation8 + $0x24] ss:$8 sps:$4 sm:$0xff]   ;;  %2670 = vmatpush1.bf16.msra.mxu0 %v6640_v26 }
 0x842   :  { %v2139_v31 = vpop.permute.xlu0 %2138  ;;  %2671 = vmatprep.subr.bf16.mxu0 %v6645_v27  ;;  %v6664_v26 = vld [vmem:[#allocation9 + $0x48] sm:$0xff]  }
 0x843   :  { %2144 = vst.msk [vmem:[#allocation3] sm:$0xff] %vm8039_vm15, %v2139_v31  ;;  %v6643_v31 = vld [vmem:[#allocation8 + $0x20] ss:$8 sps:$4 sm:$0xff]   ;;  %vm8046_vm15 = vcmask 130048  }
 0x844   :  { %v2240_v32 = vpop.permute.xlu1 %2239  ;;  %v6665_v27 = vld [vmem:[#allocation9 + $0x8] sm:$0xff]  }
 0x845   :  { %2244 = vst.msk [vmem:[#allocation3 + $0x8] sm:$0xff] %vm8040_vm0, %v2240_v32  ;;  %v6648_v32 = vld [vmem:[#allocation8 + $0x14] ss:$8 sps:$4 sm:$0xff]   ;;  %2672 = vmatpush1.bf16.msra.mxu0 %v6643_v31  ;;  %v6667_v31 = vld [vmem:[#allocation9] sm:$0xff]   ;;  %vm8047_vm0 = vmmov %vm8046_vm15 }
 0x846   :  { %v2238_v34 = vpop.permute.xlu0 %2237  ;;  %2673 = vmatprep.subr.bf16.mxu0 %v6648_v32  ;;  %vm8060_vm6 = vmmov %vm8047_vm0 }
 0x847   :  { %2243 = vst.msk [vmem:[#allocation3] sm:$0xff] %vm8041_vm1, %v2238_v34  ;;  %v6646_v34 = vld [vmem:[#allocation8 + $0x10] ss:$8 sps:$4 sm:$0xff]   ;;  %vm8048_vm1 = vmmov %vm8047_vm0 }
 0x848   :  { %vm8070_vm14 = vmmov %vm8047_vm0 }
 0x849   :  { %2674 = vmatpush1.bf16.msra.mxu0 %v6646_v34 }
 0x84a   :  { %v2339_v35 = vpop.permute.xlu1 %2338 }
 0x84b   :  { %2343 = vst.msk [vmem:[#allocation3 + $0x8] sm:$0xff] %vm8042_vm4, %v2339_v35  ;;  %v6651_v35 = vld [vmem:[#allocation8 + $0x4] ss:$8 sps:$4 sm:$0xff]   ;;  %vm8049_vm4 = vmmov %vm8047_vm0 }
 0x84c   :  { %v2337_v54 = vpop.permute.xlu0 %2336  ;;  %2675 = vmatprep.subr.bf16.mxu0 %v6651_v35 }
 0x84d   :  { %2342 = vst.msk [vmem:[#allocation3] sm:$0xff] %vm8043_vm2, %v2337_v54  ;;  %v6649_v54 = vld [vmem:[#allocation8] ss:$8 sps:$4 sm:$0xff]   ;;  %vm8050_vm2 = vmmov %vm8047_vm0 }
 0x84e   :  { %v2438_v37 = vpop.permute.xlu1 %2437  ;;  %2676 = vmatpush1.bf16.msra.mxu0 %v6649_v54 }
 0x84f   :  { %2442 = vst.msk [vmem:[#allocation3 + $0x8] sm:$0xff] %vm8044_vm5, %v2438_v37  ;;  %v6652_v37 = vld [vmem:[#allocation9 + $0x78] sm:$0xff]   ;;  %vm8051_vm5 = vmmov %vm8047_vm0 }
 0x850   :  { %v2436_v38 = vpop.permute.xlu0 %2435  ;;  %6015 = vmatprep.subr.bf16.mxu1 %v6652_v37 }
 0x851   :  { %2441 = vst.msk [vmem:[#allocation3] sm:$0xff] %vm8045_vm7, %v2436_v38  ;;  %v6653_v38 = vld [vmem:[#allocation9 + $0x38] sm:$0xff]   ;;  %vm8052_vm7 = vmmov %vm8047_vm0 }
 0x856   :  { %v2444_v43 = vld [vmem:[#allocation3 + $0x8] sm:$0xff] }
 0x858   :  { %v2443_v40 = vld [vmem:[#allocation3] sm:$0xff] }
 0x859   :  { %v2445_v46 = vpack.c.bf16 %v2444_v43, %v2443_v40  ;;  %v6654_v40 = vld [vmem:[#allocation9 + $0x70] sm:$0xff]  }
 0x85a   :  { %v6655_v43 = vld [vmem:[#allocation9 + $0x30] sm:$0xff]  }
 0x85b   :  { %6351 = vmatmul.mubr.bf16.vlgmr.msra.gmra.mxu1 %v2445_v46  ;;  %v6656_v46 = vld [vmem:[#allocation9 + $0x68] sm:$0xff]  }
 0x85c   :  { %6016 = vmatpush3.bf16.msra.mxu1 %v6653_v38 }
 0x85d   :  { %6017 = vmatprep.subr.bf16.mxu1 %v6654_v40 }
 0x860   :  { %6018 = vmatpush3.bf16.msra.mxu1 %v6655_v43 }
 0x861   :  { %6019 = vmatprep.subr.bf16.mxu1 %v6656_v46 }
 0x91b   :  { %v2513_v55 = vpop.f32.mrf.mxu1 }
 0x91c   :  { %v2514_v56 = vadd.f32 %v2513_v55, %v2446_v48  ;;  %v6658_v55 = vld [vmem:[#allocation9 + $0x60] sm:$0xff]  }
 0x91d   :  { %v6352_v10 = vpop.f32.mrf.mxu1 }
 0x91e   :  { %v2520_v58 = vadd.f32 %v2514_v56, %v7044_v60  ;;  %v6659_v56 = vld [vmem:[#allocation9 + $0x20] sm:$0xff]   ;;  %v6660_v10 = vld [vmem:[#allocation9 + $0x58] sm:$0xff]  }
 0x91f   :  { %v2516_v62 = vpop.f32.mrf.mxu1 }
 0x920   :  { %v2517_v5 = vadd.f32 %v2516_v62, %v2446_v48  ;;  %2524 = vadd.xlane.f32.xlu0 %v2520_v58  ;;  %v6657_v48 = vld [vmem:[#allocation9 + $0x28] sm:$0xff]  }
 0x921   :  { %v6353_v30 = vpop.f32.mrf.mxu1  ;;  %6020 = vmatpush3.bf16.msra.mxu1 %v6657_v48 }
 0x922   :  { %v2521_v7 = vadd.f32 %v2517_v5, %v7046_v61  ;;  %6021 = vmatprep.subr.bf16.mxu1 %v6658_v55 }
 0x924   :  { %2526 = vadd.xlane.f32.xlu1 %v2521_v7 }
 0x925   :  { %6022 = vmatpush3.bf16.msra.mxu1 %v6659_v56 }
 0x926   :  { %6023 = vmatprep.subr.bf16.mxu1 %v6660_v10 }
 0x9a9   :  { %v2525_v11 = vpop.xlane.xlu0 %2524 }
 0x9aa   :  { %v2529_v12 = vmul.f32 0.0078125, %v2525_v11 }
 0x9ac   :  { %v7530_v13 = vsub.f32 %v2520_v58, %v2529_v12  ;;  %v6661_v58 = vld [vmem:[#allocation9 + $0x18] sm:$0xff]  }
 0x9ad   :  { %v2527_v14 = vpop.xlane.xlu1 %2526  ;;  %6024 = vmatpush3.bf16.msra.mxu1 %v6661_v58 }
 0x9ae   :  { %v2530_v15 = vmul.f32 0.0078125, %v2527_v14  ;;  %v2533_v60 = vmul.f32 %v7530_v13, %v7530_v13  ;;  %v2522_v14 = vld [vmem:[#allocation12 + $0x34] ss:$0 sm:$0xff]  ;;  %6025 = vmatprep.subr.bf16.mxu1 %v6662_v24  ;;  %v6671_v24 = vld [vmem:[#allocation6 + $0x1e8] ss:$16 sps:$4 sm:$0xff]  }
 0x9b0   :  { %2535 = vadd.xlane.f32.xlu0 %v2533_v60  ;;  %v7534_v16 = vsub.f32 %v2521_v7, %v2530_v15 }
 0x9b1   :  { %6026 = vmatpush3.bf16.msra.mxu1 %v6663_v25 }
 0x9b2   :  { %v2534_v61 = vmul.f32 %v7534_v16, %v7534_v16  ;;  %6027 = vmatprep.subr.bf16.mxu1 %v6664_v26 }
 0x9b4   :  { %2537 = vadd.xlane.f32.xlu0 %v2534_v61 }
 0x9b5   :  { %6028 = vmatpush3.bf16.msra.mxu1 %v6665_v27 }
 0xa39   :  { %v2536_v62 = vpop.xlane.xlu0 %2535 }
 0xa3a   :  { %v2539_v5 = vmul.f32 0.0078125, %v2536_v62 }
 0xa3c   :  { %v2541_v30 = vadd.f32 1e-05, %v2539_v5 }
 0xa3d   :  { %v2538_v7 = vpop.xlane.xlu0 %2537 }
 0xa3e   :  { %6780 = vrsqrt.f32 %v2541_v30  ;;  %v2540_v8 = vmul.f32 0.0078125, %v2538_v7  ;;  %v2742_v7 = vld [vmem:[#allocation12 + $0x33] ss:$0 sm:$0xff] }
 0xa40   :  { %v2542_v9 = vadd.f32 1e-05, %v2540_v8 }
 0xa42   :  { %6782 = vrsqrt.f32 %v2542_v9 }
 0xa4b   :  { %v6781_v11 = vpop.eup %6780 }
 0xa4c   :  { %v2545_v12 = vmul.f32 %v6781_v11, %v7530_v13  ;;  %v6666_v13 = vld [vmem:[#allocation9 + $0x40] sm:$0xff]  }
 0xa4d   :  { %6029 = vmatprep.subr.bf16.mxu1 %v6666_v13 }
 0xa4e   :  { %v2547_v61 = vmul.f32 %v2545_v12, %v2522_v14  ;;  %6030 = vmatpush3.bf16.msra.mxu1 %v6667_v31 }
 0xa4f   :  { %v6783_v15 = vpop.eup %6782  ;;  %6354 = vmatprep.subr.bf16.mxu1 %v6947_v28 }
 0xa50   :  { %v2546_v60 = vmul.f32 %v6783_v15, %v7534_v16  ;;  %v2549_v20 = vadd.f32 %v2547_v61, %v2523_v17  ;;  %v2569_v16 = vld [vmem:[#allocation12 + $0x32] ss:$8 sm:$0x3] }
 0xa51   :  { %v2578_v34 = vrot.slane %v2569_v16, %v7063_v6  ;;  %v2574_v35 = vrot.slane %v2569_v16, %v7054_v1 }
 0xa52   :  { %v2548_v18 = vmul.f32 %v2546_v60, %v2522_v14 }
 0xa54   :  { %v2550_v22 = vadd.f32 %v2548_v18, %v2523_v17  ;;  %v6668_v18 = vld [vmem:[#allocation6 + $0x1e0] ss:$16 sps:$4 sm:$0xff]  }
 0xa56   :  { %v2551_v23 = vpack.c.bf16 %v2550_v22, %v2549_v20 }
 0xa58   :  { %2694 = vmatmul.mubr.bf16.vlgmr.msra.gmra.mxu0 %v2551_v23  ;;  %v6670_v23 = vld [vmem:[#allocation6 + $0x1e4] ss:$16 sps:$4 sm:$0xff]  }
 0xa59   :  { %3122 = vmatprep.mubr.bf16.mxu0 %v6946_v0  ;;  %3090 = vmatprep.subr.bf16.mxu0 %v6670_v23 }
 0xa5a   :  { %3091 = vmatpush1.bf16.msra.mxu0 %v6668_v18 }
 0xb18   :  { %v2695_v32 = vpop.f32.mrf.mxu0 }
 0xb19   :  { %v2696_v43 = vadd.f32 %v2695_v32, %v2574_v35  ;;  %v6675_v32 = vld [vmem:[#allocation6 + $0x1c4] ss:$16 sps:$4 sm:$0xff]  }
 0xb1a   :  { %v2697_v54 = vpop.f32.mrf.mxu0  ;;  %3092 = vmatprep.subr.bf16.mxu0 %v6675_v32 }
 0xb1b   :  { %v2698_v38 = vadd.f32 %v2697_v54, %v2578_v34  ;;  %v2704_v58 = vmax.f32 %v2696_v43, 0.0  ;;  %v6680_v54 = vld [vmem:[#allocation6 + $0x1a4] ss:$16 sps:$4 sm:$0xff]  }
 0xb1c   :  { %v2699_v37 = vpop.f32.mrf.mxu0  ;;  %v6685_v43 = vld [vmem:[#allocation6 + $0x184] ss:$16 sps:$4 sm:$0xff]  }
 0xb1d   :  { %v2700_v40 = vadd.f32 %v2699_v37, %v2574_v35  ;;  %v2705_v56 = vmax.f32 %v2698_v38, 0.0  ;;  %v6676_v35 = vld [vmem:[#allocation6 + $0x1c8] ss:$16 sps:$4 sm:$0xff]   ;;  %v6678_v37 = vld [vmem:[#allocation6 + $0x1a0] ss:$16 sps:$4 sm:$0xff]  }
 0xb1e   :  { %v2701_v46 = vpop.f32.mrf.mxu0  ;;  %v6681_v38 = vld [vmem:[#allocation6 + $0x1a8] ss:$16 sps:$4 sm:$0xff]  }
 0xb1f   :  { %v2702_v48 = vadd.f32 %v2701_v46, %v2578_v34  ;;  %v2706_v55 = vmax.f32 %v2700_v40, 0.0  ;;  %v6673_v34 = vld [vmem:[#allocation6 + $0x1c0] ss:$16 sps:$4 sm:$0xff]   ;;  %v6686_v46 = vld [vmem:[#allocation6 + $0x188] ss:$16 sps:$4 sm:$0xff]  }
 0xb20   :  { %3093 = vmatpush1.bf16.msra.mxu0 %v6673_v34  ;;  %v6683_v40 = vld [vmem:[#allocation6 + $0x180] ss:$16 sps:$4 sm:$0xff]  }
 0xb21   :  { %v2707_v10 = vmax.f32 %v2702_v48, 0.0  ;;  %v2708_v5 = vpack.c.bf16 %v2706_v55, %v2704_v58  ;;  %3094 = vmatprep.subr.bf16.mxu0 %v6680_v54  ;;  %v6690_v48 = vld [vmem:[#allocation6 + $0x164] ss:$16 sps:$4 sm:$0xff]   ;;  %v6688_v55 = vld [vmem:[#allocation6 + $0x160] ss:$16 sps:$4 sm:$0xff]  }
 0xb22   :  { %v6693_v58 = vld [vmem:[#allocation6 + $0x140] ss:$16 sps:$4 sm:$0xff]  }
 0xb23   :  { %v2709_v62 = vpack.c.bf16 %v2707_v10, %v2705_v56  ;;  %v6691_v56 = vld [vmem:[#allocation6 + $0x168] ss:$16 sps:$4 sm:$0xff]   ;;  %v6695_v10 = vld [vmem:[#allocation6 + $0x144] ss:$16 sps:$4 sm:$0xff]  }
 0xb24   :  { %3095 = vmatpush1.bf16.msra.mxu0 %v6678_v37 }
 0xb25   :  { %2871 = vmatprep.mubr.bf16.mxu1 %v2709_v62  ;;  %3096 = vmatprep.subr.bf16.mxu0 %v6685_v43  ;;  %v6696_v62 = vld [vmem:[#allocation6 + $0x148] ss:$16 sps:$4 sm:$0xff]  }
 0xb26   :  { %2872 = vmatmul.mubr.bf16.vlgmr.msra.gmra.mxu1 %v2708_v5  ;;  %v6700_v5 = vld [vmem:[#allocation6 + $0x124] ss:$16 sps:$4 sm:$0xff]  }
 0xb27   :  { %6370 = vmatprep.mubr.msk.bf16.mxu1 %vm8028_vm3, %v6947_v28  ;;  %6355 = vmatpush3.bf16.msra.mxu1 %v6671_v24  ;;  %v2882_v24 = vld [vmem:[#allocation12 + $0x36] ss:$0 sm:$0xff]  ;;  %vm8059_vm3 = vmmov %vm8047_vm0 }
 0xb28   :  { %6356 = vmatprep.subr.bf16.mxu1 %v6947_v28  ;;  %3097 = vmatpush1.bf16.msra.mxu0 %v6683_v40 }
 0xb29   :  { %3098 = vmatprep.subr.bf16.mxu0 %v6690_v48 }
 0xb2b   :  { %6357 = vmatpush3.bf16.msra.mxu1 %v6676_v35  ;;  %v2945_v35 = vld [vmem:[#allocation12 + $0x48] ss:$8 sm:$0x7] }
 0xb2c   :  { %6358 = vmatprep.subr.bf16.mxu1 %v6947_v28  ;;  %3099 = vmatpush1.bf16.msra.mxu0 %v6688_v55  ;;  %v2950_v54 = vrot.slane %v2945_v35, %v7054_v1  ;;  %v2954_v43 = vrot.slane %v2945_v35, %v7063_v6 }
 0xb2d   :  { %3100 = vmatprep.subr.bf16.mxu0 %v6695_v10 }
 0xb2f   :  { %6359 = vmatpush3.bf16.msra.mxu1 %v6681_v38 }
 0xb30   :  { %6360 = vmatprep.subr.bf16.mxu1 %v6947_v28  ;;  %3101 = vmatpush1.bf16.msra.mxu0 %v6693_v58 }
 0xb31   :  { %3102 = vmatprep.subr.bf16.mxu0 %v6700_v5 }
 0xb33   :  { %6361 = vmatpush3.bf16.msra.mxu1 %v6686_v46 }
 0xb34   :  { %6362 = vmatprep.subr.bf16.mxu1 %v6947_v28 }
 0xb37   :  { %6363 = vmatpush3.bf16.msra.mxu1 %v6691_v56 }
 0xb38   :  { %6364 = vmatprep.subr.bf16.mxu1 %v6947_v28 }
 0xb3b   :  { %6365 = vmatpush3.bf16.msra.mxu1 %v6696_v62 }
 0xb3c   :  { %6366 = vmatprep.subr.bf16.mxu1 %v6947_v28 }
 0xbe6   :  { %v6031_v30 = vpop.f32.mrf.mxu1 }
 0xbe8   :  { %v6032_v8 = vpop.f32.mrf.mxu1 }
 0xbe9   :  { %v6033_v9 = vadd.f32 %v6032_v8, %v6031_v30  ;;  %v6698_v30 = vld [vmem:[#allocation6 + $0x120] ss:$16 sps:$4 sm:$0xff]   ;;  %v6705_v8 = vld [vmem:[#allocation6 + $0x104] ss:$16 sps:$4 sm:$0xff]  }
 0xbea   :  { %v6034_v11 = vpop.f32.mrf.mxu1  ;;  %3103 = vmatpush1.bf16.msra.mxu0 %v6698_v30 }
 0xbeb   :  { %v2874_v12 = vadd.f32 %v6033_v9, %v2742_v7  ;;  %v6703_v9 = vld [vmem:[#allocation6 + $0x100] ss:$16 sps:$4 sm:$0xff]   ;;  %3104 = vmatprep.subr.bf16.mxu0 %v6705_v8 }
 0xbec   :  { %v6035_v14 = vpop.f32.mrf.mxu1 }
 0xbed   :  { %v6036_v15 = vadd.f32 %v6035_v14, %v6034_v11  ;;  %v2880_v60 = vadd.f32 %v2874_v12, %v2549_v20  ;;  %v6706_v11 = vld [vmem:[#allocation6 + $0x108] ss:$16 sps:$4 sm:$0xff]  }
 0xbee   :  { %3105 = vmatpush1.bf16.msra.mxu0 %v6703_v9 }
 0xbef   :  { %v2877_v61 = vadd.f32 %v6036_v15, %v2742_v7  ;;  %2884 = vadd.xlane.f32.xlu1 %v2880_v60  ;;  %v6701_v7 = vld [vmem:[#allocation6 + $0x128] ss:$16 sps:$4 sm:$0xff]  }
 0xbf0   :  { %6367 = vmatpush3.bf16.msra.mxu1 %v6701_v7 }
 0xbf1   :  { %v2881_v17 = vadd.f32 %v2877_v61, %v2550_v22  ;;  %6368 = vmatprep.subr.bf16.mxu1 %v6947_v28 }
 0xbf3   :  { %2886 = vadd.xlane.f32.xlu0 %v2881_v17 }
 0xbf4   :  { %6369 = vmatpush3.bf16.msra.mxu1 %v6706_v11 }
 0xc78   :  { %v2885_v25 = vpop.xlane.xlu1 %2884 }
 0xc79   :  { %v2888_v26 = vmul.f32 0.0078125, %v2885_v25 }
 0xc7b   :  { %v7547_v27 = vsub.f32 %v2880_v60, %v2888_v26 }
 0xc7c   :  { %v2887_v13 = vpop.xlane.xlu0 %2886 }
 0xc7d   :  { %v2889_v31 = vmul.f32 0.0078125, %v2887_v13  ;;  %v2892_v20 = vmul.f32 %v7547_v27, %v7547_v27 }
 0xc7f   :  { %v7551_v16 = vsub.f32 %v2881_v17, %v2889_v31  ;;  %2894 = vadd.xlane.f32.xlu1 %v2892_v20  ;;  %v2883_v31 = vld [vmem:[#allocation12 + $0x37] ss:$0 sm:$0xff] }
 0xc81   :  { %v2893_v22 = vmul.f32 %v7551_v16, %v7551_v16 }
 0xc83   :  { %2896 = vadd.xlane.f32.xlu0 %v2893_v22 }
 0xd08   :  { %v2895_v12 = vpop.xlane.xlu1 %2894 }
 0xd09   :  { %v2898_v14 = vmul.f32 0.0078125, %v2895_v12 }
 0xd0b   :  { %v2900_v15 = vadd.f32 1e-05, %v2898_v14 }
 0xd0c   :  { %v2897_v60 = vpop.xlane.xlu0 %2896 }
 0xd0d   :  { %6784 = vrsqrt.f32 %v2900_v15  ;;  %v2899_v61 = vmul.f32 0.0078125, %v2897_v60 }
 0xd0f   :  { %v2901_v17 = vadd.f32 1e-05, %v2899_v61 }
 0xd11   :  { %6786 = vrsqrt.f32 %v2901_v17 }
 0xd1a   :  { %v6785_v18 = vpop.eup %6784 }
 0xd1b   :  { %v2904_v23 = vmul.f32 %v6785_v18, %v7547_v27  ;;  %v7572_v27 = vrot.slane %v2945_v35, %v453_v2 }
 0xd1d   :  { %v2906_v13 = vmul.f32 %v2904_v23, %v2882_v24 }
 0xd1e   :  { %v6787_v25 = vpop.eup %6786 }
 0xd1f   :  { %v2905_v26 = vmul.f32 %v6787_v25, %v7551_v16  ;;  %v7563_v22 = vadd.f32 %v2906_v13, %v2883_v31 }
 0xd21   :  { %v2907_v20 = vmul.f32 %v2905_v26, %v2882_v24 }
 0xd23   :  { %v7565_v32 = vadd.f32 %v2907_v20, %v2883_v31 }
 0xd25   :  { %v2943_v34 = vpack.c.bf16 %v7565_v32, %v7563_v22 }
 0xd27   :  { %3123 = vmatmul.mubr.bf16.vlgmr.msra.gmra.mxu0 %v2943_v34  ;;  %6371 = vmatmul.mubr.bf16.vlgmr.msra.gmra.mxu1 %v2943_v34 }
 0xde7   :  { %v3124_v16 = vpop.f32.mrf.mxu0  ;;  %v3167_v37 = vpop.f32.mrf.mxu1 }
 0xde8   :  { %v3125_v38 = vadd.f32 %v3124_v16, %v2950_v54  ;;  %v7575_v40 = vadd.f32 %v3167_v37, %v7572_v27 }
 0xde9   :  { %v3126_v46 = vpop.f32.mrf.mxu0  ;;  %v6372_v48 = vpop.f32.mrf.mxu1 }
 0xdea   :  { %3368 = vrot.lane.b32.xlu0 %v3125_v38, %s6952_s2  ;;  %3265 = vrot.lane.b32.xlu1 %v3125_v38, %s6951_s6  ;;  %v3127_v2 = vadd.f32 %v3126_v46, %v2954_v43 }
 0xdeb   :  { %6378 = vmatprep.mubr.msk.f32.mxu0 %vm8046_vm15, %v3125_v38  ;;  %v3128_v55 = vpop.f32.mrf.mxu0  ;;  %v7581_v63 = vpop.f32.mrf.mxu1  ;;  %vm8053_vm15 = vmmov %vm8047_vm0 }
 0xdec   :  { %v3129_v62 = vadd.f32 %v3128_v55, %v2950_v54  ;;  %v7672_v48 = vadd.f32 %v7581_v63, %v7572_v27 }
 0xded   :  { %v3130_v56 = vpop.f32.mrf.mxu0  ;;  %v6373_v10 = vpop.f32.mrf.mxu1 }
 0xdee   :  { %v3131_v58 = vadd.f32 %v3130_v56, %v2954_v43  ;;  %3269 = vrot.lane.b32.xlu0 %v3127_v2, %s6951_s6  ;;  %3471 = vrot.lane.b32.xlu1 %v3125_v38, %s6950_s0 }
 0xdf0   :  { %6374 = vmatprep.subr.msk.mxu0 %vm8047_vm0, %v3131_v58 }
 0xdf1   :  { %6375 = vmatpush3.xpose.msk.msra.mxu0 %vm8048_vm1, %v3131_v58  ;;  %vm8054_vm1 = vmmov %vm8047_vm0 }
 0xdf2   :  { %6376 = vmatprep.subr.msk.mxu0 %vm8049_vm4, %v3127_v2  ;;  %3267 = vrot.lane.b32.xlu0 %v3129_v62, %s6951_s6  ;;  %vm8055_vm4 = vmmov %vm8047_vm0 }
 0xdf3   :  { %3372 = vrot.lane.b32.xlu1 %v3127_v2, %s6952_s2 }
 0xdf5   :  { %6377 = vmatpush3.xpose.msk.msra.mxu0 %vm8050_vm2, %v3127_v2  ;;  %vm8056_vm2 = vmmov %vm8047_vm0 }
 0xdf6   :  { %3370 = vrot.lane.b32.xlu0 %v3129_v62, %s6952_s2 }
 0xdf7   :  { %3475 = vrot.lane.b32.xlu1 %v3127_v2, %s6950_s0 }
 0xdf8   :  { %6379 = vmatmul.mubr.msk.f32.vlgmr.msra.gmra.mxu0 %vm8051_vm5, %v3129_v62  ;;  %vm8057_vm5 = vmmov %vm8047_vm0 }
 0xdfa   :  { %3578 = vrot.lane.b32.xlu0 %v3127_v2, %s6937_s13 }
 0xdfb   :  { %3271 = vrot.lane.b32.xlu1 %v3131_v58, %s6951_s6 }
 0xdfe   :  { %3574 = vrot.lane.b32.xlu0 %v3125_v38, %s6937_s13 }
 0xdff   :  { %3473 = vrot.lane.b32.xlu1 %v3129_v62, %s6950_s0 }
 0xe02   :  { %3576 = vrot.lane.b32.xlu0 %v3129_v62, %s6937_s13 }
 0xe03   :  { %3374 = vrot.lane.b32.xlu1 %v3131_v58, %s6952_s2 }
 0xe06   :  { %3580 = vrot.lane.b32.xlu0 %v3131_v58, %s6937_s13 }
 0xe07   :  { %3681 = vrot.lane.b32.xlu1 %v3127_v2, %s6953_s17 }
 0xe0a   :  { %3683 = vrot.lane.b32.xlu0 %v3131_v58, %s6953_s17 }
 0xe0b   :  { %3477 = vrot.lane.b32.xlu1 %v3131_v58, %s6950_s0 }
 0xe0e   :  { %3784 = vrot.lane.b32.xlu0 %v3127_v2, %s6954_s18 }
 0xe0f   :  { %3677 = vrot.lane.b32.xlu1 %v3125_v38, %s6953_s17 }
 0xe12   :  { %3889 = vrot.lane.b32.xlu0 %v3131_v58, %s6934_s28 }
 0xe13   :  { %3679 = vrot.lane.b32.xlu1 %v3129_v62, %s6953_s17 }
 0xe16   :  { %3780 = vrot.lane.b32.xlu0 %v3125_v38, %s6954_s18 }
 0xe17   :  { %3786 = vrot.lane.b32.xlu1 %v3131_v58, %s6954_s18 }
 0xe1a   :  { %3883 = vrot.lane.b32.xlu0 %v3125_v38, %s6934_s28 }
 0xe1b   :  { %3887 = vrot.lane.b32.xlu1 %v3127_v2, %s6934_s28 }
 0xe1f   :  { %3782 = vrot.lane.b32.xlu1 %v3129_v62, %s6954_s18 }
 0xe23   :  { %3885 = vrot.lane.b32.xlu1 %v3129_v62, %s6934_s28 }
 0xe5c   :  { %v3369_v5 = vpop.permute.xlu0 %3368  ;;  %v3266_v30 = vpop.permute.xlu1 %3265 }
 0xe5d   :  { %6385 = vmatprep.mubr.msk.f32.mxu0 %vm8052_vm7, %v3266_v30  ;;  %vm8058_vm7 = vmmov %vm8047_vm0 }
 0xe60   :  { %v3270_v7 = vpop.permute.xlu0 %3269  ;;  %v3472_v8 = vpop.permute.xlu1 %3471 }
 0xe64   :  { %v3268_v9 = vpop.permute.xlu0 %3267 }
 0xe65   :  { %v3373_v11 = vpop.permute.xlu1 %3372 }
 0xe68   :  { %v3371_v12 = vpop.permute.xlu0 %3370 }
 0xe69   :  { %v3476_v14 = vpop.permute.xlu1 %3475 }
 0xe6c   :  { %v3579_v15 = vpop.permute.xlu0 %3578 }
 0xe6d   :  { %v3272_v60 = vpop.permute.xlu1 %3271 }
 0xe6e   :  { %6381 = vmatprep.subr.msk.mxu0 %vm8053_vm15, %v3272_v60  ;;  %vm8061_vm15 = vmmov %vm8047_vm0 }
 0xe6f   :  { %6382 = vmatpush3.xpose.msk.msra.mxu0 %vm8047_vm0, %v3272_v60 }
 0xe70   :  { %6383 = vmatprep.subr.msk.mxu0 %vm8054_vm1, %v3270_v7  ;;  %v3575_v61 = vpop.permute.xlu0 %3574  ;;  %vm8062_vm1 = vmmov %vm8047_vm0 }
 0xe71   :  { %v3474_v17 = vpop.permute.xlu1 %3473  ;;  %6406 = vmatprep.mubr.msk.f32.mxu1 %vm8055_vm4, %v3575_v61  ;;  %vm8063_vm4 = vmmov %vm8047_vm0 }
 0xe73   :  { %6384 = vmatpush3.xpose.msk.msra.mxu0 %vm8056_vm2, %v3270_v7  ;;  %vm8064_vm2 = vmmov %vm8047_vm0 }
 0xe74   :  { %v3577_v18 = vpop.permute.xlu0 %3576 }
 0xe75   :  { %v3375_v23 = vpop.permute.xlu1 %3374 }
 0xe76   :  { %6386 = vmatmul.mubr.msk.f32.vlgmr.msra.gmra.mxu0 %vm8057_vm5, %v3268_v9  ;;  %6388 = vmatprep.subr.msk.mxu0 %vm8058_vm7, %v3375_v23  ;;  %vm8065_vm5 = vmmov %vm8047_vm0 }
 0xe77   :  { %6389 = vmatpush3.xpose.msk.msra.mxu0 %vm8059_vm3, %v3375_v23  ;;  %6392 = vmatprep.mubr.msk.f32.mxu0 %vm8060_vm6, %v3369_v5  ;;  %vm8066_vm7 = vmmov %vm8047_vm0 }
 0xe78   :  { %6390 = vmatprep.subr.msk.mxu0 %vm8061_vm15, %v3373_v11  ;;  %v3581_v24 = vpop.permute.xlu0 %3580  ;;  %vm8067_vm3 = vmmov %vm8047_vm0 }
 0xe79   :  { %v3682_v25 = vpop.permute.xlu1 %3681  ;;  %6402 = vmatprep.subr.msk.mxu1 %vm8047_vm0, %v3581_v24  ;;  %vm8068_vm6 = vmmov %vm8047_vm0 }
 0xe7a   :  { %6403 = vmatpush3.xpose.msk.msra.mxu1 %vm8062_vm1, %v3581_v24  ;;  %vm8069_vm15 = vmmov %vm8047_vm0 }
 0xe7b   :  { %6391 = vmatpush3.xpose.msk.msra.mxu0 %vm8063_vm4, %v3373_v11  ;;  %6404 = vmatprep.subr.msk.mxu1 %vm8064_vm2, %v3579_v15  ;;  %vm8071_vm1 = vmmov %vm8047_vm0 }
 0xe7c   :  { %v3684_v26 = vpop.permute.xlu0 %3683  ;;  %vm8072_vm4 = vmmov %vm8047_vm0 }
 0xe7d   :  { %v3478_v13 = vpop.permute.xlu1 %3477  ;;  %vm8073_vm2 = vmmov %vm8047_vm0 }
 0xe7e   :  { %6393 = vmatmul.mubr.msk.f32.vlgmr.msra.gmra.mxu0 %vm8065_vm5, %v3371_v12  ;;  %6395 = vmatprep.subr.msk.mxu0 %vm8066_vm7, %v3478_v13  ;;  %vm8074_vm5 = vmmov %vm8047_vm0 }
 0xe7f   :  { %6396 = vmatpush3.xpose.msk.msra.mxu0 %vm8067_vm3, %v3478_v13  ;;  %6399 = vmatprep.mubr.msk.f32.mxu0 %vm8068_vm6, %v3472_v8  ;;  %vm8075_vm7 = vmmov %vm8047_vm0 }
 0xe80   :  { %6405 = vmatpush3.xpose.msk.msra.mxu1 %vm8069_vm15, %v3579_v15  ;;  %6397 = vmatprep.subr.msk.mxu0 %vm8070_vm14, %v3476_v14  ;;  %v3785_v31 = vpop.permute.xlu0 %3784  ;;  %vm8076_vm3 = vmmov %vm8047_vm0 }
 0xe81   :  { %v3678_v20 = vpop.permute.xlu1 %3677  ;;  %vm8077_vm14 = vmmov %vm8047_vm0 }
 0xe82   :  { %vm8078_vm6 = vmmov %vm8047_vm0 }
 0xe83   :  { %6407 = vmatmul.mubr.msk.f32.vlgmr.msra.gmra.mxu1 %vm8047_vm0, %v3577_v18  ;;  %6398 = vmatpush3.xpose.msk.msra.mxu0 %vm8071_vm1, %v3476_v14  ;;  %vm8079_vm15 = vmmov %vm8047_vm0 }
 0xe84   :  { %6409 = vmatprep.subr.msk.mxu0 %vm8072_vm4, %v3684_v26  ;;  %v3890_v34 = vpop.permute.xlu0 %3889  ;;  %vm8080_vm1 = vmmov %vm8047_vm0 }
 0xe85   :  { %v3680_v35 = vpop.permute.xlu1 %3679  ;;  %vm8081_vm4 = vmmov %vm8047_vm0 }
 0xe86   :  { %6400 = vmatmul.mubr.msk.f32.vlgmr.msra.gmra.mxu0 %vm8073_vm2, %v3474_v17  ;;  %vm8082_vm2 = vmmov %vm8047_vm0 }
 0xe87   :  { %6410 = vmatpush3.xpose.msk.msra.mxu0 %vm8074_vm5, %v3684_v26  ;;  %6413 = vmatprep.mubr.msk.f32.mxu0 %vm8075_vm7, %v3678_v20  ;;  %vm8083_vm5 = vmmov %vm8047_vm0 }
 0xe88   :  { %6411 = vmatprep.subr.msk.mxu0 %vm8076_vm3, %v3682_v25  ;;  %v3781_v54 = vpop.permute.xlu0 %3780  ;;  %vm8084_vm7 = vmmov %vm8047_vm0 }
 0xe89   :  { %v3787_v16 = vpop.permute.xlu1 %3786  ;;  %6420 = vmatprep.mubr.msk.f32.mxu1 %vm8077_vm14, %v3781_v54  ;;  %vm8085_vm3 = vmmov %vm8047_vm0 }
 0xe8a   :  { %6416 = vmatprep.subr.msk.mxu1 %vm8078_vm6, %v3787_v16  ;;  %vm8086_vm14 = vmmov %vm8047_vm0 }
 0xe8b   :  { %6412 = vmatpush3.xpose.msk.msra.mxu0 %vm8079_vm15, %v3682_v25  ;;  %6417 = vmatpush3.xpose.msk.msra.mxu1 %vm8047_vm0, %v3787_v16  ;;  %vm8087_vm6 = vmmov %vm8047_vm0 }
 0xe8c   :  { %6418 = vmatprep.subr.msk.mxu1 %vm8080_vm1, %v3785_v31  ;;  %6423 = vmatprep.subr.msk.mxu0 %vm8081_vm4, %v3890_v34  ;;  %v3884_v37 = vpop.permute.xlu0 %3883  ;;  %vm8088_vm15 = vmmov %vm8047_vm0  ;;  %vm8095_vm1 = vnez %v8007_v53  ;;  %vm8096_vm4 = vnez %v8009_v57 }
 0xe8d   :  { %v3888_v38 = vpop.permute.xlu1 %3887 }
 0xe8e   :  { %6414 = vmatmul.mubr.msk.f32.vlgmr.msra.gmra.mxu0 %vm8082_vm2, %v3680_v35  ;;  %vm8097_vm2 = vnez %v8011_v59 }
 0xe8f   :  { %6419 = vmatpush3.xpose.msk.msra.mxu1 %vm8083_vm5, %v3785_v31  ;;  %6424 = vmatpush3.xpose.msk.msra.mxu0 %vm8084_vm7, %v3890_v34  ;;  %vm8098_vm5 = vnez %v8013_v4  ;;  %vm8099_vm7 = vnez %v8015_v3 }
 0xe90   :  { %6427 = vmatprep.mubr.msk.f32.mxu0 %vm8085_vm3, %v3884_v37  ;;  %6425 = vmatprep.subr.msk.mxu0 %vm8086_vm14, %v3888_v38  ;;  %vm8100_vm3 = vmmov %vm8047_vm0 }
 0xe91   :  { %v3783_v43 = vpop.permute.xlu1 %3782  ;;  %6430 = vmatprep.subr.msk.mxu1 %vm7186_vm9, %v6955_v52  ;;  %vm8101_vm14 = vmmov %vm8047_vm0 }
 0xe92   :  { %6421 = vmatmul.mubr.msk.f32.vlgmr.msra.gmra.mxu1 %vm8087_vm6, %v3783_v43  ;;  %vm8102_vm6 = vcmask 261248  }
 0xe93   :  { %6426 = vmatpush3.xpose.msk.msra.mxu0 %vm8088_vm15, %v3888_v38  ;;  %6431 = vmatpush3.msk.msra.mxu1 %vm7186_vm9, %v6955_v52  ;;  %vm8090_vm9 = vnez %v7997_v29  ;;  %vm8103_vm15 = vmmov %vm8102_vm6 }
 0xe94   :  { %6465 = vmatprep.subr.msk.mxu0 %vm7146_vm8, %v6955_v52  ;;  %6432 = vmatprep.subr.msk.mxu1 %vm7191_vm10, %v6955_v52 }
 0xe95   :  { %v3886_v46 = vpop.permute.xlu1 %3885  ;;  %6433 = vmatpush3.msk.msra.mxu1 %vm7191_vm10, %v6955_v52  ;;  %vm8091_vm10 = vnez %v7999_v33 }
 0xe96   :  { %6428 = vmatmul.mubr.msk.f32.vlgmr.msra.gmra.mxu0 %vm8047_vm0, %v3886_v46  ;;  %6434 = vmatprep.subr.msk.mxu1 %vm7203_vm11, %v6955_v52  ;;  %vm8104_vm0 = vcmask 392448  }
 0xe97   :  { %6466 = vmatpush3.msk.msra.mxu0 %vm7146_vm8, %v6955_v52  ;;  %6435 = vmatpush3.msk.msra.mxu1 %vm7203_vm11, %v6955_v52  ;;  %vm8089_vm8 = vnez %v7995_v50  ;;  %vm8092_vm11 = vnez %v8001_v36 }
 0xe98   :  { %6470 = vmatprep.subr.mxu0 %v7672_v48  ;;  %6436 = vmatprep.subr.msk.mxu1 %vm7214_vm12, %v6955_v52 }
 0xe99   :  { %6437 = vmatpush3.msk.msra.mxu1 %vm7214_vm12, %v6955_v52  ;;  %vm8093_vm12 = vnez %v8003_v39 }
 0xe9a   :  { %6438 = vmatprep.subr.msk.mxu1 %vm7225_vm13, %v6955_v52 }
 0xe9b   :  { %6439 = vmatpush3.msk.msra.mxu1 %vm7225_vm13, %v6955_v52  ;;  %vm8094_vm13 = vnez %v8005_v44 }
 0xe9c   :  { %6440 = vmatprep.subr.msk.mxu1 %vm8089_vm8, %v6955_v52 }
 0xe9d   :  { %6441 = vmatpush3.msk.msra.mxu1 %vm8089_vm8, %v6955_v52  ;;  %vm8105_vm8 = vmmov %vm8104_vm0 }
 0xe9e   :  { %6442 = vmatprep.subr.msk.mxu1 %vm8090_vm9, %v6955_v52 }
 0xe9f   :  { %6443 = vmatpush3.msk.msra.mxu1 %vm8090_vm9, %v6955_v52  ;;  %vm8106_vm9 = vcmask 523648  }
 0xea0   :  { %6444 = vmatprep.subr.msk.mxu1 %vm8091_vm10, %v6955_v52 }
 0xea1   :  { %6445 = vmatpush3.msk.msra.mxu1 %vm8091_vm10, %v6955_v52  ;;  %vm8107_vm10 = vcmask 654848  }
 0xea2   :  { %6446 = vmatprep.subr.msk.mxu1 %vm8092_vm11, %v6955_v52 }
 0xea3   :  { %6447 = vmatpush3.msk.msra.mxu1 %vm8092_vm11, %v6955_v52  ;;  %vm8108_vm11 = vmmov %vm8106_vm9 }
 0xea4   :  { %6448 = vmatprep.subr.msk.mxu1 %vm8093_vm12, %v6955_v52 }
 0xea5   :  { %6449 = vmatpush3.msk.msra.mxu1 %vm8093_vm12, %v6955_v52  ;;  %vm8109_vm12 = vmmov %vm8107_vm10 }
 0xea6   :  { %6450 = vmatprep.subr.msk.mxu1 %vm8094_vm13, %v6955_v52 }
 0xea7   :  { %6451 = vmatpush3.msk.msra.mxu1 %vm8094_vm13, %v6955_v52  ;;  %vm8110_vm13 = vcmask 786048  }
 0xea8   :  { %6452 = vmatprep.subr.msk.mxu1 %vm8095_vm1, %v6955_v52 }
 0xea9   :  { %6453 = vmatpush3.msk.msra.mxu1 %vm8095_vm1, %v6955_v52  ;;  %vm8111_vm1 = vcmask 917248  }
 0xeaa   :  { %6454 = vmatprep.subr.msk.mxu1 %vm8096_vm4, %v6955_v52 }
 0xeab   :  { %6455 = vmatpush3.msk.msra.mxu1 %vm8096_vm4, %v6955_v52  ;;  %vm8112_vm4 = vmmov %vm8110_vm13 }
 0xeac   :  { %6456 = vmatprep.subr.msk.mxu1 %vm8097_vm2, %v6955_v52 }
 0xead   :  { %6457 = vmatpush3.msk.msra.mxu1 %vm8097_vm2, %v6955_v52  ;;  %vm8113_vm2 = vmmov %vm8111_vm1 }
 0xeae   :  { %6458 = vmatprep.subr.msk.mxu1 %vm8098_vm5, %v6955_v52 }
 0xeaf   :  { %6459 = vmatpush3.msk.msra.mxu1 %vm8098_vm5, %v6955_v52  ;;  %vm8114_vm5 = vcmask 1048448  }
 0xeb0   :  { %6460 = vmatprep.subr.msk.mxu1 %vm8099_vm7, %v6955_v52 }
 0xeb1   :  { %6461 = vmatpush3.msk.msra.mxu1 %vm8099_vm7, %v6955_v52  ;;  %vm8115_vm7 = vmmov %vm8114_vm5 }
 0xeb8   :  { %v6380_v51 = vpop.f32.mrf.mxu0 }
 0xeb9   :  { %v3262_v41 = vmul.f32 0.25, %v6380_v51 }
 0xeba   :  { %v3252_v42 = vpop.f32.mrf.mxu0 }
 0xebb   :  { %3264 = vst.msk [vmem:[#allocation2 + $0x8] sm:$0xff] %vm8100_vm3, %v3262_v41  ;;  %v3261_v45 = vmul.f32 0.25, %v3252_v42  ;;  %vm8116_vm3 = vcmask 64512  }
 0xebd   :  { %3263 = vst.msk [vmem:[#allocation2] sm:$0xff] %vm8101_vm14, %v3261_v45  ;;  %vm8117_vm14 = vmmov %vm8116_vm3 }
 0xf36   :  { %v6387_v47 = vpop.f32.mrf.mxu0 }
 0xf37   :  { %v3357_v49 = vmul.f32 0.25, %v6387_v47 }
 0xf38   :  { %v3347_v50 = vpop.f32.mrf.mxu0 }
 0xf39   :  { %v3356_v29 = vmul.f32 0.25, %v3347_v50  ;;  %3362 = vrot.lane.b32.xlu1 %v3357_v49, %s6934_s28 }
 0xf3b   :  { %3360 = vrot.lane.b32.xlu0 %v3356_v29, %s6934_s28 }
 0xf3e   :  { %v6394_v33 = vpop.f32.mrf.mxu0 }
 0xf3f   :  { %v3460_v57 = vmul.f32 0.25, %v6394_v33 }
 0xf40   :  { %v3450_v53 = vpop.f32.mrf.mxu0 }
 0xf41   :  { %v3459_v59 = vmul.f32 0.25, %v3450_v53 }
 0xf43   :  { %v6408_v36 = vpop.f32.mrf.mxu1 }
 0xf44   :  { %v3666_v39 = vmul.f32 0.25, %v6408_v36 }
 0xf45   :  { %v3656_v52 = vpop.f32.mrf.mxu1 }
 0xf46   :  { %v3665_v44 = vmul.f32 0.25, %v3656_v52  ;;  %3671 = vrot.lane.b32.xlu1 %v3666_v39, %s6937_s13  ;;  %v6401_v4 = vpop.f32.mrf.mxu0 }
 0xf47   :  { %v3563_v10 = vmul.f32 0.25, %v6401_v4 }
 0xf48   :  { %3669 = vrot.lane.b32.xlu0 %v3665_v44, %s6937_s13  ;;  %v3553_v3 = vpop.f32.mrf.mxu0 }
 0xf49   :  { %v3562_v62 = vmul.f32 0.25, %v3553_v3 }
 0xf4a   :  { %3465 = vrot.lane.b32.xlu1 %v3460_v57, %s6954_s18 }
 0xf4c   :  { %3463 = vrot.lane.b32.xlu0 %v3459_v59, %s6954_s18 }
 0xf4e   :  { %v6415_v63 = vpop.f32.mrf.mxu0 }
 0xf4f   :  { %v3769_v30 = vmul.f32 0.25, %v6415_v63 }
 0xf50   :  { %v3759_v58 = vpop.f32.mrf.mxu0 }
 0xf51   :  { %v3768_v7 = vmul.f32 0.25, %v3759_v58 }
 0xf52   :  { %v6422_v27 = vpop.f32.mrf.mxu1 }
 0xf53   :  { %v3872_v55 = vmul.f32 0.25, %v6422_v27 }
 0xf54   :  { %v3862_v2 = vpop.f32.mrf.mxu1 }
 0xf55   :  { %v3871_v56 = vmul.f32 0.25, %v3862_v2  ;;  %3877 = vrot.lane.b32.xlu1 %v3872_v55, %s6952_s2 }
 0xf56   :  { %v6429_v5 = vpop.f32.mrf.mxu0 }
 0xf57   :  { %3875 = vrot.lane.b32.xlu0 %v3871_v56, %s6952_s2  ;;  %v3975_v9 = vmul.f32 0.25, %v6429_v5 }
 0xf58   :  { %v3965_v8 = vpop.f32.mrf.mxu0 }
 0xf59   :  { %3568 = vrot.lane.b32.xlu1 %v3563_v10, %s6953_s17  ;;  %v3974_v11 = vmul.f32 0.25, %v3965_v8 }
 0xf5b   :  { %3566 = vrot.lane.b32.xlu0 %v3562_v62, %s6953_s17 }
 0xf5d   :  { %3774 = vrot.lane.b32.xlu1 %v3769_v30, %s6950_s0 }
 0xf5f   :  { %3772 = vrot.lane.b32.xlu0 %v3768_v7, %s6950_s0 }
 0xf61   :  { %3980 = vrot.lane.b32.xlu1 %v3975_v9, %s6951_s6 }
 0xf63   :  { %3978 = vrot.lane.b32.xlu0 %v3974_v11, %s6951_s6 }
 0xfab   :  { %v3363_v12 = vpop.permute.xlu1 %3362 }
 0xfac   :  { %3367 = vst.msk [vmem:[#allocation2 + $0x8] sm:$0xff] %vm8102_vm6, %v3363_v12  ;;  %vm8118_vm6 = vcmask 130048  }
 0xfad   :  { %v3361_v14 = vpop.permute.xlu0 %3360 }
 0xfae   :  { %3366 = vst.msk [vmem:[#allocation2] sm:$0xff] %vm8103_vm15, %v3361_v14  ;;  %vm8119_vm15 = vmmov %vm8118_vm6 }
 0xfb8   :  { %v3672_v15 = vpop.permute.xlu1 %3671 }
 0xfba   :  { %v3670_v60 = vpop.permute.xlu0 %3669 }
 0xfbc   :  { %v3466_v61 = vpop.permute.xlu1 %3465 }
 0xfbd   :  { %3470 = vst.msk [vmem:[#allocation2 + $0x8] sm:$0xff] %vm8104_vm0, %v3466_v61  ;;  %vm8120_vm0 = vmmov %vm8118_vm6 }
 0xfbe   :  { %v3464_v17 = vpop.permute.xlu0 %3463 }
 0xfbf   :  { %3469 = vst.msk [vmem:[#allocation2] sm:$0xff] %vm8105_vm8, %v3464_v17  ;;  %vm8121_vm8 = vmmov %vm8120_vm0 }
 0xfc7   :  { %v3878_v18 = vpop.permute.xlu1 %3877 }
 0xfc9   :  { %v3876_v23 = vpop.permute.xlu0 %3875 }
 0xfcb   :  { %v3569_v24 = vpop.permute.xlu1 %3568 }
 0xfcc   :  { %3573 = vst.msk [vmem:[#allocation2 + $0x8] sm:$0xff] %vm8106_vm9, %v3569_v24  ;;  %vm8122_vm9 = vmmov %vm8120_vm0 }
 0xfcd   :  { %3676 = vst.msk [vmem:[#allocation2 + $0x8] sm:$0xff] %vm8107_vm10, %v3672_v15  ;;  %v3567_v25 = vpop.permute.xlu0 %3566  ;;  %vm8123_vm10 = vmmov %vm8120_vm0 }
 0xfce   :  { %3572 = vst.msk [vmem:[#allocation2] sm:$0xff] %vm8108_vm11, %v3567_v25  ;;  %vm8124_vm11 = vmmov %vm8120_vm0  ;;  %v2936_v25 = vld [vmem:[#allocation6 + $0x1c8] sm:$0xff] }
 0xfcf   :  { %3675 = vst.msk [vmem:[#allocation2] sm:$0xff] %vm8109_vm12, %v3670_v60  ;;  %v3775_v26 = vpop.permute.xlu1 %3774  ;;  %vm8125_vm12 = vmmov %vm8120_vm0 }
 0xfd0   :  { %3779 = vst.msk [vmem:[#allocation2 + $0x8] sm:$0xff] %vm8110_vm13, %v3775_v26  ;;  %vm8126_vm13 = vmmov %vm8120_vm0  ;;  %v2938_v26 = vld [vmem:[#allocation6 + $0x1d8] sm:$0xff] }
 0xfd1   :  { %3882 = vst.msk [vmem:[#allocation2 + $0x8] sm:$0xff] %vm8111_vm1, %v3878_v18  ;;  %v3773_v13 = vpop.permute.xlu0 %3772  ;;  %vm8127_vm1 = vmmov %vm8120_vm0  ;;  %v2940_v18 = vld [vmem:[#allocation6 + $0x1e8] sm:$0xff] }
 0xfd2   :  { %3778 = vst.msk [vmem:[#allocation2] sm:$0xff] %vm8112_vm4, %v3773_v13  ;;  %vm8128_vm4 = vmmov %vm8120_vm0  ;;  %v5840_v13 = vcombine.high %v2936_v25, %v2938_v26 }
 0xfd3   :  { %3881 = vst.msk [vmem:[#allocation2] sm:$0xff] %vm8113_vm2, %v3876_v23  ;;  %v3981_v31 = vpop.permute.xlu1 %3980  ;;  %vm8129_vm2 = vmmov %vm8120_vm0  ;;  %v2942_v23 = vld [vmem:[#allocation6 + $0x1f8] sm:$0xff] }
 0xfd4   :  { %3985 = vst.msk [vmem:[#allocation2 + $0x8] sm:$0xff] %vm8114_vm5, %v3981_v31  ;;  %vm8130_vm5 = vmmov %vm8120_vm0  ;;  %v5841_v24 = vcombine.high %v2940_v18, %v2942_v23  ;;  %v2932_v31 = vld [vmem:[#allocation6 + $0x1a8] sm:$0xff] }
 0xfd5   :  { %v3979_v20 = vpop.permute.xlu0 %3978 }
 0xfd6   :  { %3984 = vst.msk [vmem:[#allocation2] sm:$0xff] %vm8115_vm7, %v3979_v20  ;;  %vm8131_vm7 = vmmov %vm8120_vm0  ;;  %v2934_v20 = vld [vmem:[#allocation6 + $0x1b8] sm:$0xff] }
 0xfdb   :  { %v3987_v34 = vld [vmem:[#allocation2 + $0x8] sm:$0xff] }
 0xfdc   :  { %v3989_v35 = vadd.f32 %v3987_v34, %v7274_v19 }
 0xfdd   :  { %v3986_v54 = vld [vmem:[#allocation2] sm:$0xff] }
 0xfde   :  { %3992 = vmax.xlane.f32.xlu1 %v3989_v35  ;;  %v3988_v16 = vadd.f32 %v3986_v54, %v7276_v21  ;;  %v5839_v54 = vcombine.high %v2932_v31, %v2934_v20  ;;  %v6710_v31 = vld [vmem:[#allocation8 + $0xf4] ss:$8 sps:$4 sm:$0xff]  }
 0xfe0   :  { %3990 = vmax.xlane.f32.xlu0 %v3988_v16 }
 0xfef   :  { %4249 = vrot.lane.b32.xlu1 %v7575_v40, %s6951_s6 }
 0xff3   :  { %4348 = vrot.lane.b32.xlu1 %v7575_v40, %s6952_s2 }
 0xff6   :  { %4251 = vrot.lane.b32.xlu0 %v7672_v48, %s6951_s6 }
 0xff7   :  { %4447 = vrot.lane.b32.xlu1 %v7575_v40, %s6950_s0 }
 0xffa   :  { %4350 = vrot.lane.b32.xlu0 %v7672_v48, %s6952_s2 }
 0xffb   :  { %4546 = vrot.lane.b32.xlu1 %v7575_v40, %s6937_s13 }
 0xffe   :  { %4449 = vrot.lane.b32.xlu0 %v7672_v48, %s6950_s0 }
 0xfff   :  { %4645 = vrot.lane.b32.xlu1 %v7575_v40, %s6953_s17 }
0x1002   :  { %4548 = vrot.lane.b32.xlu0 %v7672_v48, %s6937_s13 }
0x1003   :  { %4845 = vrot.lane.b32.xlu1 %v7672_v48, %s6934_s28 }
0x1006   :  { %4647 = vrot.lane.b32.xlu0 %v7672_v48, %s6953_s17 }
0x100a   :  { %4746 = vrot.lane.b32.xlu0 %v7672_v48, %s6954_s18 }
0x100e   :  { %4744 = vrot.lane.b32.xlu0 %v7575_v40, %s6954_s18 }
0x1067   :  { %v3993_v19 = vpop.xlane.xlu1 %3992 }
0x1068   :  { %v3995_v21 = vsub.f32 %v3989_v35, %v3993_v19  ;;  %v2930_v19 = vld [vmem:[#allocation6 + $0x198] sm:$0xff] }
0x1069   :  { %v3991_v37 = vpop.xlane.xlu0 %3990 }
0x106a   :  { %v3994_v38 = vsub.f32 %v3988_v16, %v3991_v37  ;;  %v3998_v43 = vmul.f32 1.442695, %v3995_v21  ;;  %v2928_v16 = vld [vmem:[#allocation6 + $0x188] sm:$0xff] }
0x106b   :  { %v4250_v46 = vpop.permute.xlu1 %4249 }
0x106c   :  { %v3996_v51 = vmul.f32 1.442695, %v3994_v38  ;;  %v5838_v38 = vcombine.high %v2928_v16, %v2930_v19 }
0x106d   :  { %v4252_v44 = vpop.permute.xlu0 %4251 }
0x106e   :  { %6788 = vpow2.f32 %v3996_v51 }
0x106f   :  { %6790 = vpow2.f32 %v3998_v43  ;;  %v4349_v41 = vpop.permute.xlu1 %4348  ;;  %v2924_v43 = vld [vmem:[#allocation6 + $0x168] sm:$0xff] }
0x1073   :  { %v7821_v42 = vpop.permute.xlu1 %4447 }
0x1077   :  { %v7823_v45 = vpop.permute.xlu1 %4546 }
0x107b   :  { %v6789_v47 = vpop.eup %6788  ;;  %v7825_v49 = vpop.permute.xlu1 %4645 }
0x107c   :  { %v6791_v50 = vpop.eup %6790  ;;  %6462 = vmatprep.mubr.f32.mxu1 %v6789_v47 }
0x107d   :  { %6463 = vmatmul.mubr.f32.vlgmr.msra.gmra.mxu1 %v6791_v50 }
0x107f   :  { %v4846_v29 = vpop.permute.xlu1 %4845 }
0x1080   :  { %6519 = vmatprep.subr.mxu1 %v4846_v29 }
0x1081   :  { %6520 = vmatpush3.msra.mxu1 %v4846_v29  ;;  %v2918_v29 = vld [vmem:[#allocation6 + $0x138] sm:$0xff] }
0x113d   :  { %v6464_v33 = vpop.f32.mrf.mxu1 }
0x113f   :  { %v4066_v36 = vpop.f32.mrf.mxu1 }
0x1140   :  { %6792 = vrcp.f32 %v4066_v36 }
0x1141   :  { %6794 = vrcp.f32 %v6464_v33 }
0x114d   :  { %v6793_v39 = vpop.eup %6792 }
0x114e   :  { %v6795_v52 = vpop.eup %6794  ;;  %6467 = vmatprep.mubr.msk.f32.mxu0 %vm8116_vm3, %v6793_v39  ;;  %vm8132_vm3 = vmmov %vm8120_vm0 }
0x114f   :  { %6468 = vmatmul.mubr.msk.f32.vlgmr.msra.gmra.mxu0 %vm8117_vm14, %v6795_v52  ;;  %vm8133_vm14 = vmmov 0  }
0x1150   :  { %6471 = vmatpush3.msra.mxu0 %v7672_v48  ;;  %v4351_v48 = vpop.permute.xlu0 %4350 }
0x1151   :  { %6472 = vmatprep.subr.mxu0 %v7575_v40 }
0x1152   :  { %6473 = vmatpush3.msra.mxu0 %v7575_v40 }
0x1153   :  { %6477 = vmatprep.subr.mxu0 %v4252_v44 }
0x1154   :  { %v4450_v3 = vpop.permute.xlu0 %4449 }
0x1158   :  { %v4549_v27 = vpop.permute.xlu0 %4548 }
0x115c   :  { %v4648_v55 = vpop.permute.xlu0 %4647 }
0x1160   :  { %v4747_v63 = vpop.permute.xlu0 %4746 }
0x1164   :  { %v4745_v2 = vpop.permute.xlu0 %4744 }
0x120f   :  { %v6469_v53 = vpop.f32.mrf.mxu0 }
0x1210   :  { %v4159_v57 = vmul.f32 %v6791_v50, %v6469_v53  ;;  %v2916_v50 = vld [vmem:[#allocation6 + $0x128] sm:$0xff]  ;;  %v2914_v53 = vld [vmem:[#allocation6 + $0x118] sm:$0xff] }
0x1211   :  { %v4149_v59 = vpop.f32.mrf.mxu0  ;;  %v5835_v52 = vcombine.high %v2916_v50, %v2918_v29  ;;  %v6726_v50 = vld [vmem:[#allocation8 + $0x90] ss:$8 sps:$4 sm:$0xff]   ;;  %v6731_v29 = vld [vmem:[#allocation8 + $0x84] ss:$8 sps:$4 sm:$0xff]  }
0x1212   :  { %v4158_v4 = vmul.f32 %v6789_v47, %v4149_v59  ;;  %4245 = vrot.lane.b32.xlu1 %v4159_v57, %s6951_s6  ;;  %v2922_v47 = vld [vmem:[#allocation6 + $0x158] sm:$0xff] }
0x1214   :  { %4243 = vrot.lane.b32.xlu0 %v4158_v4, %s6951_s6  ;;  %6474 = vmatprep.mubr.msk.f32.mxu0 %vm8118_vm6, %v4158_v4  ;;  %vm8134_vm6 = vmmov %vm8120_vm0 }
0x1215   :  { %6475 = vmatmul.mubr.msk.f32.vlgmr.msra.gmra.mxu0 %vm8119_vm15, %v4159_v57  ;;  %vm8135_vm15 = vmmov %vm8120_vm0 }
0x1216   :  { %6478 = vmatpush3.msra.mxu0 %v4252_v44  ;;  %4346 = vrot.lane.b32.xlu1 %v4159_v57, %s6952_s2  ;;  %v2912_v44 = vld [vmem:[#allocation6 + $0x108] sm:$0xff] }
0x1217   :  { %6479 = vmatprep.subr.mxu0 %v4250_v46  ;;  %v5834_v59 = vcombine.high %v2912_v44, %v2914_v53  ;;  %v6735_v44 = vld [vmem:[#allocation9 + $0xb0] sm:$0xff]   ;;  %v6736_v53 = vld [vmem:[#allocation9 + $0xe8] sm:$0xff]  }
0x1218   :  { %6480 = vmatpush3.msra.mxu0 %v4250_v46  ;;  %4344 = vrot.lane.b32.xlu0 %v4158_v4, %s6952_s2  ;;  %v2926_v46 = vld [vmem:[#allocation6 + $0x178] sm:$0xff] }
0x1219   :  { %6484 = vmatprep.subr.mxu0 %v4351_v48 }
0x121a   :  { %4445 = vrot.lane.b32.xlu1 %v4159_v57, %s6950_s0 }
0x121c   :  { %4443 = vrot.lane.b32.xlu0 %v4158_v4, %s6950_s0 }
0x121e   :  { %4544 = vrot.lane.b32.xlu1 %v4159_v57, %s6937_s13 }
0x1220   :  { %4542 = vrot.lane.b32.xlu0 %v4158_v4, %s6937_s13 }
0x1222   :  { %4643 = vrot.lane.b32.xlu1 %v4159_v57, %s6953_s17 }
0x1224   :  { %4641 = vrot.lane.b32.xlu0 %v4158_v4, %s6953_s17 }
0x1226   :  { %4742 = vrot.lane.b32.xlu1 %v4159_v57, %s6954_s18 }
0x1228   :  { %4843 = vrot.lane.b32.xlu0 %v7575_v40, %s6934_s28 }
0x122a   :  { %4740 = vrot.lane.b32.xlu1 %v4158_v4, %s6954_s18 }
0x122c   :  { %4839 = vrot.lane.b32.xlu0 %v4158_v4, %s6934_s28 }
0x122e   :  { %4841 = vrot.lane.b32.xlu1 %v4159_v57, %s6934_s28 }
0x1284   :  { %v4246_v56 = vpop.permute.xlu1 %4245 }
0x1286   :  { %v4244_v10 = vpop.permute.xlu0 %4243 }
0x1287   :  { %6481 = vmatprep.mubr.msk.f32.mxu0 %vm8120_vm0, %v4244_v10 }
0x1288   :  { %v4347_v58 = vpop.permute.xlu1 %4346  ;;  %6482 = vmatmul.mubr.msk.f32.vlgmr.msra.gmra.mxu0 %vm8121_vm8, %v4246_v56  ;;  %vm8136_vm8 = vcmask 261248  }
0x1289   :  { %6485 = vmatpush3.msra.mxu0 %v4351_v48 }
0x128a   :  { %6486 = vmatprep.subr.mxu0 %v4349_v41  ;;  %v4345_v40 = vpop.permute.xlu0 %4344 }
0x128b   :  { %6487 = vmatpush3.msra.mxu0 %v4349_v41  ;;  %6488 = vmatprep.mubr.msk.f32.mxu0 %vm8122_vm9, %v4345_v40  ;;  %vm8137_vm9 = vmmov %vm8136_vm8 }
0x128c   :  { %6491 = vmatprep.subr.mxu0 %v4450_v3  ;;  %v4446_v62 = vpop.permute.xlu1 %4445  ;;  %6489 = vmatmul.mubr.msk.f32.vlgmr.msra.gmra.mxu0 %vm8123_vm10, %v4347_v58  ;;  %vm8138_vm10 = vcmask 392448  }
0x128d   :  { %6492 = vmatpush3.msra.mxu0 %v4450_v3 }
0x128e   :  { %6493 = vmatprep.subr.mxu0 %v7821_v42  ;;  %v4444_v5 = vpop.permute.xlu0 %4443 }
0x128f   :  { %6494 = vmatpush3.msra.mxu0 %v7821_v42  ;;  %6495 = vmatprep.mubr.msk.f32.mxu0 %vm8124_vm11, %v4444_v5  ;;  %v5837_v42 = vcombine.high %v2924_v43, %v2926_v46  ;;  %vm8139_vm11 = vmmov %vm8138_vm10  ;;  %v6714_v43 = vld [vmem:[#allocation8 + $0xd0] ss:$8 sps:$4 sm:$0xff]   ;;  %v6717_v46 = vld [vmem:[#allocation8 + $0xc0] ss:$8 sps:$4 sm:$0xff]  }
0x1290   :  { %6498 = vmatprep.subr.mxu0 %v4549_v27  ;;  %v4545_v30 = vpop.permute.xlu1 %4544  ;;  %6496 = vmatmul.mubr.msk.f32.vlgmr.msra.gmra.mxu0 %vm8125_vm12, %v4446_v62  ;;  %vm8140_vm12 = vcmask 523648  }
0x1291   :  { %6499 = vmatpush3.msra.mxu0 %v4549_v27 }
0x1292   :  { %6500 = vmatprep.subr.mxu0 %v7823_v45  ;;  %v4543_v7 = vpop.permute.xlu0 %4542 }
0x1293   :  { %6501 = vmatpush3.msra.mxu0 %v7823_v45  ;;  %6502 = vmatprep.mubr.msk.f32.mxu0 %vm8126_vm13, %v4543_v7  ;;  %v2920_v45 = vld [vmem:[#allocation6 + $0x148] sm:$0xff]  ;;  %vm8141_vm13 = vmmov %vm8140_vm12 }
0x1294   :  { %6505 = vmatprep.subr.mxu0 %v4648_v55  ;;  %v4644_v8 = vpop.permute.xlu1 %4643  ;;  %6503 = vmatmul.mubr.msk.f32.vlgmr.msra.gmra.mxu0 %vm8127_vm1, %v4545_v30  ;;  %v5836_v36 = vcombine.high %v2920_v45, %v2922_v47  ;;  %vm8142_vm1 = vcmask 654848   ;;  %v6725_v45 = vld [vmem:[#allocation8 + $0xa4] ss:$8 sps:$4 sm:$0xff]   ;;  %v6723_v47 = vld [vmem:[#allocation8 + $0xa0] ss:$8 sps:$4 sm:$0xff]  }
0x1295   :  { %6506 = vmatpush3.msra.mxu0 %v4648_v55 }
0x1296   :  { %6507 = vmatprep.subr.mxu0 %v7825_v49  ;;  %v4642_v9 = vpop.permute.xlu0 %4641 }
0x1297   :  { %6508 = vmatpush3.msra.mxu0 %v7825_v49  ;;  %6509 = vmatprep.mubr.msk.f32.mxu0 %vm8128_vm4, %v4642_v9  ;;  %vm8143_vm4 = vmmov %vm8142_vm1 }
0x1298   :  { %6512 = vmatprep.subr.mxu0 %v4747_v63  ;;  %v4743_v11 = vpop.permute.xlu1 %4742  ;;  %6510 = vmatmul.mubr.msk.f32.vlgmr.msra.gmra.mxu0 %vm8129_vm2, %v4644_v8  ;;  %vm8144_vm2 = vcmask 786048  }
0x1299   :  { %6513 = vmatpush3.msra.mxu0 %v4747_v63 }
0x129a   :  { %6514 = vmatprep.subr.mxu0 %v4745_v2  ;;  %v4844_v12 = vpop.permute.xlu0 %4843 }
0x129b   :  { %6515 = vmatpush3.msra.mxu0 %v4745_v2  ;;  %6521 = vmatprep.subr.mxu1 %v4844_v12 }
0x129c   :  { %v4741_v14 = vpop.permute.xlu1 %4740  ;;  %6522 = vmatpush3.msra.mxu1 %v4844_v12  ;;  %6526 = vmatprep.subr.bf16.mxu0 %v6947_v28 }
0x129d   :  { %6516 = vmatprep.mubr.msk.f32.mxu0 %vm8130_vm5, %v4741_v14  ;;  %vm8145_vm5 = vmmov %vm8144_vm2  ;;  %5156 = vmatprep.subr.bf16.mxu1 %v6710_v31 }
0x129e   :  { %6517 = vmatmul.mubr.msk.f32.vlgmr.msra.gmra.mxu0 %vm8131_vm7, %v4743_v11  ;;  %v4840_v15 = vpop.permute.xlu0 %4839  ;;  %vm8146_vm7 = vcmask 917248  }
0x129f   :  { %6523 = vmatprep.mubr.msk.f32.mxu1 %vm8132_vm3, %v4840_v15  ;;  %6542 = vmatprep.mubr.msk.bf16.mxu0 %vm8133_vm14, %v6947_v28  ;;  %vm8147_vm3 = vmmov %vm8146_vm7  ;;  %vm8148_vm14 = vcmask 1048448   ;;  %v4941_v15 = vld [vmem:[#allocation12 + $0x49] ss:$0 sm:$0xff] }
0x12a0   :  { %v4842_v60 = vpop.permute.xlu1 %4841  ;;  %6527 = vmatpush3.bf16.msra.mxu0 %v5841_v24 }
0x12a1   :  { %6524 = vmatmul.mubr.msk.f32.vlgmr.msra.gmra.mxu1 %vm8134_vm6, %v4842_v60  ;;  %6528 = vmatprep.subr.bf16.mxu0 %v6947_v28  ;;  %vm8149_vm6 = vmmov %vm8148_vm14 }
0x12a2   :  { %5188 = vmatprep.mubr.bf16.mxu1 %v6946_v0 }
0x12a4   :  { %6529 = vmatpush3.bf16.msra.mxu0 %v5840_v13  ;;  %v6708_v13 = vld [vmem:[#allocation8 + $0xf0] ss:$8 sps:$4 sm:$0xff]  }
0x12a5   :  { %6530 = vmatprep.subr.bf16.mxu0 %v6947_v28  ;;  %5157 = vmatpush1.bf16.msra.mxu1 %v6708_v13 }
0x12a8   :  { %6531 = vmatpush3.bf16.msra.mxu0 %v5839_v54 }
0x12a9   :  { %6532 = vmatprep.subr.bf16.mxu0 %v6947_v28 }
0x12ac   :  { %6533 = vmatpush3.bf16.msra.mxu0 %v5838_v38  ;;  %v6716_v38 = vld [vmem:[#allocation8 + $0xd4] ss:$8 sps:$4 sm:$0xff]  }
0x12ad   :  { %6534 = vmatprep.subr.bf16.mxu0 %v6947_v28 }
0x12b0   :  { %6535 = vmatpush3.bf16.msra.mxu0 %v5837_v42  ;;  %v6720_v42 = vld [vmem:[#allocation8 + $0xb0] ss:$8 sps:$4 sm:$0xff]  }
0x12b1   :  { %6536 = vmatprep.subr.bf16.mxu0 %v6947_v28 }
0x12b4   :  { %6537 = vmatpush3.bf16.msra.mxu0 %v5836_v36  ;;  %v6732_v36 = vld [vmem:[#allocation9 + $0xf8] sm:$0xff]  }
0x12b5   :  { %6538 = vmatprep.subr.bf16.mxu0 %v6947_v28 }
0x12b8   :  { %6539 = vmatpush3.bf16.msra.mxu0 %v5835_v52  ;;  %v6734_v52 = vld [vmem:[#allocation9 + $0xf0] sm:$0xff]  }
0x12b9   :  { %6540 = vmatprep.subr.bf16.mxu0 %v6947_v28 }
0x12bc   :  { %6541 = vmatpush3.bf16.msra.mxu0 %v5834_v59  ;;  %v6738_v59 = vld [vmem:[#allocation9 + $0xe0] sm:$0xff]  }
0x12bd   :  { %6140 = vmatprep.subr.bf16.mxu0 %v6732_v36  ;;  %v6750_v36 = vld [vmem:[#allocation11 + $0x74] ss:$8 sps:$4 sm:$0xff]  }
0x12d5   :  { %v6476_v61 = vpop.f32.mrf.mxu0 }
0x12d6   :  { %4242 = vst.msk [vmem:[#allocation3 + $0x8] sm:$0xff] %vm8135_vm15, %v6476_v61 }
0x12d7   :  { %v4232_v17 = vpop.f32.mrf.mxu0 }
0x12d8   :  { %4241 = vst.msk [vmem:[#allocation3] sm:$0xff] %vm8120_vm0, %v4232_v17 }
0x1348   :  { %v6483_v34 = vpop.f32.mrf.mxu0 }
0x1349   :  { %4338 = vrot.lane.b32.xlu1 %v6483_v34, %s6934_s28 }
0x134a   :  { %v4325_v35 = vpop.f32.mrf.mxu0 }
0x134b   :  { %4336 = vrot.lane.b32.xlu0 %v4325_v35, %s6934_s28 }
0x134c   :  { %v6490_v21 = vpop.f32.mrf.mxu0 }
0x134d   :  { %4437 = vrot.lane.b32.xlu1 %v6490_v21, %s6954_s18  ;;  %v6713_v21 = vld [vmem:[#allocation8 + $0xe4] ss:$8 sps:$4 sm:$0xff]  }
0x134e   :  { %v4424_v37 = vpop.f32.mrf.mxu0  ;;  %5158 = vmatprep.subr.bf16.mxu1 %v6713_v21 }
0x134f   :  { %4435 = vrot.lane.b32.xlu0 %v4424_v37, %s6954_s18  ;;  %v6711_v37 = vld [vmem:[#allocation8 + $0xe0] ss:$8 sps:$4 sm:$0xff]  }
0x1350   :  { %v6497_v51 = vpop.f32.mrf.mxu0  ;;  %5159 = vmatpush1.bf16.msra.mxu1 %v6711_v37 }
0x1351   :  { %4536 = vrot.lane.b32.xlu1 %v6497_v51, %s6953_s17  ;;  %5160 = vmatprep.subr.bf16.mxu1 %v6716_v38  ;;  %v6719_v51 = vld [vmem:[#allocation8 + $0xc4] ss:$8 sps:$4 sm:$0xff]  }
0x1352   :  { %v4523_v41 = vpop.f32.mrf.mxu0 }
0x1353   :  { %4534 = vrot.lane.b32.xlu0 %v4523_v41, %s6953_s17  ;;  %v6722_v41 = vld [vmem:[#allocation8 + $0xb4] ss:$8 sps:$4 sm:$0xff]  }
0x1354   :  { %v6504_v49 = vpop.f32.mrf.mxu0  ;;  %5161 = vmatpush1.bf16.msra.mxu1 %v6714_v43  ;;  %v5238_v43 = vld [vmem:[#allocation12 + $0x4b] ss:$0 sm:$0xff] }
0x1355   :  { %4635 = vrot.lane.b32.xlu1 %v6504_v49, %s6937_s13  ;;  %5162 = vmatprep.subr.bf16.mxu1 %v6719_v51  ;;  %v6728_v49 = vld [vmem:[#allocation8 + $0x94] ss:$8 sps:$4 sm:$0xff]  }
0x1356   :  { %v4622_v33 = vpop.f32.mrf.mxu0 }
0x1357   :  { %4633 = vrot.lane.b32.xlu0 %v4622_v33, %s6937_s13  ;;  %v6729_v33 = vld [vmem:[#allocation8 + $0x80] ss:$8 sps:$4 sm:$0xff]  }
0x1358   :  { %v6511_v39 = vpop.f32.mrf.mxu0  ;;  %5163 = vmatpush1.bf16.msra.mxu1 %v6717_v46 }
0x1359   :  { %4734 = vrot.lane.b32.xlu1 %v6511_v39, %s6950_s0  ;;  %5164 = vmatprep.subr.bf16.mxu1 %v6722_v41  ;;  %v6733_v39 = vld [vmem:[#allocation9 + $0xb8] sm:$0xff]  }
0x135a   :  { %v4721_v57 = vpop.f32.mrf.mxu0 }
0x135b   :  { %4732 = vrot.lane.b32.xlu0 %v4721_v57, %s6950_s0  ;;  %v6737_v57 = vld [vmem:[#allocation9 + $0xa8] sm:$0xff]  }
0x135c   :  { %5165 = vmatpush1.bf16.msra.mxu1 %v6720_v42 }
0x135d   :  { %5166 = vmatprep.subr.bf16.mxu1 %v6725_v45 }
0x135e   :  { %v6518_v4 = vpop.f32.mrf.mxu0 }
0x135f   :  { %4833 = vrot.lane.b32.xlu1 %v6518_v4, %s6952_s2  ;;  %v6739_v4 = vld [vmem:[#allocation9 + $0xa0] sm:$0xff]  }
0x1360   :  { %v4820_v48 = vpop.f32.mrf.mxu0  ;;  %5167 = vmatpush1.bf16.msra.mxu1 %v6723_v47 }
0x1361   :  { %4831 = vrot.lane.b32.xlu0 %v4820_v48, %s6952_s2  ;;  %v6525_v3 = vpop.f32.mrf.mxu1  ;;  %5168 = vmatprep.subr.bf16.mxu1 %v6728_v49  ;;  %v6740_v48 = vld [vmem:[#allocation9 + $0xd8] sm:$0xff]  }
0x1363   :  { %4932 = vrot.lane.b32.xlu1 %v6525_v3, %s6951_s6  ;;  %v4919_v27 = vpop.f32.mrf.mxu1  ;;  %v6741_v3 = vld [vmem:[#allocation9 + $0x98] sm:$0xff]  }
0x1364   :  { %5169 = vmatpush1.bf16.msra.mxu1 %v6726_v50 }
0x1365   :  { %4930 = vrot.lane.b32.xlu0 %v4919_v27, %s6951_s6  ;;  %5170 = vmatprep.subr.bf16.mxu1 %v6731_v29 }
0x1368   :  { %5171 = vmatpush1.bf16.msra.mxu1 %v6729_v33  ;;  %v6748_v33 = vld [vmem:[#allocation11 + $0x70] ss:$8 sps:$4 sm:$0xff]  }
0x1369   :  { %5516 = vmatprep.subr.bf16.mxu1 %v6750_v36 }
0x13bb   :  { %v4339_v55 = vpop.permute.xlu1 %4338 }
0x13bc   :  { %4343 = vst.msk [vmem:[#allocation3 + $0x8] sm:$0xff] %vm8136_vm8, %v4339_v55 }
0x13bd   :  { %v4337_v63 = vpop.permute.xlu0 %4336 }
0x13be   :  { %4342 = vst.msk [vmem:[#allocation3] sm:$0xff] %vm8137_vm9, %v4337_v63 }
0x13bf   :  { %v4438_v28 = vpop.permute.xlu1 %4437 }
0x13c0   :  { %4442 = vst.msk [vmem:[#allocation3 + $0x8] sm:$0xff] %vm8138_vm10, %v4438_v28 }
0x13c1   :  { %v4436_v2 = vpop.permute.xlu0 %4435 }
0x13c2   :  { %4441 = vst.msk [vmem:[#allocation3] sm:$0xff] %vm8139_vm11, %v4436_v2 }
0x13c3   :  { %v4537_v56 = vpop.permute.xlu1 %4536 }
0x13c4   :  { %4541 = vst.msk [vmem:[#allocation3 + $0x8] sm:$0xff] %vm8140_vm12, %v4537_v56 }
0x13c5   :  { %v4535_v10 = vpop.permute.xlu0 %4534 }
0x13c6   :  { %4540 = vst.msk [vmem:[#allocation3] sm:$0xff] %vm8141_vm13, %v4535_v10 }
0x13c7   :  { %v4636_v58 = vpop.permute.xlu1 %4635 }
0x13c8   :  { %4640 = vst.msk [vmem:[#allocation3 + $0x8] sm:$0xff] %vm8142_vm1, %v4636_v58 }
0x13c9   :  { %v4634_v40 = vpop.permute.xlu0 %4633 }
0x13ca   :  { %4639 = vst.msk [vmem:[#allocation3] sm:$0xff] %vm8143_vm4, %v4634_v40  ;;  %v5017_v40 = vld [vmem:[#allocation12 + $0x4c] ss:$0 sm:$0xff] }
0x13cb   :  { %v4735_v62 = vpop.permute.xlu1 %4734 }
0x13cc   :  { %4739 = vst.msk [vmem:[#allocation3 + $0x8] sm:$0xff] %vm8144_vm2, %v4735_v62 }
0x13cd   :  { %v4733_v5 = vpop.permute.xlu0 %4732 }
0x13ce   :  { %4738 = vst.msk [vmem:[#allocation3] sm:$0xff] %vm8145_vm5, %v4733_v5 }
0x13d1   :  { %v4834_v30 = vpop.permute.xlu1 %4833 }
0x13d2   :  { %4838 = vst.msk [vmem:[#allocation3 + $0x8] sm:$0xff] %vm8146_vm7, %v4834_v30 }
0x13d3   :  { %v4832_v7 = vpop.permute.xlu0 %4831 }
0x13d4   :  { %4837 = vst.msk [vmem:[#allocation3] sm:$0xff] %vm8147_vm3, %v4832_v7  ;;  %v5018_v7 = vld [vmem:[#allocation12 + $0x4d] ss:$0 sm:$0xff] }
0x13d5   :  { %v4933_v8 = vpop.permute.xlu1 %4932 }
0x13d6   :  { %4937 = vst.msk [vmem:[#allocation3 + $0x8] sm:$0xff] %vm8148_vm14, %v4933_v8 }
0x13d7   :  { %v4931_v9 = vpop.permute.xlu0 %4930 }
0x13d8   :  { %4936 = vst.msk [vmem:[#allocation3] sm:$0xff] %vm8149_vm6, %v4931_v9 }
0x13dd   :  { %v4939_v12 = vld [vmem:[#allocation3 + $0x8] sm:$0xff] }
0x13df   :  { %v4938_v11 = vld [vmem:[#allocation3] sm:$0xff] }
0x13e0   :  { %v4940_v14 = vpack.c.bf16 %v4939_v12, %v4938_v11 }
0x13e2   :  { %6543 = vmatmul.mubr.bf16.vlgmr.msra.gmra.mxu0 %v4940_v14  ;;  %v6742_v14 = vld [vmem:[#allocation9 + $0xd0] sm:$0xff]  }
0x13e3   :  { %6141 = vmatpush3.bf16.msra.mxu0 %v6733_v39 }
0x13e4   :  { %6142 = vmatprep.subr.bf16.mxu0 %v6734_v52 }
0x13e7   :  { %6143 = vmatpush3.bf16.msra.mxu0 %v6735_v44 }
0x13e8   :  { %6144 = vmatprep.subr.bf16.mxu0 %v6736_v53 }
0x13eb   :  { %6145 = vmatpush3.bf16.msra.mxu0 %v6737_v57 }
0x13ec   :  { %6146 = vmatprep.subr.bf16.mxu0 %v6738_v59 }
0x13ef   :  { %6147 = vmatpush3.bf16.msra.mxu0 %v6739_v4 }
0x13f0   :  { %6148 = vmatprep.subr.bf16.mxu0 %v6740_v48 }
0x13f3   :  { %6149 = vmatpush3.bf16.msra.mxu0 %v6741_v3  ;;  %v6753_v3 = vld [vmem:[#allocation11 + $0x64] ss:$8 sps:$4 sm:$0xff]  }
0x13f4   :  { %6150 = vmatprep.subr.bf16.mxu0 %v6742_v14 }
0x14a2   :  { %v5008_v60 = vpop.f32.mrf.mxu0 }
0x14a3   :  { %v5009_v61 = vadd.f32 %v5008_v60, %v4941_v15  ;;  %v6744_v60 = vld [vmem:[#allocation9 + $0xc8] sm:$0xff]  }
0x14a4   :  { %v6544_v17 = vpop.f32.mrf.mxu0 }
0x14a5   :  { %v5015_v18 = vadd.f32 %v5009_v61, %v7563_v22  ;;  %v6745_v61 = vld [vmem:[#allocation9 + $0x88] sm:$0xff]   ;;  %v6746_v17 = vld [vmem:[#allocation9 + $0xc0] sm:$0xff]  }
0x14a6   :  { %v5011_v23 = vpop.f32.mrf.mxu0 }
0x14a7   :  { %v5012_v24 = vadd.f32 %v5011_v23, %v4941_v15  ;;  %5019 = vadd.xlane.f32.xlu0 %v5015_v18  ;;  %v6743_v15 = vld [vmem:[#allocation9 + $0x90] sm:$0xff]  }
0x14a8   :  { %v6545_v25 = vpop.f32.mrf.mxu0  ;;  %6151 = vmatpush3.bf16.msra.mxu0 %v6743_v15  ;;  %v5064_v23 = vld [vmem:[#allocation12 + $0x4a] ss:$8 sm:$0x3] }
0x14a9   :  { %v5016_v26 = vadd.f32 %v5012_v24, %v7565_v32  ;;  %6152 = vmatprep.subr.bf16.mxu0 %v6744_v60  ;;  %v5073_v25 = vrot.slane %v5064_v23, %v7063_v6 }
0x14ab   :  { %5021 = vadd.xlane.f32.xlu1 %v5016_v26 }
0x14ac   :  { %6153 = vmatpush3.bf16.msra.mxu0 %v6745_v61 }
0x14ad   :  { %6154 = vmatprep.subr.bf16.mxu0 %v6746_v17  ;;  %v5378_v17 = vld [vmem:[#allocation12 + $0x4e] ss:$0 sm:$0xff] }
0x1530   :  { %v5020_v20 = vpop.xlane.xlu0 %5019 }
0x1531   :  { %v5023_v34 = vmul.f32 0.0078125, %v5020_v20 }
0x1533   :  { %v7913_v35 = vsub.f32 %v5015_v18, %v5023_v34  ;;  %v6747_v18 = vld [vmem:[#allocation9 + $0x80] sm:$0xff]  }
0x1534   :  { %v5022_v54 = vpop.xlane.xlu1 %5021  ;;  %6155 = vmatpush3.bf16.msra.mxu0 %v6747_v18 }
0x1535   :  { %v5024_v16 = vmul.f32 0.0078125, %v5022_v54  ;;  %v5027_v22 = vmul.f32 %v7913_v35, %v7913_v35 }
0x1537   :  { %v7917_v19 = vsub.f32 %v5016_v26, %v5024_v16  ;;  %5029 = vadd.xlane.f32.xlu0 %v5027_v22  ;;  %v5069_v26 = vrot.slane %v5064_v23, %v7054_v1 }
0x1539   :  { %v5028_v32 = vmul.f32 %v7917_v19, %v7917_v19 }
0x153b   :  { %5031 = vadd.xlane.f32.xlu0 %v5028_v32 }
0x15c0   :  { %v5030_v27 = vpop.xlane.xlu0 %5029 }
0x15c1   :  { %v5033_v55 = vmul.f32 0.0078125, %v5030_v27  ;;  %v6751_v27 = vld [vmem:[#allocation11 + $0x60] ss:$8 sps:$4 sm:$0xff]  }
0x15c3   :  { %v5035_v63 = vadd.f32 1e-05, %v5033_v55  ;;  %v6756_v55 = vld [vmem:[#allocation11 + $0x54] ss:$8 sps:$4 sm:$0xff]  }
0x15c4   :  { %v5032_v28 = vpop.xlane.xlu0 %5031 }
0x15c5   :  { %6796 = vrsqrt.f32 %v5035_v63  ;;  %v5034_v2 = vmul.f32 0.0078125, %v5032_v28  ;;  %v6754_v63 = vld [vmem:[#allocation11 + $0x50] ss:$8 sps:$4 sm:$0xff]   ;;  %v6757_v28 = vld [vmem:[#allocation11 + $0x40] ss:$8 sps:$4 sm:$0xff]  }
0x15c7   :  { %v5036_v56 = vadd.f32 1e-05, %v5034_v2  ;;  %v6759_v2 = vld [vmem:[#allocation11 + $0x44] ss:$8 sps:$4 sm:$0xff]  }
0x15c9   :  { %6798 = vrsqrt.f32 %v5036_v56  ;;  %v6762_v56 = vld [vmem:[#allocation11 + $0x34] ss:$8 sps:$4 sm:$0xff]  }
0x15d2   :  { %v6797_v10 = vpop.eup %6796 }
0x15d3   :  { %v5039_v58 = vmul.f32 %v6797_v10, %v7913_v35  ;;  %v6760_v10 = vld [vmem:[#allocation11 + $0x30] ss:$8 sps:$4 sm:$0xff]  }
0x15d5   :  { %v5041_v30 = vmul.f32 %v5039_v58, %v5017_v40  ;;  %v6765_v58 = vld [vmem:[#allocation11 + $0x24] ss:$8 sps:$4 sm:$0xff]  }
0x15d6   :  { %v6799_v62 = vpop.eup %6798 }
0x15d7   :  { %v5040_v5 = vmul.f32 %v6799_v62, %v7917_v19  ;;  %v5043_v9 = vadd.f32 %v5041_v30, %v5018_v7  ;;  %v6768_v62 = vld [vmem:[#allocation11 + $0x14] ss:$8 sps:$4 sm:$0xff]   ;;  %v6771_v30 = vld [vmem:[#allocation11 + $0x4] ss:$8 sps:$4 sm:$0xff]  }
0x15d9   :  { %v5042_v8 = vmul.f32 %v5040_v5, %v5017_v40  ;;  %v6763_v40 = vld [vmem:[#allocation11 + $0x20] ss:$8 sps:$4 sm:$0xff]   ;;  %v6766_v5 = vld [vmem:[#allocation11 + $0x10] ss:$8 sps:$4 sm:$0xff]  }
0x15db   :  { %v5044_v11 = vadd.f32 %v5042_v8, %v5018_v7  ;;  %v6769_v7 = vld [vmem:[#allocation11] ss:$8 sps:$4 sm:$0xff]  }
0x15dd   :  { %v5045_v12 = vpack.c.bf16 %v5044_v11, %v5043_v9 }
0x15df   :  { %5189 = vmatmul.mubr.bf16.vlgmr.msra.gmra.mxu1 %v5045_v12 }
0x15e0   :  { %5548 = vmatprep.mubr.bf16.mxu1 %v6946_v0  ;;  %5517 = vmatpush1.bf16.msra.mxu1 %v6748_v33 }
0x15e1   :  { %5518 = vmatprep.subr.bf16.mxu1 %v6753_v3 }
0x15e4   :  { %5519 = vmatpush1.bf16.msra.mxu1 %v6751_v27 }
0x15e5   :  { %5520 = vmatprep.subr.bf16.mxu1 %v6756_v55 }
0x15e8   :  { %5521 = vmatpush1.bf16.msra.mxu1 %v6754_v63 }
0x15e9   :  { %5522 = vmatprep.subr.bf16.mxu1 %v6759_v2 }
0x15ec   :  { %5523 = vmatpush1.bf16.msra.mxu1 %v6757_v28 }
0x15ed   :  { %5524 = vmatprep.subr.bf16.mxu1 %v6762_v56 }
0x15f0   :  { %5525 = vmatpush1.bf16.msra.mxu1 %v6760_v10 }
0x15f1   :  { %5526 = vmatprep.subr.bf16.mxu1 %v6765_v58 }
0x15f4   :  { %5527 = vmatpush1.bf16.msra.mxu1 %v6763_v40 }
0x15f5   :  { %5528 = vmatprep.subr.bf16.mxu1 %v6768_v62 }
0x15f8   :  { %5529 = vmatpush1.bf16.msra.mxu1 %v6766_v5 }
0x15f9   :  { %5530 = vmatprep.subr.bf16.mxu1 %v6771_v30 }
0x15fc   :  { %5531 = vmatpush1.bf16.msra.mxu1 %v6769_v7 }
0x169f   :  { %v5190_v24 = vpop.f32.mrf.mxu1 }
0x16a0   :  { %v5191_v34 = vadd.f32 %v5190_v24, %v5069_v26 }
0x16a1   :  { %v5192_v13 = vpop.f32.mrf.mxu1 }
0x16a2   :  { %v5193_v31 = vadd.f32 %v5192_v13, %v5073_v25  ;;  %v5199_v32 = vmax.f32 %v5191_v34, 0.0 }
0x16a3   :  { %v5194_v0 = vpop.f32.mrf.mxu1 }
0x16a4   :  { %v5195_v20 = vadd.f32 %v5194_v0, %v5069_v26  ;;  %v5200_v22 = vmax.f32 %v5193_v31, 0.0 }
0x16a5   :  { %v5196_v35 = vpop.f32.mrf.mxu1 }
0x16a6   :  { %v5197_v54 = vadd.f32 %v5196_v35, %v5073_v25  ;;  %v5201_v16 = vmax.f32 %v5195_v20, 0.0  ;;  %v5379_v25 = vld [vmem:[#allocation12 + $0x4f] ss:$0 sm:$0xff]  ;;  %v5424_v20 = vld [vmem:[#allocation12 + $0x60] ss:$8 sm:$0x3] }
0x16a7   :  { %v5429_v34 = vrot.slane %v5424_v20, %v7054_v1  ;;  %v5433_v35 = vrot.slane %v5424_v20, %v7063_v6 }
0x16a8   :  { %v5202_v19 = vmax.f32 %v5197_v54, 0.0  ;;  %v5203_v37 = vpack.c.bf16 %v5201_v16, %v5199_v32 }
0x16aa   :  { %v5204_v21 = vpack.c.bf16 %v5202_v19, %v5200_v22 }
0x16ac   :  { %5367 = vmatprep.mubr.bf16.mxu0 %v5204_v21 }
0x16ad   :  { %5368 = vmatmul.mubr.bf16.vlgmr.msra.gmra.mxu0 %v5203_v37 }
0x176d   :  { %v6156_v38 = vpop.f32.mrf.mxu0 }
0x176f   :  { %v6157_v46 = vpop.f32.mrf.mxu0 }
0x1770   :  { %v6158_v51 = vadd.f32 %v6157_v46, %v6156_v38 }
0x1771   :  { %v6159_v41 = vpop.f32.mrf.mxu0 }
0x1772   :  { %v5370_v42 = vadd.f32 %v6158_v51, %v5238_v43 }
0x1773   :  { %v6160_v45 = vpop.f32.mrf.mxu0 }
0x1774   :  { %v6161_v47 = vadd.f32 %v6160_v45, %v6159_v41  ;;  %v5376_v49 = vadd.f32 %v5370_v42, %v5043_v9 }
0x1776   :  { %v5373_v50 = vadd.f32 %v6161_v47, %v5238_v43  ;;  %5380 = vadd.xlane.f32.xlu1 %v5376_v49 }
0x1778   :  { %v5377_v29 = vadd.f32 %v5373_v50, %v5044_v11 }
0x177a   :  { %5382 = vadd.xlane.f32.xlu0 %v5377_v29 }
0x17ff   :  { %v5381_v39 = vpop.xlane.xlu1 %5380 }
0x1800   :  { %v5384_v52 = vmul.f32 0.0078125, %v5381_v39 }
0x1802   :  { %v5386_v44 = vsub.f32 %v5376_v49, %v5384_v52 }
0x1803   :  { %v5383_v53 = vpop.xlane.xlu0 %5382 }
0x1804   :  { %v5385_v57 = vmul.f32 0.0078125, %v5383_v53  ;;  %v5388_v59 = vmul.f32 %v5386_v44, %v5386_v44 }
0x1806   :  { %v5387_v4 = vsub.f32 %v5377_v29, %v5385_v57  ;;  %5390 = vadd.xlane.f32.xlu1 %v5388_v59 }
0x1808   :  { %v5389_v48 = vmul.f32 %v5387_v4, %v5387_v4 }
0x180a   :  { %5392 = vadd.xlane.f32.xlu0 %v5389_v48 }
0x188f   :  { %v5391_v8 = vpop.xlane.xlu1 %5390 }
0x1890   :  { %v5394_v9 = vmul.f32 0.0078125, %v5391_v8 }
0x1892   :  { %v5396_v11 = vadd.f32 1e-05, %v5394_v9 }
0x1893   :  { %v5393_v12 = vpop.xlane.xlu0 %5392 }
0x1894   :  { %6800 = vrsqrt.f32 %v5396_v11  ;;  %v5395_v14 = vmul.f32 0.0078125, %v5393_v12 }
0x1896   :  { %v5397_v15 = vadd.f32 1e-05, %v5395_v14 }
0x1898   :  { %6802 = vrsqrt.f32 %v5397_v15 }
0x18a1   :  { %v6801_v60 = vpop.eup %6800 }
0x18a2   :  { %v5400_v61 = vmul.f32 %v6801_v60, %v5386_v44 }
0x18a4   :  { %v5402_v24 = vmul.f32 %v5400_v61, %v5378_v17 }
0x18a5   :  { %v6803_v18 = vpop.eup %6802 }
0x18a6   :  { %v5401_v23 = vmul.f32 %v6803_v18, %v5387_v4  ;;  %v5404_v13 = vadd.f32 %v5402_v24, %v5379_v25 }
0x18a8   :  { %v5403_v26 = vmul.f32 %v5401_v23, %v5378_v17 }
0x18aa   :  { %v5405_v0 = vadd.f32 %v5403_v26, %v5379_v25 }
0x18ac   :  { %v5406_v31 = vpack.c.bf16 %v5405_v0, %v5404_v13 }
0x18ae   :  { %5549 = vmatmul.mubr.bf16.vlgmr.msra.gmra.mxu1 %v5406_v31 }
0x196e   :  { %v5550_v54 = vpop.f32.mrf.mxu1 }
0x196f   :  { %v5551_v16 = vadd.f32 %v5550_v54, %v5429_v34 }
0x1970   :  { %v5552_v22 = vpop.f32.mrf.mxu1 }
0x1971   :  { %5559 = vst [vmem:[%s7947_s7] sm:$0xff] %v5551_v16  ;;  %v5553_v19 = vadd.f32 %v5552_v22, %v5433_v35 }
0x1972   :  { %v5554_v32 = vpop.f32.mrf.mxu1 }
0x1973   :  { %5560 = vst [vmem:[%s7947_s7 + $0x8] sm:$0xff] %v5553_v19  ;;  %v5555_v21 = vadd.f32 %v5554_v32, %v5429_v34 }
0x1974   :  { %v5556_v37 = vpop.f32.mrf.mxu1 }
0x1975   :  { %5561 = vst [vmem:[%s7947_s7 + $0x10] sm:$0xff] %v5555_v21  ;;  %v5557_v1 = vadd.f32 %v5556_v37, %v5433_v35 }
0x1977   :  { %5562 = vst [vmem:[%s7947_s7 + $0x18] sm:$0xff] %v5557_v1 }
0x1978   :  { %5567 = vsyncpa [#allocation5], 1 }
0x1979   :  { %5568 = vsyncpa [#allocation7], 1 }
0x197a   :  { %5569 = vsyncpa [#allocation10], 1 }
0x197b   :  { %5570 = vsyncpa [#allocation13], 1 }

</bundles_post_ra>
